<compile_context>
chip_gen: v6e
topology: v6e:2x2x1
jax: 0.10.0
libtpu: 0.0.40
codegen_flags: <defaults>
</compile_context>

<pallas_src>
import functools

import jax
import jax.numpy as jnp
import numpy as np
from jax.experimental import pallas as pl
from jax.experimental.pallas import tpu as pltpu


def _lstm_recurrent_kernel(gx_ref, whh_ref, hout_ref, h_scr, c_scr,
                           *, hidden, tt):
    """One grid step == TT LSTM timesteps for one batch tile.

    gx_ref  : (TT, TB, 4H) f32   precomputed x @ W_ih^T + (b_ih + b_hh)
    whh_ref : (H, 4H)      bf16  recurrent weights (pre-transposed, 1-buffered)
    hout_ref: (TB, H)      f32   last-timestep hidden state for this batch tile
    h_scr/c_scr: (TB, H)   f32   recurrent state carried across time blocks
    """
    t_blk = pl.program_id(1)

    @pl.when(t_blk == 0)
    def _():
        h_scr[...] = jnp.zeros_like(h_scr)
        c_scr[...] = jnp.zeros_like(c_scr)

    H = hidden

    def sig(z):
        # sigmoid(z) = 0.5 * tanh(0.5*z) + 0.5 : a single EUP push per element
        # instead of exp + reciprocal.
        return 0.5 * jnp.tanh(0.5 * z) + 0.5

    def step(i, carry):
        h, c = carry
        gx = gx_ref[i]                                     # (TB, 4H) f32
        # Serial recurrent matmul: bf16 operands (weight sourced straight from
        # VMEM, not hoisted into vregs), f32 accumulation on the MXU.
        gates = gx + jnp.dot(h.astype(jnp.bfloat16), whh_ref[...],
                             preferred_element_type=jnp.float32)
        # PyTorch gate order [i, f, g, o]; H is a multiple of 128 so every
        # slice below is lane-aligned.  i & f share one fused tanh over 2H.
        if_g = sig(gates[:, 0:2 * H])
        i_g = if_g[:, :H]
        f_g = if_g[:, H:]
        g_g = jnp.tanh(gates[:, 2 * H:3 * H])
        o_g = sig(gates[:, 3 * H:4 * H])
        c_new = f_g * c + i_g * g_g
        h_new = o_g * jnp.tanh(c_new)
        return h_new, c_new

    h_fin, c_fin = jax.lax.fori_loop(0, tt, step, (h_scr[...], c_scr[...]),
                                     unroll=True)
    h_scr[...] = h_fin
    c_scr[...] = c_fin

    @pl.when(t_blk == pl.num_programs(1) - 1)
    def _():
        hout_ref[...] = h_fin


def mouse_lstm_forward(x, params, *, tt=16, tb=None):
    """x: (B, T, D) float32 (PyTorch batch_first layout). Returns (B, O)."""
    B, T, D = x.shape
    Hp = params["w_hh_t"].shape[0]           # padded hidden size (128-multiple)
    G = 4 * Hp
    O = params["w_fc_t"].shape[1]

    # --- Batch: pad to a sublane multiple (>= 8); padded rows are discarded.
    # tb is the per-grid-step batch tile; on v7x pick tb ~= B_pad/2 (multiple
    # of 8) so the leading "parallel" axis spreads across both TensorCores.
    if tb is None:
        tb_ = max(8, ((B + 7) // 8) * 8)      # one tile by default
    else:
        tb_ = max(8, ((tb + 7) // 8) * 8)
    B_pad = ((max(B, tb_) + tb_ - 1) // tb_) * tb_
    if B_pad != B:
        x = jnp.pad(x, ((0, B_pad - B), (0, 0), (0, 0)))
    n_btiles = B_pad // tb_

    # --- Hoisted input projection, emitted directly time-major.  Only the
    # small x tensor is transposed (B,T,D)->(T,B,D); the big (T,B,4Hp) gates
    # tensor comes straight out of the matmul with no HBM transpose pass.
    x_t = jnp.transpose(x, (1, 0, 2))                              # (T, B, D)
    gates = jnp.einsum("tbd,dg->tbg", x_t, params["w_ih_t"]) + params["b_gates"]

    # --- Front-pad time to a multiple of tt (exact: zero gates keep h=c=0).
    t_pad = (-T) % tt
    if t_pad:
        gates = jnp.pad(gates, ((t_pad, 0), (0, 0), (0, 0)))
    t_total = T + t_pad
    n_blocks = t_total // tt

    kernel = functools.partial(_lstm_recurrent_kernel, hidden=Hp, tt=tt)

    # --- Explicit VMEM budget: double-buffered gates stream + single-buffered
    # bf16 W_hh + resident output + h/c scratch, with 1.5x headroom.
    gates_buf = 2 * tt * tb_ * G * 4
    whh_buf = Hp * G * 2
    out_buf = 2 * tb_ * Hp * 4
    scr_buf = 2 * tb_ * Hp * 4
    vmem_needed = gates_buf + whh_buf + out_buf + scr_buf
    vmem_limit = int(min(64 << 20,                       # safe on v7x (64 MiB)
                         max(16 << 20, int(vmem_needed * 1.5) + (1 << 20))))

    cost = pl.CostEstimate(
        flops=2 * B_pad * Hp * G * t_total + 10 * B_pad * Hp * t_total,
        transcendentals=5 * B_pad * Hp * t_total,
        bytes_accessed=t_total * B_pad * G * 4 + Hp * G * 2 + B_pad * Hp * 4,
    )

    h_last = pl.pallas_call(
        kernel,
        out_shape=jax.ShapeDtypeStruct((B_pad, Hp), jnp.float32),
        grid_spec=pltpu.PrefetchScalarGridSpec(
            num_scalar_prefetch=0,
            grid=(n_btiles, n_blocks),
            in_specs=[
                # streamed gates block for this (batch tile, time block)
                pl.BlockSpec((tt, tb_, G), lambda b, t: (t, b, 0)),
                # constant-index recurrent weight: single-buffered bf16
                pl.BlockSpec((Hp, G), lambda b, t: (0, 0),
                             pipeline_mode=pl.Buffered(buffer_count=1)),
            ],
            out_specs=pl.BlockSpec((tb_, Hp), lambda b, t: (b, 0)),
            scratch_shapes=[
                pltpu.VMEM((tb_, Hp), jnp.float32),   # h state
                pltpu.VMEM((tb_, Hp), jnp.float32),   # c state
            ],
        ),
        compiler_params=pltpu.CompilerParams(
            dimension_semantics=("parallel", "arbitrary"),  # batch || , time serial
            vmem_limit_bytes=vmem_limit,
        ),
        cost_estimate=cost,
    )(gates, params["w_hh_t"])

    # --- Final FC on the last hidden state: tiny, plain XLA matmul.
    return h_last[:B] @ params["w_fc_t"] + params["b_fc"]


def init_params(key, input_size, hidden_size, output_size, *, lane=128):
    """PyTorch-style uniform init, packed into kernel-friendly layout.

    Hidden size is zero-padded per gate to a multiple of 128 so gate slices
    are lane-aligned; the padding is mathematically exact for the forward.
    """
    H, D, O = hidden_size, input_size, output_size
    ks = jax.random.split(key, 6)
    s = 1.0 / np.sqrt(H)
    w_ih = jax.random.uniform(ks[0], (4 * H, D), jnp.float32, -s, s)
    w_hh = jax.random.uniform(ks[1], (4 * H, H), jnp.float32, -s, s)
    b_ih = jax.random.uniform(ks[2], (4 * H,), jnp.float32, -s, s)
    b_hh = jax.random.uniform(ks[3], (4 * H,), jnp.float32, -s, s)
    w_fc = jax.random.uniform(ks[4], (O, H), jnp.float32, -s, s)
    b_fc = jax.random.uniform(ks[5], (O,), jnp.float32, -s, s)

    Hp = ((H + lane - 1) // lane) * lane
    pad_h = Hp - H

    def pad_gate_rows(w):                                  # (4H, X) -> (4Hp, X)
        w4 = w.reshape(4, H, -1)
        return jnp.pad(w4, ((0, 0), (0, pad_h), (0, 0))).reshape(4 * Hp, -1)

    w_ih_p = pad_gate_rows(w_ih)                                     # (4Hp, D)
    w_hh_p = jnp.pad(pad_gate_rows(w_hh), ((0, 0), (0, pad_h)))      # (4Hp, Hp)
    b_p = jnp.pad((b_ih + b_hh).reshape(4, H),
                  ((0, 0), (0, pad_h))).reshape(1, 4 * Hp)           # (1, 4Hp)
    w_fc_p = jnp.pad(w_fc, ((0, 0), (0, pad_h)))                     # (O, Hp)

    return {
        "w_ih_t": w_ih_p.T,                                   # (D, 4Hp) f32
        "w_hh_t": jnp.asarray(w_hh_p.T, jnp.bfloat16),        # (Hp, 4Hp) bf16
        "b_gates": b_p,                                       # (1, 4Hp) f32
        "w_fc_t": w_fc_p.T,                                   # (Hp, O) f32
        "b_fc": b_fc.reshape(1, -1),                          # (1, O) f32
        # Unpadded originals for the pure-JAX reference.
        "ref": {"w_ih": w_ih, "w_hh": w_hh, "b": b_ih + b_hh,
                "w_fc": w_fc, "b_fc": b_fc, "H": H},
    }


def reference_forward(x, params):
    """Pure-JAX replica of torch.nn.LSTM + Linear (unpadded weights).

    Mirrors the kernel's numerical policy (bf16 recurrent-matmul operands with
    f32 accumulation, tanh-form sigmoid); everything else is float32.
    Note: vs. a pure-f32 PyTorch LSTM this drifts slowly with sequence length.
    """
    r = params["ref"]
    B, T, D = x.shape
    H = r["H"]
    w_ih_t = r["w_ih"].T
    w_hh_t = r["w_hh"].T.astype(jnp.bfloat16)
    b = r["b"].reshape(1, -1)

    def sig(z):
        return 0.5 * jnp.tanh(0.5 * z) + 0.5

    h = jnp.zeros((B, H), jnp.float32)
    c = jnp.zeros((B, H), jnp.float32)
    for t in range(T):
        gates = (x[:, t, :] @ w_ih_t
                 + jnp.dot(h.astype(jnp.bfloat16), w_hh_t,
                           preferred_element_type=jnp.float32)
                 + b)
        i = sig(gates[:, 0 * H:1 * H])
        f = sig(gates[:, 1 * H:2 * H])
        g = jnp.tanh(gates[:, 2 * H:3 * H])
        o = sig(gates[:, 3 * H:4 * H])
        c = f * c + i * g
        h = o * jnp.tanh(c)
    return h @ r["w_fc"].T + r["b_fc"].reshape(1, -1)


if __name__ == "__main__":
    # Small, deterministic shapes: batch=2 (padded to 8 internally), seq=20
    # (front-padded to 32 with tt=16), input=16, hidden=32 (padded to 128),
    # output=8.
    B, T, D, H, O = 2, 20, 16, 32, 8
    key = jax.random.PRNGKey(0)
    k_x, k_p = jax.random.split(key)
    x = jax.random.normal(k_x, (B, T, D), jnp.float32)
    params = init_params(k_p, D, H, O)

    fwd = jax.jit(functools.partial(mouse_lstm_forward, tt=16))
    out = jax.block_until_ready(fwd(x, params))

    ref = reference_forward(x, params)
    np.testing.assert_allclose(np.asarray(out), np.asarray(ref),
                               rtol=1e-3, atol=1e-3)

    print("KERNEL_OK")
</pallas_src>

<mosaic_0001>
module attributes {stable_mosaic.version = 11 : i64} {
  func.func @_lstm_recurrent_kernel(%arg0: i32, %arg1: i32, %arg2: memref<16x8x512xf32, #tpu.memory_space<vmem>>, %arg3: memref<128x512xbf16, #tpu.memory_space<vmem>>, %arg4: memref<8x128xf32, #tpu.memory_space<vmem>>, %arg5: memref<8x128xf32, #tpu.memory_space<vmem>>, %arg6: memref<8x128xf32, #tpu.memory_space<vmem>>) attributes {dimension_semantics = [#tpu.dimension_semantics<parallel>, #tpu.dimension_semantics<arbitrary>], iteration_bounds = array<i64: 1, 2>, scalar_prefetch = 0 : i64, scratch_operands = 2 : i64, tpu.core_type = #tpu.core_type<tc>, window_params = [{transform_indices = @transform_0, window_bounds = array<i64: 16, 8, 512>}, {pipeline_mode = #tpu.pipeline_mode<synchronous>, transform_indices = @transform_1, window_bounds = array<i64: 128, 512>}, {transform_indices = @transform_2, window_bounds = array<i64: 8, 128>}]} {
    %c0_i32 = arith.constant 0 : i32
    %0 = arith.cmpi eq, %arg1, %c0_i32 : i32
    %1 = arith.extui %0 : i1 to i32
    %c0_i32_0 = arith.constant 0 : i32
    %2 = arith.cmpi ne, %1, %c0_i32_0 : i32
    scf.if %2 {
      %cst_186 = arith.constant 0.000000e+00 : f32
      %522 = vector.broadcast %cst_186 : f32 to vector<8x128xf32>
      %c0_187 = arith.constant 0 : index
      %c0_188 = arith.constant 0 : index
      %523 = vector.load %arg5[%c0_187, %c0_188] : memref<8x128xf32, #tpu.memory_space<vmem>>, vector<8x128xf32>
      tpu.vector_store %arg5[%c0_187, %c0_188], %522 {strides = array<i32>} : memref<8x128xf32, #tpu.memory_space<vmem>>, vector<8x128xf32>,
      %cst_189 = arith.constant 0.000000e+00 : f32
      %524 = vector.broadcast %cst_189 : f32 to vector<8x128xf32>
      %c0_190 = arith.constant 0 : index
      %c0_191 = arith.constant 0 : index
      %525 = vector.load %arg6[%c0_190, %c0_191] : memref<8x128xf32, #tpu.memory_space<vmem>>, vector<8x128xf32>
      tpu.vector_store %arg6[%c0_190, %c0_191], %524 {strides = array<i32>} : memref<8x128xf32, #tpu.memory_space<vmem>>, vector<8x128xf32>,
    } else {
    }
    %c0 = arith.constant 0 : index
    %c0_1 = arith.constant 0 : index
    %3 = vector.load %arg5[%c0, %c0_1] : memref<8x128xf32, #tpu.memory_space<vmem>>, vector<8x128xf32>
    %c0_2 = arith.constant 0 : index
    %c0_3 = arith.constant 0 : index
    %4 = vector.load %arg6[%c0_2, %c0_3] : memref<8x128xf32, #tpu.memory_space<vmem>>, vector<8x128xf32>
    %c0_i32_4 = arith.constant 0 : i32
    %5 = arith.index_cast %c0_i32_4 : i32 to index
    %c0_5 = arith.constant 0 : index
    %c0_6 = arith.constant 0 : index
    %6 = vector.load %arg2[%5, %c0_5, %c0_6] : memref<16x8x512xf32, #tpu.memory_space<vmem>>, vector<1x8x512xf32>
    %7 = vector.shape_cast %6 : vector<1x8x512xf32> to vector<8x512xf32>
    %8 = arith.truncf %3 : vector<8x128xf32> to vector<8x128xbf16>
    %c0_7 = arith.constant 0 : index
    %c0_8 = arith.constant 0 : index
    %9 = vector.load %arg3[%c0_7, %c0_8] : memref<128x512xbf16, #tpu.memory_space<vmem>>, vector<128x512xbf16>
    %cst = arith.constant dense<0.000000e+00> : vector<8x512xf32>
    %10 = tpu.matmul %8, %9, %cst {dimension_numbers = #tpu.dot_dimension_numbers<[1], [0], [0], [1], [0, 0, 1, 1], [], []>} : vector<8x128xbf16>, vector<128x512xbf16>, vector<8x512xf32> -> vector<8x512xf32>
    %11 = arith.addf %7, %10 : vector<8x512xf32>
    %12 = vector.extract_strided_slice %11 {offsets = [0, 0], sizes = [8, 256], strides = [1, 1]} : vector<8x512xf32> to vector<8x256xf32>
    %cst_9 = arith.constant 5.000000e-01 : f32
    %13 = vector.broadcast %cst_9 : f32 to vector<8x256xf32>
    %14 = arith.mulf %13, %12 : vector<8x256xf32>
    %15 = math.tanh %14 : vector<8x256xf32>
    %cst_10 = arith.constant 5.000000e-01 : f32
    %16 = vector.broadcast %cst_10 : f32 to vector<8x256xf32>
    %17 = arith.mulf %16, %15 : vector<8x256xf32>
    %cst_11 = arith.constant 5.000000e-01 : f32
    %18 = vector.broadcast %cst_11 : f32 to vector<8x256xf32>
    %19 = arith.addf %17, %18 : vector<8x256xf32>
    %20 = vector.extract_strided_slice %19 {offsets = [0, 0], sizes = [8, 128], strides = [1, 1]} : vector<8x256xf32> to vector<8x128xf32>
    %21 = vector.extract_strided_slice %19 {offsets = [0, 128], sizes = [8, 128], strides = [1, 1]} : vector<8x256xf32> to vector<8x128xf32>
    %22 = vector.extract_strided_slice %11 {offsets = [0, 256], sizes = [8, 128], strides = [1, 1]} : vector<8x512xf32> to vector<8x128xf32>
    %23 = math.tanh %22 : vector<8x128xf32>
    %24 = vector.extract_strided_slice %11 {offsets = [0, 384], sizes = [8, 128], strides = [1, 1]} : vector<8x512xf32> to vector<8x128xf32>
    %cst_12 = arith.constant 5.000000e-01 : f32
    %25 = vector.broadcast %cst_12 : f32 to vector<8x128xf32>
    %26 = arith.mulf %25, %24 : vector<8x128xf32>
    %27 = math.tanh %26 : vector<8x128xf32>
    %cst_13 = arith.constant 5.000000e-01 : f32
    %28 = vector.broadcast %cst_13 : f32 to vector<8x128xf32>
    %29 = arith.mulf %28, %27 : vector<8x128xf32>
    %cst_14 = arith.constant 5.000000e-01 : f32
    %30 = vector.broadcast %cst_14 : f32 to vector<8x128xf32>
    %31 = arith.addf %29, %30 : vector<8x128xf32>
    %32 = arith.mulf %21, %4 : vector<8x128xf32>
    %33 = arith.mulf %20, %23 : vector<8x128xf32>
    %34 = arith.addf %32, %33 : vector<8x128xf32>
    %35 = math.tanh %34 : vector<8x128xf32>
    %36 = arith.mulf %31, %35 : vector<8x128xf32>
    %c1_i32 = arith.constant 1 : i32
    %37 = arith.index_cast %c1_i32 : i32 to index
    %c0_15 = arith.constant 0 : index
    %c0_16 = arith.constant 0 : index
    %38 = vector.load %arg2[%37, %c0_15, %c0_16] : memref<16x8x512xf32, #tpu.memory_space<vmem>>, vector<1x8x512xf32>
    %39 = vector.shape_cast %38 : vector<1x8x512xf32> to vector<8x512xf32>
    %40 = arith.truncf %36 : vector<8x128xf32> to vector<8x128xbf16>
    %c0_17 = arith.constant 0 : index
    %c0_18 = arith.constant 0 : index
    %41 = vector.load %arg3[%c0_17, %c0_18] : memref<128x512xbf16, #tpu.memory_space<vmem>>, vector<128x512xbf16>
    %cst_19 = arith.constant dense<0.000000e+00> : vector<8x512xf32>
    %42 = tpu.matmul %40, %41, %cst_19 {dimension_numbers = #tpu.dot_dimension_numbers<[1], [0], [0], [1], [0, 0, 1, 1], [], []>} : vector<8x128xbf16>, vector<128x512xbf16>, vector<8x512xf32> -> vector<8x512xf32>
    %43 = arith.addf %39, %42 : vector<8x512xf32>
    %44 = vector.extract_strided_slice %43 {offsets = [0, 0], sizes = [8, 256], strides = [1, 1]} : vector<8x512xf32> to vector<8x256xf32>
    %cst_20 = arith.constant 5.000000e-01 : f32
    %45 = vector.broadcast %cst_20 : f32 to vector<8x256xf32>
    %46 = arith.mulf %45, %44 : vector<8x256xf32>
    %47 = math.tanh %46 : vector<8x256xf32>
    %cst_21 = arith.constant 5.000000e-01 : f32
    %48 = vector.broadcast %cst_21 : f32 to vector<8x256xf32>
    %49 = arith.mulf %48, %47 : vector<8x256xf32>
    %cst_22 = arith.constant 5.000000e-01 : f32
    %50 = vector.broadcast %cst_22 : f32 to vector<8x256xf32>
    %51 = arith.addf %49, %50 : vector<8x256xf32>
    %52 = vector.extract_strided_slice %51 {offsets = [0, 0], sizes = [8, 128], strides = [1, 1]} : vector<8x256xf32> to vector<8x128xf32>
    %53 = vector.extract_strided_slice %51 {offsets = [0, 128], sizes = [8, 128], strides = [1, 1]} : vector<8x256xf32> to vector<8x128xf32>
    %54 = vector.extract_strided_slice %43 {offsets = [0, 256], sizes = [8, 128], strides = [1, 1]} : vector<8x512xf32> to vector<8x128xf32>
    %55 = math.tanh %54 : vector<8x128xf32>
    %56 = vector.extract_strided_slice %43 {offsets = [0, 384], sizes = [8, 128], strides = [1, 1]} : vector<8x512xf32> to vector<8x128xf32>
    %cst_23 = arith.constant 5.000000e-01 : f32
    %57 = vector.broadcast %cst_23 : f32 to vector<8x128xf32>
    %58 = arith.mulf %57, %56 : vector<8x128xf32>
    %59 = math.tanh %58 : vector<8x128xf32>
    %cst_24 = arith.constant 5.000000e-01 : f32
    %60 = vector.broadcast %cst_24 : f32 to vector<8x128xf32>
    %61 = arith.mulf %60, %59 : vector<8x128xf32>
    %cst_25 = arith.constant 5.000000e-01 : f32
    %62 = vector.broadcast %cst_25 : f32 to vector<8x128xf32>
    %63 = arith.addf %61, %62 : vector<8x128xf32>
    %64 = arith.mulf %53, %34 : vector<8x128xf32>
    %65 = arith.mulf %52, %55 : vector<8x128xf32>
    %66 = arith.addf %64, %65 : vector<8x128xf32>
    %67 = math.tanh %66 : vector<8x128xf32>
    %68 = arith.mulf %63, %67 : vector<8x128xf32>
    %c2_i32 = arith.constant 2 : i32
    %69 = arith.index_cast %c2_i32 : i32 to index
    %c0_26 = arith.constant 0 : index
    %c0_27 = arith.constant 0 : index
    %70 = vector.load %arg2[%69, %c0_26, %c0_27] : memref<16x8x512xf32, #tpu.memory_space<vmem>>, vector<1x8x512xf32>
    %71 = vector.shape_cast %70 : vector<1x8x512xf32> to vector<8x512xf32>
    %72 = arith.truncf %68 : vector<8x128xf32> to vector<8x128xbf16>
    %c0_28 = arith.constant 0 : index
    %c0_29 = arith.constant 0 : index
    %73 = vector.load %arg3[%c0_28, %c0_29] : memref<128x512xbf16, #tpu.memory_space<vmem>>, vector<128x512xbf16>
    %cst_30 = arith.constant dense<0.000000e+00> : vector<8x512xf32>
    %74 = tpu.matmul %72, %73, %cst_30 {dimension_numbers = #tpu.dot_dimension_numbers<[1], [0], [0], [1], [0, 0, 1, 1], [], []>} : vector<8x128xbf16>, vector<128x512xbf16>, vector<8x512xf32> -> vector<8x512xf32>
    %75 = arith.addf %71, %74 : vector<8x512xf32>
    %76 = vector.extract_strided_slice %75 {offsets = [0, 0], sizes = [8, 256], strides = [1, 1]} : vector<8x512xf32> to vector<8x256xf32>
    %cst_31 = arith.constant 5.000000e-01 : f32
    %77 = vector.broadcast %cst_31 : f32 to vector<8x256xf32>
    %78 = arith.mulf %77, %76 : vector<8x256xf32>
    %79 = math.tanh %78 : vector<8x256xf32>
    %cst_32 = arith.constant 5.000000e-01 : f32
    %80 = vector.broadcast %cst_32 : f32 to vector<8x256xf32>
    %81 = arith.mulf %80, %79 : vector<8x256xf32>
    %cst_33 = arith.constant 5.000000e-01 : f32
    %82 = vector.broadcast %cst_33 : f32 to vector<8x256xf32>
    %83 = arith.addf %81, %82 : vector<8x256xf32>
    %84 = vector.extract_strided_slice %83 {offsets = [0, 0], sizes = [8, 128], strides = [1, 1]} : vector<8x256xf32> to vector<8x128xf32>
    %85 = vector.extract_strided_slice %83 {offsets = [0, 128], sizes = [8, 128], strides = [1, 1]} : vector<8x256xf32> to vector<8x128xf32>
    %86 = vector.extract_strided_slice %75 {offsets = [0, 256], sizes = [8, 128], strides = [1, 1]} : vector<8x512xf32> to vector<8x128xf32>
    %87 = math.tanh %86 : vector<8x128xf32>
    %88 = vector.extract_strided_slice %75 {offsets = [0, 384], sizes = [8, 128], strides = [1, 1]} : vector<8x512xf32> to vector<8x128xf32>
    %cst_34 = arith.constant 5.000000e-01 : f32
    %89 = vector.broadcast %cst_34 : f32 to vector<8x128xf32>
    %90 = arith.mulf %89, %88 : vector<8x128xf32>
    %91 = math.tanh %90 : vector<8x128xf32>
    %cst_35 = arith.constant 5.000000e-01 : f32
    %92 = vector.broadcast %cst_35 : f32 to vector<8x128xf32>
    %93 = arith.mulf %92, %91 : vector<8x128xf32>
    %cst_36 = arith.constant 5.000000e-01 : f32
    %94 = vector.broadcast %cst_36 : f32 to vector<8x128xf32>
    %95 = arith.addf %93, %94 : vector<8x128xf32>
    %96 = arith.mulf %85, %66 : vector<8x128xf32>
    %97 = arith.mulf %84, %87 : vector<8x128xf32>
    %98 = arith.addf %96, %97 : vector<8x128xf32>
    %99 = math.tanh %98 : vector<8x128xf32>
    %100 = arith.mulf %95, %99 : vector<8x128xf32>
    %c3_i32 = arith.constant 3 : i32
    %101 = arith.index_cast %c3_i32 : i32 to index
    %c0_37 = arith.constant 0 : index
    %c0_38 = arith.constant 0 : index
    %102 = vector.load %arg2[%101, %c0_37, %c0_38] : memref<16x8x512xf32, #tpu.memory_space<vmem>>, vector<1x8x512xf32>
    %103 = vector.shape_cast %102 : vector<1x8x512xf32> to vector<8x512xf32>
    %104 = arith.truncf %100 : vector<8x128xf32> to vector<8x128xbf16>
    %c0_39 = arith.constant 0 : index
    %c0_40 = arith.constant 0 : index
    %105 = vector.load %arg3[%c0_39, %c0_40] : memref<128x512xbf16, #tpu.memory_space<vmem>>, vector<128x512xbf16>
    %cst_41 = arith.constant dense<0.000000e+00> : vector<8x512xf32>
    %106 = tpu.matmul %104, %105, %cst_41 {dimension_numbers = #tpu.dot_dimension_numbers<[1], [0], [0], [1], [0, 0, 1, 1], [], []>} : vector<8x128xbf16>, vector<128x512xbf16>, vector<8x512xf32> -> vector<8x512xf32>
    %107 = arith.addf %103, %106 : vector<8x512xf32>
    %108 = vector.extract_strided_slice %107 {offsets = [0, 0], sizes = [8, 256], strides = [1, 1]} : vector<8x512xf32> to vector<8x256xf32>
    %cst_42 = arith.constant 5.000000e-01 : f32
    %109 = vector.broadcast %cst_42 : f32 to vector<8x256xf32>
    %110 = arith.mulf %109, %108 : vector<8x256xf32>
    %111 = math.tanh %110 : vector<8x256xf32>
    %cst_43 = arith.constant 5.000000e-01 : f32
    %112 = vector.broadcast %cst_43 : f32 to vector<8x256xf32>
    %113 = arith.mulf %112, %111 : vector<8x256xf32>
    %cst_44 = arith.constant 5.000000e-01 : f32
    %114 = vector.broadcast %cst_44 : f32 to vector<8x256xf32>
    %115 = arith.addf %113, %114 : vector<8x256xf32>
    %116 = vector.extract_strided_slice %115 {offsets = [0, 0], sizes = [8, 128], strides = [1, 1]} : vector<8x256xf32> to vector<8x128xf32>
    %117 = vector.extract_strided_slice %115 {offsets = [0, 128], sizes = [8, 128], strides = [1, 1]} : vector<8x256xf32> to vector<8x128xf32>
    %118 = vector.extract_strided_slice %107 {offsets = [0, 256], sizes = [8, 128], strides = [1, 1]} : vector<8x512xf32> to vector<8x128xf32>
    %119 = math.tanh %118 : vector<8x128xf32>
    %120 = vector.extract_strided_slice %107 {offsets = [0, 384], sizes = [8, 128], strides = [1, 1]} : vector<8x512xf32> to vector<8x128xf32>
    %cst_45 = arith.constant 5.000000e-01 : f32
    %121 = vector.broadcast %cst_45 : f32 to vector<8x128xf32>
    %122 = arith.mulf %121, %120 : vector<8x128xf32>
    %123 = math.tanh %122 : vector<8x128xf32>
    %cst_46 = arith.constant 5.000000e-01 : f32
    %124 = vector.broadcast %cst_46 : f32 to vector<8x128xf32>
    %125 = arith.mulf %124, %123 : vector<8x128xf32>
    %cst_47 = arith.constant 5.000000e-01 : f32
    %126 = vector.broadcast %cst_47 : f32 to vector<8x128xf32>
    %127 = arith.addf %125, %126 : vector<8x128xf32>
    %128 = arith.mulf %117, %98 : vector<8x128xf32>
    %129 = arith.mulf %116, %119 : vector<8x128xf32>
    %130 = arith.addf %128, %129 : vector<8x128xf32>
    %131 = math.tanh %130 : vector<8x128xf32>
    %132 = arith.mulf %127, %131 : vector<8x128xf32>
    %c4_i32 = arith.constant 4 : i32
    %133 = arith.index_cast %c4_i32 : i32 to index
    %c0_48 = arith.constant 0 : index
    %c0_49 = arith.constant 0 : index
    %134 = vector.load %arg2[%133, %c0_48, %c0_49] : memref<16x8x512xf32, #tpu.memory_space<vmem>>, vector<1x8x512xf32>
    %135 = vector.shape_cast %134 : vector<1x8x512xf32> to vector<8x512xf32>
    %136 = arith.truncf %132 : vector<8x128xf32> to vector<8x128xbf16>
    %c0_50 = arith.constant 0 : index
    %c0_51 = arith.constant 0 : index
    %137 = vector.load %arg3[%c0_50, %c0_51] : memref<128x512xbf16, #tpu.memory_space<vmem>>, vector<128x512xbf16>
    %cst_52 = arith.constant dense<0.000000e+00> : vector<8x512xf32>
    %138 = tpu.matmul %136, %137, %cst_52 {dimension_numbers = #tpu.dot_dimension_numbers<[1], [0], [0], [1], [0, 0, 1, 1], [], []>} : vector<8x128xbf16>, vector<128x512xbf16>, vector<8x512xf32> -> vector<8x512xf32>
    %139 = arith.addf %135, %138 : vector<8x512xf32>
    %140 = vector.extract_strided_slice %139 {offsets = [0, 0], sizes = [8, 256], strides = [1, 1]} : vector<8x512xf32> to vector<8x256xf32>
    %cst_53 = arith.constant 5.000000e-01 : f32
    %141 = vector.broadcast %cst_53 : f32 to vector<8x256xf32>
    %142 = arith.mulf %141, %140 : vector<8x256xf32>
    %143 = math.tanh %142 : vector<8x256xf32>
    %cst_54 = arith.constant 5.000000e-01 : f32
    %144 = vector.broadcast %cst_54 : f32 to vector<8x256xf32>
    %145 = arith.mulf %144, %143 : vector<8x256xf32>
    %cst_55 = arith.constant 5.000000e-01 : f32
    %146 = vector.broadcast %cst_55 : f32 to vector<8x256xf32>
    %147 = arith.addf %145, %146 : vector<8x256xf32>
    %148 = vector.extract_strided_slice %147 {offsets = [0, 0], sizes = [8, 128], strides = [1, 1]} : vector<8x256xf32> to vector<8x128xf32>
    %149 = vector.extract_strided_slice %147 {offsets = [0, 128], sizes = [8, 128], strides = [1, 1]} : vector<8x256xf32> to vector<8x128xf32>
    %150 = vector.extract_strided_slice %139 {offsets = [0, 256], sizes = [8, 128], strides = [1, 1]} : vector<8x512xf32> to vector<8x128xf32>
    %151 = math.tanh %150 : vector<8x128xf32>
    %152 = vector.extract_strided_slice %139 {offsets = [0, 384], sizes = [8, 128], strides = [1, 1]} : vector<8x512xf32> to vector<8x128xf32>
    %cst_56 = arith.constant 5.000000e-01 : f32
    %153 = vector.broadcast %cst_56 : f32 to vector<8x128xf32>
    %154 = arith.mulf %153, %152 : vector<8x128xf32>
    %155 = math.tanh %154 : vector<8x128xf32>
    %cst_57 = arith.constant 5.000000e-01 : f32
    %156 = vector.broadcast %cst_57 : f32 to vector<8x128xf32>
    %157 = arith.mulf %156, %155 : vector<8x128xf32>
    %cst_58 = arith.constant 5.000000e-01 : f32
    %158 = vector.broadcast %cst_58 : f32 to vector<8x128xf32>
    %159 = arith.addf %157, %158 : vector<8x128xf32>
    %160 = arith.mulf %149, %130 : vector<8x128xf32>
    %161 = arith.mulf %148, %151 : vector<8x128xf32>
    %162 = arith.addf %160, %161 : vector<8x128xf32>
    %163 = math.tanh %162 : vector<8x128xf32>
    %164 = arith.mulf %159, %163 : vector<8x128xf32>
    %c5_i32 = arith.constant 5 : i32
    %165 = arith.index_cast %c5_i32 : i32 to index
    %c0_59 = arith.constant 0 : index
    %c0_60 = arith.constant 0 : index
    %166 = vector.load %arg2[%165, %c0_59, %c0_60] : memref<16x8x512xf32, #tpu.memory_space<vmem>>, vector<1x8x512xf32>
    %167 = vector.shape_cast %166 : vector<1x8x512xf32> to vector<8x512xf32>
    %168 = arith.truncf %164 : vector<8x128xf32> to vector<8x128xbf16>
    %c0_61 = arith.constant 0 : index
    %c0_62 = arith.constant 0 : index
    %169 = vector.load %arg3[%c0_61, %c0_62] : memref<128x512xbf16, #tpu.memory_space<vmem>>, vector<128x512xbf16>
    %cst_63 = arith.constant dense<0.000000e+00> : vector<8x512xf32>
    %170 = tpu.matmul %168, %169, %cst_63 {dimension_numbers = #tpu.dot_dimension_numbers<[1], [0], [0], [1], [0, 0, 1, 1], [], []>} : vector<8x128xbf16>, vector<128x512xbf16>, vector<8x512xf32> -> vector<8x512xf32>
    %171 = arith.addf %167, %170 : vector<8x512xf32>
    %172 = vector.extract_strided_slice %171 {offsets = [0, 0], sizes = [8, 256], strides = [1, 1]} : vector<8x512xf32> to vector<8x256xf32>
    %cst_64 = arith.constant 5.000000e-01 : f32
    %173 = vector.broadcast %cst_64 : f32 to vector<8x256xf32>
    %174 = arith.mulf %173, %172 : vector<8x256xf32>
    %175 = math.tanh %174 : vector<8x256xf32>
    %cst_65 = arith.constant 5.000000e-01 : f32
    %176 = vector.broadcast %cst_65 : f32 to vector<8x256xf32>
    %177 = arith.mulf %176, %175 : vector<8x256xf32>
    %cst_66 = arith.constant 5.000000e-01 : f32
    %178 = vector.broadcast %cst_66 : f32 to vector<8x256xf32>
    %179 = arith.addf %177, %178 : vector<8x256xf32>
    %180 = vector.extract_strided_slice %179 {offsets = [0, 0], sizes = [8, 128], strides = [1, 1]} : vector<8x256xf32> to vector<8x128xf32>
    %181 = vector.extract_strided_slice %179 {offsets = [0, 128], sizes = [8, 128], strides = [1, 1]} : vector<8x256xf32> to vector<8x128xf32>
    %182 = vector.extract_strided_slice %171 {offsets = [0, 256], sizes = [8, 128], strides = [1, 1]} : vector<8x512xf32> to vector<8x128xf32>
    %183 = math.tanh %182 : vector<8x128xf32>
    %184 = vector.extract_strided_slice %171 {offsets = [0, 384], sizes = [8, 128], strides = [1, 1]} : vector<8x512xf32> to vector<8x128xf32>
    %cst_67 = arith.constant 5.000000e-01 : f32
    %185 = vector.broadcast %cst_67 : f32 to vector<8x128xf32>
    %186 = arith.mulf %185, %184 : vector<8x128xf32>
    %187 = math.tanh %186 : vector<8x128xf32>
    %cst_68 = arith.constant 5.000000e-01 : f32
    %188 = vector.broadcast %cst_68 : f32 to vector<8x128xf32>
    %189 = arith.mulf %188, %187 : vector<8x128xf32>
    %cst_69 = arith.constant 5.000000e-01 : f32
    %190 = vector.broadcast %cst_69 : f32 to vector<8x128xf32>
    %191 = arith.addf %189, %190 : vector<8x128xf32>
    %192 = arith.mulf %181, %162 : vector<8x128xf32>
    %193 = arith.mulf %180, %183 : vector<8x128xf32>
    %194 = arith.addf %192, %193 : vector<8x128xf32>
    %195 = math.tanh %194 : vector<8x128xf32>
    %196 = arith.mulf %191, %195 : vector<8x128xf32>
    %c6_i32 = arith.constant 6 : i32
    %197 = arith.index_cast %c6_i32 : i32 to index
    %c0_70 = arith.constant 0 : index
    %c0_71 = arith.constant 0 : index
    %198 = vector.load %arg2[%197, %c0_70, %c0_71] : memref<16x8x512xf32, #tpu.memory_space<vmem>>, vector<1x8x512xf32>
    %199 = vector.shape_cast %198 : vector<1x8x512xf32> to vector<8x512xf32>
    %200 = arith.truncf %196 : vector<8x128xf32> to vector<8x128xbf16>
    %c0_72 = arith.constant 0 : index
    %c0_73 = arith.constant 0 : index
    %201 = vector.load %arg3[%c0_72, %c0_73] : memref<128x512xbf16, #tpu.memory_space<vmem>>, vector<128x512xbf16>
    %cst_74 = arith.constant dense<0.000000e+00> : vector<8x512xf32>
    %202 = tpu.matmul %200, %201, %cst_74 {dimension_numbers = #tpu.dot_dimension_numbers<[1], [0], [0], [1], [0, 0, 1, 1], [], []>} : vector<8x128xbf16>, vector<128x512xbf16>, vector<8x512xf32> -> vector<8x512xf32>
    %203 = arith.addf %199, %202 : vector<8x512xf32>
    %204 = vector.extract_strided_slice %203 {offsets = [0, 0], sizes = [8, 256], strides = [1, 1]} : vector<8x512xf32> to vector<8x256xf32>
    %cst_75 = arith.constant 5.000000e-01 : f32
    %205 = vector.broadcast %cst_75 : f32 to vector<8x256xf32>
    %206 = arith.mulf %205, %204 : vector<8x256xf32>
    %207 = math.tanh %206 : vector<8x256xf32>
    %cst_76 = arith.constant 5.000000e-01 : f32
    %208 = vector.broadcast %cst_76 : f32 to vector<8x256xf32>
    %209 = arith.mulf %208, %207 : vector<8x256xf32>
    %cst_77 = arith.constant 5.000000e-01 : f32
    %210 = vector.broadcast %cst_77 : f32 to vector<8x256xf32>
    %211 = arith.addf %209, %210 : vector<8x256xf32>
    %212 = vector.extract_strided_slice %211 {offsets = [0, 0], sizes = [8, 128], strides = [1, 1]} : vector<8x256xf32> to vector<8x128xf32>
    %213 = vector.extract_strided_slice %211 {offsets = [0, 128], sizes = [8, 128], strides = [1, 1]} : vector<8x256xf32> to vector<8x128xf32>
    %214 = vector.extract_strided_slice %203 {offsets = [0, 256], sizes = [8, 128], strides = [1, 1]} : vector<8x512xf32> to vector<8x128xf32>
    %215 = math.tanh %214 : vector<8x128xf32>
    %216 = vector.extract_strided_slice %203 {offsets = [0, 384], sizes = [8, 128], strides = [1, 1]} : vector<8x512xf32> to vector<8x128xf32>
    %cst_78 = arith.constant 5.000000e-01 : f32
    %217 = vector.broadcast %cst_78 : f32 to vector<8x128xf32>
    %218 = arith.mulf %217, %216 : vector<8x128xf32>
    %219 = math.tanh %218 : vector<8x128xf32>
    %cst_79 = arith.constant 5.000000e-01 : f32
    %220 = vector.broadcast %cst_79 : f32 to vector<8x128xf32>
    %221 = arith.mulf %220, %219 : vector<8x128xf32>
    %cst_80 = arith.constant 5.000000e-01 : f32
    %222 = vector.broadcast %cst_80 : f32 to vector<8x128xf32>
    %223 = arith.addf %221, %222 : vector<8x128xf32>
    %224 = arith.mulf %213, %194 : vector<8x128xf32>
    %225 = arith.mulf %212, %215 : vector<8x128xf32>
    %226 = arith.addf %224, %225 : vector<8x128xf32>
    %227 = math.tanh %226 : vector<8x128xf32>
    %228 = arith.mulf %223, %227 : vector<8x128xf32>
    %c7_i32 = arith.constant 7 : i32
    %229 = arith.index_cast %c7_i32 : i32 to index
    %c0_81 = arith.constant 0 : index
    %c0_82 = arith.constant 0 : index
    %230 = vector.load %arg2[%229, %c0_81, %c0_82] : memref<16x8x512xf32, #tpu.memory_space<vmem>>, vector<1x8x512xf32>
    %231 = vector.shape_cast %230 : vector<1x8x512xf32> to vector<8x512xf32>
    %232 = arith.truncf %228 : vector<8x128xf32> to vector<8x128xbf16>
    %c0_83 = arith.constant 0 : index
    %c0_84 = arith.constant 0 : index
    %233 = vector.load %arg3[%c0_83, %c0_84] : memref<128x512xbf16, #tpu.memory_space<vmem>>, vector<128x512xbf16>
    %cst_85 = arith.constant dense<0.000000e+00> : vector<8x512xf32>
    %234 = tpu.matmul %232, %233, %cst_85 {dimension_numbers = #tpu.dot_dimension_numbers<[1], [0], [0], [1], [0, 0, 1, 1], [], []>} : vector<8x128xbf16>, vector<128x512xbf16>, vector<8x512xf32> -> vector<8x512xf32>
    %235 = arith.addf %231, %234 : vector<8x512xf32>
    %236 = vector.extract_strided_slice %235 {offsets = [0, 0], sizes = [8, 256], strides = [1, 1]} : vector<8x512xf32> to vector<8x256xf32>
    %cst_86 = arith.constant 5.000000e-01 : f32
    %237 = vector.broadcast %cst_86 : f32 to vector<8x256xf32>
    %238 = arith.mulf %237, %236 : vector<8x256xf32>
    %239 = math.tanh %238 : vector<8x256xf32>
    %cst_87 = arith.constant 5.000000e-01 : f32
    %240 = vector.broadcast %cst_87 : f32 to vector<8x256xf32>
    %241 = arith.mulf %240, %239 : vector<8x256xf32>
    %cst_88 = arith.constant 5.000000e-01 : f32
    %242 = vector.broadcast %cst_88 : f32 to vector<8x256xf32>
    %243 = arith.addf %241, %242 : vector<8x256xf32>
    %244 = vector.extract_strided_slice %243 {offsets = [0, 0], sizes = [8, 128], strides = [1, 1]} : vector<8x256xf32> to vector<8x128xf32>
    %245 = vector.extract_strided_slice %243 {offsets = [0, 128], sizes = [8, 128], strides = [1, 1]} : vector<8x256xf32> to vector<8x128xf32>
    %246 = vector.extract_strided_slice %235 {offsets = [0, 256], sizes = [8, 128], strides = [1, 1]} : vector<8x512xf32> to vector<8x128xf32>
    %247 = math.tanh %246 : vector<8x128xf32>
    %248 = vector.extract_strided_slice %235 {offsets = [0, 384], sizes = [8, 128], strides = [1, 1]} : vector<8x512xf32> to vector<8x128xf32>
    %cst_89 = arith.constant 5.000000e-01 : f32
    %249 = vector.broadcast %cst_89 : f32 to vector<8x128xf32>
    %250 = arith.mulf %249, %248 : vector<8x128xf32>
    %251 = math.tanh %250 : vector<8x128xf32>
    %cst_90 = arith.constant 5.000000e-01 : f32
    %252 = vector.broadcast %cst_90 : f32 to vector<8x128xf32>
    %253 = arith.mulf %252, %251 : vector<8x128xf32>
    %cst_91 = arith.constant 5.000000e-01 : f32
    %254 = vector.broadcast %cst_91 : f32 to vector<8x128xf32>
    %255 = arith.addf %253, %254 : vector<8x128xf32>
    %256 = arith.mulf %245, %226 : vector<8x128xf32>
    %257 = arith.mulf %244, %247 : vector<8x128xf32>
    %258 = arith.addf %256, %257 : vector<8x128xf32>
    %259 = math.tanh %258 : vector<8x128xf32>
    %260 = arith.mulf %255, %259 : vector<8x128xf32>
    %c8_i32 = arith.constant 8 : i32
    %261 = arith.index_cast %c8_i32 : i32 to index
    %c0_92 = arith.constant 0 : index
    %c0_93 = arith.constant 0 : index
    %262 = vector.load %arg2[%261, %c0_92, %c0_93] : memref<16x8x512xf32, #tpu.memory_space<vmem>>, vector<1x8x512xf32>
    %263 = vector.shape_cast %262 : vector<1x8x512xf32> to vector<8x512xf32>
    %264 = arith.truncf %260 : vector<8x128xf32> to vector<8x128xbf16>
    %c0_94 = arith.constant 0 : index
    %c0_95 = arith.constant 0 : index
    %265 = vector.load %arg3[%c0_94, %c0_95] : memref<128x512xbf16, #tpu.memory_space<vmem>>, vector<128x512xbf16>
    %cst_96 = arith.constant dense<0.000000e+00> : vector<8x512xf32>
    %266 = tpu.matmul %264, %265, %cst_96 {dimension_numbers = #tpu.dot_dimension_numbers<[1], [0], [0], [1], [0, 0, 1, 1], [], []>} : vector<8x128xbf16>, vector<128x512xbf16>, vector<8x512xf32> -> vector<8x512xf32>
    %267 = arith.addf %263, %266 : vector<8x512xf32>
    %268 = vector.extract_strided_slice %267 {offsets = [0, 0], sizes = [8, 256], strides = [1, 1]} : vector<8x512xf32> to vector<8x256xf32>
    %cst_97 = arith.constant 5.000000e-01 : f32
    %269 = vector.broadcast %cst_97 : f32 to vector<8x256xf32>
    %270 = arith.mulf %269, %268 : vector<8x256xf32>
    %271 = math.tanh %270 : vector<8x256xf32>
    %cst_98 = arith.constant 5.000000e-01 : f32
    %272 = vector.broadcast %cst_98 : f32 to vector<8x256xf32>
    %273 = arith.mulf %272, %271 : vector<8x256xf32>
    %cst_99 = arith.constant 5.000000e-01 : f32
    %274 = vector.broadcast %cst_99 : f32 to vector<8x256xf32>
    %275 = arith.addf %273, %274 : vector<8x256xf32>
    %276 = vector.extract_strided_slice %275 {offsets = [0, 0], sizes = [8, 128], strides = [1, 1]} : vector<8x256xf32> to vector<8x128xf32>
    %277 = vector.extract_strided_slice %275 {offsets = [0, 128], sizes = [8, 128], strides = [1, 1]} : vector<8x256xf32> to vector<8x128xf32>
    %278 = vector.extract_strided_slice %267 {offsets = [0, 256], sizes = [8, 128], strides = [1, 1]} : vector<8x512xf32> to vector<8x128xf32>
    %279 = math.tanh %278 : vector<8x128xf32>
    %280 = vector.extract_strided_slice %267 {offsets = [0, 384], sizes = [8, 128], strides = [1, 1]} : vector<8x512xf32> to vector<8x128xf32>
    %cst_100 = arith.constant 5.000000e-01 : f32
    %281 = vector.broadcast %cst_100 : f32 to vector<8x128xf32>
    %282 = arith.mulf %281, %280 : vector<8x128xf32>
    %283 = math.tanh %282 : vector<8x128xf32>
    %cst_101 = arith.constant 5.000000e-01 : f32
    %284 = vector.broadcast %cst_101 : f32 to vector<8x128xf32>
    %285 = arith.mulf %284, %283 : vector<8x128xf32>
    %cst_102 = arith.constant 5.000000e-01 : f32
    %286 = vector.broadcast %cst_102 : f32 to vector<8x128xf32>
    %287 = arith.addf %285, %286 : vector<8x128xf32>
    %288 = arith.mulf %277, %258 : vector<8x128xf32>
    %289 = arith.mulf %276, %279 : vector<8x128xf32>
    %290 = arith.addf %288, %289 : vector<8x128xf32>
    %291 = math.tanh %290 : vector<8x128xf32>
    %292 = arith.mulf %287, %291 : vector<8x128xf32>
    %c9_i32 = arith.constant 9 : i32
    %293 = arith.index_cast %c9_i32 : i32 to index
    %c0_103 = arith.constant 0 : index
    %c0_104 = arith.constant 0 : index
    %294 = vector.load %arg2[%293, %c0_103, %c0_104] : memref<16x8x512xf32, #tpu.memory_space<vmem>>, vector<1x8x512xf32>
    %295 = vector.shape_cast %294 : vector<1x8x512xf32> to vector<8x512xf32>
    %296 = arith.truncf %292 : vector<8x128xf32> to vector<8x128xbf16>
    %c0_105 = arith.constant 0 : index
    %c0_106 = arith.constant 0 : index
    %297 = vector.load %arg3[%c0_105, %c0_106] : memref<128x512xbf16, #tpu.memory_space<vmem>>, vector<128x512xbf16>
    %cst_107 = arith.constant dense<0.000000e+00> : vector<8x512xf32>
    %298 = tpu.matmul %296, %297, %cst_107 {dimension_numbers = #tpu.dot_dimension_numbers<[1], [0], [0], [1], [0, 0, 1, 1], [], []>} : vector<8x128xbf16>, vector<128x512xbf16>, vector<8x512xf32> -> vector<8x512xf32>
    %299 = arith.addf %295, %298 : vector<8x512xf32>
    %300 = vector.extract_strided_slice %299 {offsets = [0, 0], sizes = [8, 256], strides = [1, 1]} : vector<8x512xf32> to vector<8x256xf32>
    %cst_108 = arith.constant 5.000000e-01 : f32
    %301 = vector.broadcast %cst_108 : f32 to vector<8x256xf32>
    %302 = arith.mulf %301, %300 : vector<8x256xf32>
    %303 = math.tanh %302 : vector<8x256xf32>
    %cst_109 = arith.constant 5.000000e-01 : f32
    %304 = vector.broadcast %cst_109 : f32 to vector<8x256xf32>
    %305 = arith.mulf %304, %303 : vector<8x256xf32>
    %cst_110 = arith.constant 5.000000e-01 : f32
    %306 = vector.broadcast %cst_110 : f32 to vector<8x256xf32>
    %307 = arith.addf %305, %306 : vector<8x256xf32>
    %308 = vector.extract_strided_slice %307 {offsets = [0, 0], sizes = [8, 128], strides = [1, 1]} : vector<8x256xf32> to vector<8x128xf32>
    %309 = vector.extract_strided_slice %307 {offsets = [0, 128], sizes = [8, 128], strides = [1, 1]} : vector<8x256xf32> to vector<8x128xf32>
    %310 = vector.extract_strided_slice %299 {offsets = [0, 256], sizes = [8, 128], strides = [1, 1]} : vector<8x512xf32> to vector<8x128xf32>
    %311 = math.tanh %310 : vector<8x128xf32>
    %312 = vector.extract_strided_slice %299 {offsets = [0, 384], sizes = [8, 128], strides = [1, 1]} : vector<8x512xf32> to vector<8x128xf32>
    %cst_111 = arith.constant 5.000000e-01 : f32
    %313 = vector.broadcast %cst_111 : f32 to vector<8x128xf32>
    %314 = arith.mulf %313, %312 : vector<8x128xf32>
    %315 = math.tanh %314 : vector<8x128xf32>
    %cst_112 = arith.constant 5.000000e-01 : f32
    %316 = vector.broadcast %cst_112 : f32 to vector<8x128xf32>
    %317 = arith.mulf %316, %315 : vector<8x128xf32>
    %cst_113 = arith.constant 5.000000e-01 : f32
    %318 = vector.broadcast %cst_113 : f32 to vector<8x128xf32>
    %319 = arith.addf %317, %318 : vector<8x128xf32>
    %320 = arith.mulf %309, %290 : vector<8x128xf32>
    %321 = arith.mulf %308, %311 : vector<8x128xf32>
    %322 = arith.addf %320, %321 : vector<8x128xf32>
    %323 = math.tanh %322 : vector<8x128xf32>
    %324 = arith.mulf %319, %323 : vector<8x128xf32>
    %c10_i32 = arith.constant 10 : i32
    %325 = arith.index_cast %c10_i32 : i32 to index
    %c0_114 = arith.constant 0 : index
    %c0_115 = arith.constant 0 : index
    %326 = vector.load %arg2[%325, %c0_114, %c0_115] : memref<16x8x512xf32, #tpu.memory_space<vmem>>, vector<1x8x512xf32>
    %327 = vector.shape_cast %326 : vector<1x8x512xf32> to vector<8x512xf32>
    %328 = arith.truncf %324 : vector<8x128xf32> to vector<8x128xbf16>
    %c0_116 = arith.constant 0 : index
    %c0_117 = arith.constant 0 : index
    %329 = vector.load %arg3[%c0_116, %c0_117] : memref<128x512xbf16, #tpu.memory_space<vmem>>, vector<128x512xbf16>
    %cst_118 = arith.constant dense<0.000000e+00> : vector<8x512xf32>
    %330 = tpu.matmul %328, %329, %cst_118 {dimension_numbers = #tpu.dot_dimension_numbers<[1], [0], [0], [1], [0, 0, 1, 1], [], []>} : vector<8x128xbf16>, vector<128x512xbf16>, vector<8x512xf32> -> vector<8x512xf32>
    %331 = arith.addf %327, %330 : vector<8x512xf32>
    %332 = vector.extract_strided_slice %331 {offsets = [0, 0], sizes = [8, 256], strides = [1, 1]} : vector<8x512xf32> to vector<8x256xf32>
    %cst_119 = arith.constant 5.000000e-01 : f32
    %333 = vector.broadcast %cst_119 : f32 to vector<8x256xf32>
    %334 = arith.mulf %333, %332 : vector<8x256xf32>
    %335 = math.tanh %334 : vector<8x256xf32>
    %cst_120 = arith.constant 5.000000e-01 : f32
    %336 = vector.broadcast %cst_120 : f32 to vector<8x256xf32>
    %337 = arith.mulf %336, %335 : vector<8x256xf32>
    %cst_121 = arith.constant 5.000000e-01 : f32
    %338 = vector.broadcast %cst_121 : f32 to vector<8x256xf32>
    %339 = arith.addf %337, %338 : vector<8x256xf32>
    %340 = vector.extract_strided_slice %339 {offsets = [0, 0], sizes = [8, 128], strides = [1, 1]} : vector<8x256xf32> to vector<8x128xf32>
    %341 = vector.extract_strided_slice %339 {offsets = [0, 128], sizes = [8, 128], strides = [1, 1]} : vector<8x256xf32> to vector<8x128xf32>
    %342 = vector.extract_strided_slice %331 {offsets = [0, 256], sizes = [8, 128], strides = [1, 1]} : vector<8x512xf32> to vector<8x128xf32>
    %343 = math.tanh %342 : vector<8x128xf32>
    %344 = vector.extract_strided_slice %331 {offsets = [0, 384], sizes = [8, 128], strides = [1, 1]} : vector<8x512xf32> to vector<8x128xf32>
    %cst_122 = arith.constant 5.000000e-01 : f32
    %345 = vector.broadcast %cst_122 : f32 to vector<8x128xf32>
    %346 = arith.mulf %345, %344 : vector<8x128xf32>
    %347 = math.tanh %346 : vector<8x128xf32>
    %cst_123 = arith.constant 5.000000e-01 : f32
    %348 = vector.broadcast %cst_123 : f32 to vector<8x128xf32>
    %349 = arith.mulf %348, %347 : vector<8x128xf32>
    %cst_124 = arith.constant 5.000000e-01 : f32
    %350 = vector.broadcast %cst_124 : f32 to vector<8x128xf32>
    %351 = arith.addf %349, %350 : vector<8x128xf32>
    %352 = arith.mulf %341, %322 : vector<8x128xf32>
    %353 = arith.mulf %340, %343 : vector<8x128xf32>
    %354 = arith.addf %352, %353 : vector<8x128xf32>
    %355 = math.tanh %354 : vector<8x128xf32>
    %356 = arith.mulf %351, %355 : vector<8x128xf32>
    %c11_i32 = arith.constant 11 : i32
    %357 = arith.index_cast %c11_i32 : i32 to index
    %c0_125 = arith.constant 0 : index
    %c0_126 = arith.constant 0 : index
    %358 = vector.load %arg2[%357, %c0_125, %c0_126] : memref<16x8x512xf32, #tpu.memory_space<vmem>>, vector<1x8x512xf32>
    %359 = vector.shape_cast %358 : vector<1x8x512xf32> to vector<8x512xf32>
    %360 = arith.truncf %356 : vector<8x128xf32> to vector<8x128xbf16>
    %c0_127 = arith.constant 0 : index
    %c0_128 = arith.constant 0 : index
    %361 = vector.load %arg3[%c0_127, %c0_128] : memref<128x512xbf16, #tpu.memory_space<vmem>>, vector<128x512xbf16>
    %cst_129 = arith.constant dense<0.000000e+00> : vector<8x512xf32>
    %362 = tpu.matmul %360, %361, %cst_129 {dimension_numbers = #tpu.dot_dimension_numbers<[1], [0], [0], [1], [0, 0, 1, 1], [], []>} : vector<8x128xbf16>, vector<128x512xbf16>, vector<8x512xf32> -> vector<8x512xf32>
    %363 = arith.addf %359, %362 : vector<8x512xf32>
    %364 = vector.extract_strided_slice %363 {offsets = [0, 0], sizes = [8, 256], strides = [1, 1]} : vector<8x512xf32> to vector<8x256xf32>
    %cst_130 = arith.constant 5.000000e-01 : f32
    %365 = vector.broadcast %cst_130 : f32 to vector<8x256xf32>
    %366 = arith.mulf %365, %364 : vector<8x256xf32>
    %367 = math.tanh %366 : vector<8x256xf32>
    %cst_131 = arith.constant 5.000000e-01 : f32
    %368 = vector.broadcast %cst_131 : f32 to vector<8x256xf32>
    %369 = arith.mulf %368, %367 : vector<8x256xf32>
    %cst_132 = arith.constant 5.000000e-01 : f32
    %370 = vector.broadcast %cst_132 : f32 to vector<8x256xf32>
    %371 = arith.addf %369, %370 : vector<8x256xf32>
    %372 = vector.extract_strided_slice %371 {offsets = [0, 0], sizes = [8, 128], strides = [1, 1]} : vector<8x256xf32> to vector<8x128xf32>
    %373 = vector.extract_strided_slice %371 {offsets = [0, 128], sizes = [8, 128], strides = [1, 1]} : vector<8x256xf32> to vector<8x128xf32>
    %374 = vector.extract_strided_slice %363 {offsets = [0, 256], sizes = [8, 128], strides = [1, 1]} : vector<8x512xf32> to vector<8x128xf32>
    %375 = math.tanh %374 : vector<8x128xf32>
    %376 = vector.extract_strided_slice %363 {offsets = [0, 384], sizes = [8, 128], strides = [1, 1]} : vector<8x512xf32> to vector<8x128xf32>
    %cst_133 = arith.constant 5.000000e-01 : f32
    %377 = vector.broadcast %cst_133 : f32 to vector<8x128xf32>
    %378 = arith.mulf %377, %376 : vector<8x128xf32>
    %379 = math.tanh %378 : vector<8x128xf32>
    %cst_134 = arith.constant 5.000000e-01 : f32
    %380 = vector.broadcast %cst_134 : f32 to vector<8x128xf32>
    %381 = arith.mulf %380, %379 : vector<8x128xf32>
    %cst_135 = arith.constant 5.000000e-01 : f32
    %382 = vector.broadcast %cst_135 : f32 to vector<8x128xf32>
    %383 = arith.addf %381, %382 : vector<8x128xf32>
    %384 = arith.mulf %373, %354 : vector<8x128xf32>
    %385 = arith.mulf %372, %375 : vector<8x128xf32>
    %386 = arith.addf %384, %385 : vector<8x128xf32>
    %387 = math.tanh %386 : vector<8x128xf32>
    %388 = arith.mulf %383, %387 : vector<8x128xf32>
    %c12_i32 = arith.constant 12 : i32
    %389 = arith.index_cast %c12_i32 : i32 to index
    %c0_136 = arith.constant 0 : index
    %c0_137 = arith.constant 0 : index
    %390 = vector.load %arg2[%389, %c0_136, %c0_137] : memref<16x8x512xf32, #tpu.memory_space<vmem>>, vector<1x8x512xf32>
    %391 = vector.shape_cast %390 : vector<1x8x512xf32> to vector<8x512xf32>
    %392 = arith.truncf %388 : vector<8x128xf32> to vector<8x128xbf16>
    %c0_138 = arith.constant 0 : index
    %c0_139 = arith.constant 0 : index
    %393 = vector.load %arg3[%c0_138, %c0_139] : memref<128x512xbf16, #tpu.memory_space<vmem>>, vector<128x512xbf16>
    %cst_140 = arith.constant dense<0.000000e+00> : vector<8x512xf32>
    %394 = tpu.matmul %392, %393, %cst_140 {dimension_numbers = #tpu.dot_dimension_numbers<[1], [0], [0], [1], [0, 0, 1, 1], [], []>} : vector<8x128xbf16>, vector<128x512xbf16>, vector<8x512xf32> -> vector<8x512xf32>
    %395 = arith.addf %391, %394 : vector<8x512xf32>
    %396 = vector.extract_strided_slice %395 {offsets = [0, 0], sizes = [8, 256], strides = [1, 1]} : vector<8x512xf32> to vector<8x256xf32>
    %cst_141 = arith.constant 5.000000e-01 : f32
    %397 = vector.broadcast %cst_141 : f32 to vector<8x256xf32>
    %398 = arith.mulf %397, %396 : vector<8x256xf32>
    %399 = math.tanh %398 : vector<8x256xf32>
    %cst_142 = arith.constant 5.000000e-01 : f32
    %400 = vector.broadcast %cst_142 : f32 to vector<8x256xf32>
    %401 = arith.mulf %400, %399 : vector<8x256xf32>
    %cst_143 = arith.constant 5.000000e-01 : f32
    %402 = vector.broadcast %cst_143 : f32 to vector<8x256xf32>
    %403 = arith.addf %401, %402 : vector<8x256xf32>
    %404 = vector.extract_strided_slice %403 {offsets = [0, 0], sizes = [8, 128], strides = [1, 1]} : vector<8x256xf32> to vector<8x128xf32>
    %405 = vector.extract_strided_slice %403 {offsets = [0, 128], sizes = [8, 128], strides = [1, 1]} : vector<8x256xf32> to vector<8x128xf32>
    %406 = vector.extract_strided_slice %395 {offsets = [0, 256], sizes = [8, 128], strides = [1, 1]} : vector<8x512xf32> to vector<8x128xf32>
    %407 = math.tanh %406 : vector<8x128xf32>
    %408 = vector.extract_strided_slice %395 {offsets = [0, 384], sizes = [8, 128], strides = [1, 1]} : vector<8x512xf32> to vector<8x128xf32>
    %cst_144 = arith.constant 5.000000e-01 : f32
    %409 = vector.broadcast %cst_144 : f32 to vector<8x128xf32>
    %410 = arith.mulf %409, %408 : vector<8x128xf32>
    %411 = math.tanh %410 : vector<8x128xf32>
    %cst_145 = arith.constant 5.000000e-01 : f32
    %412 = vector.broadcast %cst_145 : f32 to vector<8x128xf32>
    %413 = arith.mulf %412, %411 : vector<8x128xf32>
    %cst_146 = arith.constant 5.000000e-01 : f32
    %414 = vector.broadcast %cst_146 : f32 to vector<8x128xf32>
    %415 = arith.addf %413, %414 : vector<8x128xf32>
    %416 = arith.mulf %405, %386 : vector<8x128xf32>
    %417 = arith.mulf %404, %407 : vector<8x128xf32>
    %418 = arith.addf %416, %417 : vector<8x128xf32>
    %419 = math.tanh %418 : vector<8x128xf32>
    %420 = arith.mulf %415, %419 : vector<8x128xf32>
    %c13_i32 = arith.constant 13 : i32
    %421 = arith.index_cast %c13_i32 : i32 to index
    %c0_147 = arith.constant 0 : index
    %c0_148 = arith.constant 0 : index
    %422 = vector.load %arg2[%421, %c0_147, %c0_148] : memref<16x8x512xf32, #tpu.memory_space<vmem>>, vector<1x8x512xf32>
    %423 = vector.shape_cast %422 : vector<1x8x512xf32> to vector<8x512xf32>
    %424 = arith.truncf %420 : vector<8x128xf32> to vector<8x128xbf16>
    %c0_149 = arith.constant 0 : index
    %c0_150 = arith.constant 0 : index
    %425 = vector.load %arg3[%c0_149, %c0_150] : memref<128x512xbf16, #tpu.memory_space<vmem>>, vector<128x512xbf16>
    %cst_151 = arith.constant dense<0.000000e+00> : vector<8x512xf32>
    %426 = tpu.matmul %424, %425, %cst_151 {dimension_numbers = #tpu.dot_dimension_numbers<[1], [0], [0], [1], [0, 0, 1, 1], [], []>} : vector<8x128xbf16>, vector<128x512xbf16>, vector<8x512xf32> -> vector<8x512xf32>
    %427 = arith.addf %423, %426 : vector<8x512xf32>
    %428 = vector.extract_strided_slice %427 {offsets = [0, 0], sizes = [8, 256], strides = [1, 1]} : vector<8x512xf32> to vector<8x256xf32>
    %cst_152 = arith.constant 5.000000e-01 : f32
    %429 = vector.broadcast %cst_152 : f32 to vector<8x256xf32>
    %430 = arith.mulf %429, %428 : vector<8x256xf32>
    %431 = math.tanh %430 : vector<8x256xf32>
    %cst_153 = arith.constant 5.000000e-01 : f32
    %432 = vector.broadcast %cst_153 : f32 to vector<8x256xf32>
    %433 = arith.mulf %432, %431 : vector<8x256xf32>
    %cst_154 = arith.constant 5.000000e-01 : f32
    %434 = vector.broadcast %cst_154 : f32 to vector<8x256xf32>
    %435 = arith.addf %433, %434 : vector<8x256xf32>
    %436 = vector.extract_strided_slice %435 {offsets = [0, 0], sizes = [8, 128], strides = [1, 1]} : vector<8x256xf32> to vector<8x128xf32>
    %437 = vector.extract_strided_slice %435 {offsets = [0, 128], sizes = [8, 128], strides = [1, 1]} : vector<8x256xf32> to vector<8x128xf32>
    %438 = vector.extract_strided_slice %427 {offsets = [0, 256], sizes = [8, 128], strides = [1, 1]} : vector<8x512xf32> to vector<8x128xf32>
    %439 = math.tanh %438 : vector<8x128xf32>
    %440 = vector.extract_strided_slice %427 {offsets = [0, 384], sizes = [8, 128], strides = [1, 1]} : vector<8x512xf32> to vector<8x128xf32>
    %cst_155 = arith.constant 5.000000e-01 : f32
    %441 = vector.broadcast %cst_155 : f32 to vector<8x128xf32>
    %442 = arith.mulf %441, %440 : vector<8x128xf32>
    %443 = math.tanh %442 : vector<8x128xf32>
    %cst_156 = arith.constant 5.000000e-01 : f32
    %444 = vector.broadcast %cst_156 : f32 to vector<8x128xf32>
    %445 = arith.mulf %444, %443 : vector<8x128xf32>
    %cst_157 = arith.constant 5.000000e-01 : f32
    %446 = vector.broadcast %cst_157 : f32 to vector<8x128xf32>
    %447 = arith.addf %445, %446 : vector<8x128xf32>
    %448 = arith.mulf %437, %418 : vector<8x128xf32>
    %449 = arith.mulf %436, %439 : vector<8x128xf32>
    %450 = arith.addf %448, %449 : vector<8x128xf32>
    %451 = math.tanh %450 : vector<8x128xf32>
    %452 = arith.mulf %447, %451 : vector<8x128xf32>
    %c14_i32 = arith.constant 14 : i32
    %453 = arith.index_cast %c14_i32 : i32 to index
    %c0_158 = arith.constant 0 : index
    %c0_159 = arith.constant 0 : index
    %454 = vector.load %arg2[%453, %c0_158, %c0_159] : memref<16x8x512xf32, #tpu.memory_space<vmem>>, vector<1x8x512xf32>
    %455 = vector.shape_cast %454 : vector<1x8x512xf32> to vector<8x512xf32>
    %456 = arith.truncf %452 : vector<8x128xf32> to vector<8x128xbf16>
    %c0_160 = arith.constant 0 : index
    %c0_161 = arith.constant 0 : index
    %457 = vector.load %arg3[%c0_160, %c0_161] : memref<128x512xbf16, #tpu.memory_space<vmem>>, vector<128x512xbf16>
    %cst_162 = arith.constant dense<0.000000e+00> : vector<8x512xf32>
    %458 = tpu.matmul %456, %457, %cst_162 {dimension_numbers = #tpu.dot_dimension_numbers<[1], [0], [0], [1], [0, 0, 1, 1], [], []>} : vector<8x128xbf16>, vector<128x512xbf16>, vector<8x512xf32> -> vector<8x512xf32>
    %459 = arith.addf %455, %458 : vector<8x512xf32>
    %460 = vector.extract_strided_slice %459 {offsets = [0, 0], sizes = [8, 256], strides = [1, 1]} : vector<8x512xf32> to vector<8x256xf32>
    %cst_163 = arith.constant 5.000000e-01 : f32
    %461 = vector.broadcast %cst_163 : f32 to vector<8x256xf32>
    %462 = arith.mulf %461, %460 : vector<8x256xf32>
    %463 = math.tanh %462 : vector<8x256xf32>
    %cst_164 = arith.constant 5.000000e-01 : f32
    %464 = vector.broadcast %cst_164 : f32 to vector<8x256xf32>
    %465 = arith.mulf %464, %463 : vector<8x256xf32>
    %cst_165 = arith.constant 5.000000e-01 : f32
    %466 = vector.broadcast %cst_165 : f32 to vector<8x256xf32>
    %467 = arith.addf %465, %466 : vector<8x256xf32>
    %468 = vector.extract_strided_slice %467 {offsets = [0, 0], sizes = [8, 128], strides = [1, 1]} : vector<8x256xf32> to vector<8x128xf32>
    %469 = vector.extract_strided_slice %467 {offsets = [0, 128], sizes = [8, 128], strides = [1, 1]} : vector<8x256xf32> to vector<8x128xf32>
    %470 = vector.extract_strided_slice %459 {offsets = [0, 256], sizes = [8, 128], strides = [1, 1]} : vector<8x512xf32> to vector<8x128xf32>
    %471 = math.tanh %470 : vector<8x128xf32>
    %472 = vector.extract_strided_slice %459 {offsets = [0, 384], sizes = [8, 128], strides = [1, 1]} : vector<8x512xf32> to vector<8x128xf32>
    %cst_166 = arith.constant 5.000000e-01 : f32
    %473 = vector.broadcast %cst_166 : f32 to vector<8x128xf32>
    %474 = arith.mulf %473, %472 : vector<8x128xf32>
    %475 = math.tanh %474 : vector<8x128xf32>
    %cst_167 = arith.constant 5.000000e-01 : f32
    %476 = vector.broadcast %cst_167 : f32 to vector<8x128xf32>
    %477 = arith.mulf %476, %475 : vector<8x128xf32>
    %cst_168 = arith.constant 5.000000e-01 : f32
    %478 = vector.broadcast %cst_168 : f32 to vector<8x128xf32>
    %479 = arith.addf %477, %478 : vector<8x128xf32>
    %480 = arith.mulf %469, %450 : vector<8x128xf32>
    %481 = arith.mulf %468, %471 : vector<8x128xf32>
    %482 = arith.addf %480, %481 : vector<8x128xf32>
    %483 = math.tanh %482 : vector<8x128xf32>
    %484 = arith.mulf %479, %483 : vector<8x128xf32>
    %c15_i32 = arith.constant 15 : i32
    %485 = arith.index_cast %c15_i32 : i32 to index
    %c0_169 = arith.constant 0 : index
    %c0_170 = arith.constant 0 : index
    %486 = vector.load %arg2[%485, %c0_169, %c0_170] : memref<16x8x512xf32, #tpu.memory_space<vmem>>, vector<1x8x512xf32>
    %487 = vector.shape_cast %486 : vector<1x8x512xf32> to vector<8x512xf32>
    %488 = arith.truncf %484 : vector<8x128xf32> to vector<8x128xbf16>
    %c0_171 = arith.constant 0 : index
    %c0_172 = arith.constant 0 : index
    %489 = vector.load %arg3[%c0_171, %c0_172] : memref<128x512xbf16, #tpu.memory_space<vmem>>, vector<128x512xbf16>
    %cst_173 = arith.constant dense<0.000000e+00> : vector<8x512xf32>
    %490 = tpu.matmul %488, %489, %cst_173 {dimension_numbers = #tpu.dot_dimension_numbers<[1], [0], [0], [1], [0, 0, 1, 1], [], []>} : vector<8x128xbf16>, vector<128x512xbf16>, vector<8x512xf32> -> vector<8x512xf32>
    %491 = arith.addf %487, %490 : vector<8x512xf32>
    %492 = vector.extract_strided_slice %491 {offsets = [0, 0], sizes = [8, 256], strides = [1, 1]} : vector<8x512xf32> to vector<8x256xf32>
    %cst_174 = arith.constant 5.000000e-01 : f32
    %493 = vector.broadcast %cst_174 : f32 to vector<8x256xf32>
    %494 = arith.mulf %493, %492 : vector<8x256xf32>
    %495 = math.tanh %494 : vector<8x256xf32>
    %cst_175 = arith.constant 5.000000e-01 : f32
    %496 = vector.broadcast %cst_175 : f32 to vector<8x256xf32>
    %497 = arith.mulf %496, %495 : vector<8x256xf32>
    %cst_176 = arith.constant 5.000000e-01 : f32
    %498 = vector.broadcast %cst_176 : f32 to vector<8x256xf32>
    %499 = arith.addf %497, %498 : vector<8x256xf32>
    %500 = vector.extract_strided_slice %499 {offsets = [0, 0], sizes = [8, 128], strides = [1, 1]} : vector<8x256xf32> to vector<8x128xf32>
    %501 = vector.extract_strided_slice %499 {offsets = [0, 128], sizes = [8, 128], strides = [1, 1]} : vector<8x256xf32> to vector<8x128xf32>
    %502 = vector.extract_strided_slice %491 {offsets = [0, 256], sizes = [8, 128], strides = [1, 1]} : vector<8x512xf32> to vector<8x128xf32>
    %503 = math.tanh %502 : vector<8x128xf32>
    %504 = vector.extract_strided_slice %491 {offsets = [0, 384], sizes = [8, 128], strides = [1, 1]} : vector<8x512xf32> to vector<8x128xf32>
    %cst_177 = arith.constant 5.000000e-01 : f32
    %505 = vector.broadcast %cst_177 : f32 to vector<8x128xf32>
    %506 = arith.mulf %505, %504 : vector<8x128xf32>
    %507 = math.tanh %506 : vector<8x128xf32>
    %cst_178 = arith.constant 5.000000e-01 : f32
    %508 = vector.broadcast %cst_178 : f32 to vector<8x128xf32>
    %509 = arith.mulf %508, %507 : vector<8x128xf32>
    %cst_179 = arith.constant 5.000000e-01 : f32
    %510 = vector.broadcast %cst_179 : f32 to vector<8x128xf32>
    %511 = arith.addf %509, %510 : vector<8x128xf32>
    %512 = arith.mulf %501, %482 : vector<8x128xf32>
    %513 = arith.mulf %500, %503 : vector<8x128xf32>
    %514 = arith.addf %512, %513 : vector<8x128xf32>
    %515 = math.tanh %514 : vector<8x128xf32>
    %516 = arith.mulf %511, %515 : vector<8x128xf32>
    %c16_i32 = arith.constant 16 : i32
    %c0_180 = arith.constant 0 : index
    %c0_181 = arith.constant 0 : index
    %517 = vector.load %arg5[%c0_180, %c0_181] : memref<8x128xf32, #tpu.memory_space<vmem>>, vector<8x128xf32>
    tpu.vector_store %arg5[%c0_180, %c0_181], %516 {strides = array<i32>} : memref<8x128xf32, #tpu.memory_space<vmem>>, vector<8x128xf32>,
    %c0_182 = arith.constant 0 : index
    %c0_183 = arith.constant 0 : index
    %518 = vector.load %arg6[%c0_182, %c0_183] : memref<8x128xf32, #tpu.memory_space<vmem>>, vector<8x128xf32>
    tpu.vector_store %arg6[%c0_182, %c0_183], %514 {strides = array<i32>} : memref<8x128xf32, #tpu.memory_space<vmem>>, vector<8x128xf32>,
    %c1_i32_184 = arith.constant 1 : i32
    %519 = arith.cmpi eq, %arg1, %c1_i32_184 : i32
    %520 = arith.extui %519 : i1 to i32
    %c0_i32_185 = arith.constant 0 : i32
    %521 = arith.cmpi ne, %520, %c0_i32_185 : i32
    scf.if %521 {
      %c0_186 = arith.constant 0 : index
      %c0_187 = arith.constant 0 : index
      %522 = vector.load %arg4[%c0_186, %c0_187] : memref<8x128xf32, #tpu.memory_space<vmem>>, vector<8x128xf32>
      tpu.vector_store %arg4[%c0_186, %c0_187], %516 {strides = array<i32>} : memref<8x128xf32, #tpu.memory_space<vmem>>, vector<8x128xf32>,
    } else {
    }
    return
  }
  func.func @transform_0(%arg0: i32, %arg1: i32) -> (i32, i32, i32) {
    %c0_i32 = arith.constant 0 : i32
    %c0_i32_0 = arith.constant 0 : i32
    return %arg1, %arg0, %c0_i32 : i32, i32, i32
  }
  func.func @transform_1(%arg0: i32, %arg1: i32) -> (i32, i32) {
    %c0_i32 = arith.constant 0 : i32
    %c0_i32_0 = arith.constant 0 : i32
    %c0_i32_1 = arith.constant 0 : i32
    return %c0_i32, %c0_i32_0 : i32, i32
  }
  func.func @transform_2(%arg0: i32, %arg1: i32) -> (i32, i32) {
    %c0_i32 = arith.constant 0 : i32
    %c0_i32_0 = arith.constant 0 : i32
    return %arg0, %c0_i32 : i32, i32
  }
}

</mosaic_0001>

<bundles_post_ra>
// kernel: mouse_lstm_forward.1
= control target key start
LH: loop header
LB: loop body
LE: loop exit
PB: predicated region body
PF: predicated region fallthrough
CT: control target
= control target key end

     0   :  { %s2652_s9 = smov 0   ;;  %s2654_s10 = smov 0   ;;  %s3803_s0 = inlined_call_operand.vmem [shape: f32[32,8,512], index: 0, kind: input, shape index: {}]   ;;  %s3804_s1 = inlined_call_operand.vmem [shape: bf16[128,512], index: 1, kind: input, shape index: {}]   ;;  %s3805_s2 = inlined_call_operand.vmem [shape: f32[8,128], index: 2, kind: output, shape index: {}]  }
   0x1   :  { %s2656_s11 = smov 0  }
   0x2 LB: > { %s21_s12 = sadd.s32 1, %s2629_s10  ;;  %p2211_p0 = scmp.ge.s32.totalorder %s2633_s11, 1  ;;  %s2633_s11 = sphi %s2656_s11, %s12_s11   ;;  %s2629_s10 = sphi %s2654_s10, %s3807_s10   ;;  %s2625_s9 = sphi %s2652_s9, %s3806_s9  }
   0x3   : > { %p22_p1 = scmp.ge.s32.totalorder %s21_s12, 2  ;;  %p132_p2 = scmp.lt.s32.totalorder %s2633_s11, 3 }
   0x5   : > { %s3809_s12 = smov (%p22_p1, %s21_s12), 0  ;;  %p133_p3 = pnand %p2211_p0, %p132_p2 }
   0x6   : > { %s2212_s13 = sshll.u32 (!%p133_p3), %s2625_s9, 4  ;;  %p2215_p5 = scmp.ne.s32.totalorder (!%p133_p3), %s2625_s9, 0 }
   0x7   : > { %136 = sbr.rel (%p133_p3) target bundleno = 3877 (0xf25), region = 28  ;;  %p159_p4 = scmp.lt.s32.totalorder (!%p133_p3), %s2212_s13, 31 }
   0xc   : > { %s3811_s13 = smov (!%p159_p4, %s2212_s13), 31  ;;  %177 = sbr.rel (%p2215_p5) target bundleno = 19 (0x13), region = 32 }
   0xd   : > { %s2312_s14 = sshll.u32 %s3811_s13, 5 }
   0xe   : > { %s2676_s17 = scalar_lea.vmem %s3803_s0, %s2312_s14 }
  0x11   : > { %v2635_v0 = vmov 0.0  }
  0x12   : > { %178 = vst [vmem:[#allocation2] sm:$0xff] %v2635_v0  ;;  %179 = vst [vmem:[#allocation3] sm:$0xff] %v2635_v0 }
  0x13 PF: > { %v2682_v1 = vld [vmem:[%s3804_s1 + $0xe4] ss:$16 sps:$4 sm:$0xff]   ;;  %v2687_v2 = vld [vmem:[%s3804_s1 + $0xe0] ss:$16 sps:$4 sm:$0xff]   ;;  %v2636_v3 = vmov 0   ;;  %v183_v38 = vld [vmem:[%s2676_s17 + $0x8] sm:$0xff] }
  0x14   : > { %411 = vmatprep.mubr.bf16.mxu0 %v2636_v3  ;;  %452 = vmatprep.mubr.bf16.mxu1 %v2636_v3  ;;  %v2695_v4 = vld [vmem:[%s3804_s1 + $0xec] ss:$16 sps:$4 sm:$0xff]   ;;  %v2700_v5 = vld [vmem:[%s3804_s1 + $0xe8] ss:$16 sps:$4 sm:$0xff]   ;;  %v2706_v6 = vld [vmem:[%s3804_s1 + $0xc4] ss:$16 sps:$4 sm:$0xff]  }
  0x15   : > { %379 = vmatprep.subr.bf16.mxu0 %v2682_v1  ;;  %v2711_v7 = vld [vmem:[%s3804_s1 + $0xc0] ss:$16 sps:$4 sm:$0xff]   ;;  %420 = vmatprep.subr.bf16.mxu1 %v2695_v4  ;;  %v2717_v8 = vld [vmem:[%s3804_s1 + $0xcc] ss:$16 sps:$4 sm:$0xff]   ;;  %v2724_v9 = vld [vmem:[%s3804_s1 + $0xc8] ss:$16 sps:$4 sm:$0xff]  }
  0x16   : > { %380 = vmatpush1.bf16.msra.mxu0 %v2687_v2  ;;  %421 = vmatpush1.bf16.msra.mxu1 %v2700_v5  ;;  %v2730_v10 = vld [vmem:[%s3804_s1 + $0xa4] ss:$16 sps:$4 sm:$0xff]   ;;  %v2736_v11 = vld [vmem:[%s3804_s1 + $0xa0] ss:$16 sps:$4 sm:$0xff]   ;;  %v2741_v12 = vld [vmem:[%s3804_s1 + $0xac] ss:$16 sps:$4 sm:$0xff]  }
  0x17   : > { %381 = vmatprep.subr.bf16.mxu0 %v2706_v6  ;;  %422 = vmatprep.subr.bf16.mxu1 %v2717_v8  ;;  %v2747_v13 = vld [vmem:[%s3804_s1 + $0x84] ss:$16 sps:$4 sm:$0xff]   ;;  %v2753_v14 = vld [vmem:[%s3804_s1 + $0xa8] ss:$16 sps:$4 sm:$0xff]   ;;  %v2759_v15 = vld [vmem:[%s3804_s1 + $0x8c] ss:$16 sps:$4 sm:$0xff]  }
  0x18   : > { %v2765_v16 = vld [vmem:[%s3804_s1 + $0x80] ss:$16 sps:$4 sm:$0xff]   ;;  %v2771_v17 = vld [vmem:[%s3804_s1 + $0x64] ss:$16 sps:$4 sm:$0xff]   ;;  %v2777_v18 = vld [vmem:[%s3804_s1 + $0x88] ss:$16 sps:$4 sm:$0xff]  }
  0x19   : > { %v2783_v19 = vld [vmem:[%s3804_s1 + $0x6c] ss:$16 sps:$4 sm:$0xff]   ;;  %v2789_v20 = vld [vmem:[%s3804_s1 + $0x60] ss:$16 sps:$4 sm:$0xff]   ;;  %v2795_v21 = vld [vmem:[%s3804_s1 + $0x44] ss:$16 sps:$4 sm:$0xff]  }
  0x1a   : > { %382 = vmatpush1.bf16.msra.mxu0 %v2711_v7  ;;  %423 = vmatpush1.bf16.msra.mxu1 %v2724_v9  ;;  %v2801_v22 = vld [vmem:[%s3804_s1 + $0x68] ss:$16 sps:$4 sm:$0xff]   ;;  %v2807_v23 = vld [vmem:[%s3804_s1 + $0x4c] ss:$16 sps:$4 sm:$0xff]   ;;  %v2813_v24 = vld [vmem:[%s3804_s1 + $0x40] ss:$16 sps:$4 sm:$0xff]  }
  0x1b   : > { %383 = vmatprep.subr.bf16.mxu0 %v2730_v10  ;;  %424 = vmatprep.subr.bf16.mxu1 %v2741_v12  ;;  %v2819_v25 = vld [vmem:[%s3804_s1 + $0x24] ss:$16 sps:$4 sm:$0xff]   ;;  %v2825_v26 = vld [vmem:[%s3804_s1 + $0x48] ss:$16 sps:$4 sm:$0xff]   ;;  %v2831_v27 = vld [vmem:[%s3804_s1 + $0x2c] ss:$16 sps:$4 sm:$0xff]  }
  0x1c   : > { %v2837_v28 = vld [vmem:[%s3804_s1 + $0x20] ss:$16 sps:$4 sm:$0xff]   ;;  %v2843_v29 = vld [vmem:[%s3804_s1 + $0x4] ss:$16 sps:$4 sm:$0xff]   ;;  %v2849_v30 = vld [vmem:[%s3804_s1 + $0x28] ss:$16 sps:$4 sm:$0xff]  }
  0x1d   : > { %v2855_v31 = vld [vmem:[%s3804_s1 + $0xc] ss:$16 sps:$4 sm:$0xff]   ;;  %v2861_v32 = vld [vmem:[%s3804_s1] ss:$16 sps:$4 sm:$0xff]   ;;  %v2868_v34 = vld [vmem:[%s3804_s1 + $0x8] ss:$16 sps:$4 sm:$0xff]  }
  0x1e   : > { %384 = vmatpush1.bf16.msra.mxu0 %v2736_v11  ;;  %425 = vmatpush1.bf16.msra.mxu1 %v2753_v14  ;;  %v180_v33 = vld [vmem:[#allocation2] sm:$0xff]  ;;  %v184_v41 = vld [vmem:[%s2676_s17 + $0x10] sm:$0xff]  ;;  %v185_v52 = vld [vmem:[%s2676_s17 + $0x18] sm:$0xff]  ;;  %p2308_p6 = scmp.ne.s32.totalorder %s2625_s9, 1 }
  0x1f   : > { %385 = vmatprep.subr.bf16.mxu0 %v2747_v13  ;;  %426 = vmatprep.subr.bf16.mxu1 %v2759_v15  ;;  %v186_v35 = vpack.c.bf16 %v180_v33, %v180_v33  ;;  %v182_v36 = vld [vmem:[%s2676_s17] sm:$0xff]  ;;  %v181_v61 = vld [vmem:[#allocation3] sm:$0xff] }
  0x22   : > { %386 = vmatpush1.bf16.msra.mxu0 %v2765_v16  ;;  %427 = vmatpush1.bf16.msra.mxu1 %v2777_v18 }
  0x23   : > { %387 = vmatprep.subr.bf16.mxu0 %v2771_v17  ;;  %428 = vmatprep.subr.bf16.mxu1 %v2783_v19 }
  0x26   : > { %388 = vmatpush1.bf16.msra.mxu0 %v2789_v20  ;;  %429 = vmatpush1.bf16.msra.mxu1 %v2801_v22 }
  0x27   : > { %389 = vmatprep.subr.bf16.mxu0 %v2795_v21  ;;  %430 = vmatprep.subr.bf16.mxu1 %v2807_v23 }
  0x2a   : > { %390 = vmatpush1.bf16.msra.mxu0 %v2813_v24  ;;  %431 = vmatpush1.bf16.msra.mxu1 %v2825_v26 }
  0x2b   : > { %391 = vmatprep.subr.bf16.mxu0 %v2819_v25  ;;  %432 = vmatprep.subr.bf16.mxu1 %v2831_v27 }
  0x2e   : > { %392 = vmatpush1.bf16.msra.mxu0 %v2837_v28  ;;  %433 = vmatpush1.bf16.msra.mxu1 %v2849_v30 }
  0x2f   : > { %393 = vmatprep.subr.bf16.mxu0 %v2843_v29  ;;  %434 = vmatprep.subr.bf16.mxu1 %v2855_v31 }
  0x32   : > { %394 = vmatpush1.bf16.msra.mxu0 %v2861_v32  ;;  %435 = vmatpush1.bf16.msra.mxu1 %v2868_v34 }
  0x33   : > { %489 = vmatprep.subr.bf16.mxu0 %v2682_v1  ;;  %530 = vmatprep.subr.bf16.mxu1 %v2695_v4 }
  0x35   : > { %412 = vmatmul.mubr.bf16.vlgmr.msra.gmra.mxu0 %v186_v35  ;;  %453 = vmatmul.mubr.bf16.vlgmr.msra.gmra.mxu1 %v186_v35 }
  0x36   : > { %490 = vmatpush1.bf16.msra.mxu0 %v2687_v2  ;;  %521 = vmatprep.mubr.bf16.mxu0 %v2636_v3 }
  0x37   : > { %491 = vmatprep.subr.bf16.mxu0 %v2706_v6  ;;  %531 = vmatpush1.bf16.msra.mxu1 %v2700_v5 }
  0x38   : > { %562 = vmatprep.mubr.bf16.mxu1 %v2636_v3  ;;  %532 = vmatprep.subr.bf16.mxu1 %v2717_v8 }
  0x3a   : > { %492 = vmatpush1.bf16.msra.mxu0 %v2711_v7 }
  0x3b   : > { %493 = vmatprep.subr.bf16.mxu0 %v2730_v10  ;;  %533 = vmatpush1.bf16.msra.mxu1 %v2724_v9 }
  0x3c   : > { %534 = vmatprep.subr.bf16.mxu1 %v2741_v12 }
  0x3e   : > { %494 = vmatpush1.bf16.msra.mxu0 %v2736_v11 }
  0x3f   : > { %495 = vmatprep.subr.bf16.mxu0 %v2747_v13  ;;  %535 = vmatpush1.bf16.msra.mxu1 %v2753_v14 }
  0x40   : > { %536 = vmatprep.subr.bf16.mxu1 %v2759_v15 }
  0x42   : > { %496 = vmatpush1.bf16.msra.mxu0 %v2765_v16 }
  0x43   : > { %497 = vmatprep.subr.bf16.mxu0 %v2771_v17  ;;  %537 = vmatpush1.bf16.msra.mxu1 %v2777_v18 }
  0x44   : > { %538 = vmatprep.subr.bf16.mxu1 %v2783_v19 }
  0x46   : > { %498 = vmatpush1.bf16.msra.mxu0 %v2789_v20 }
  0x47   : > { %499 = vmatprep.subr.bf16.mxu0 %v2795_v21  ;;  %539 = vmatpush1.bf16.msra.mxu1 %v2801_v22 }
  0x48   : > { %540 = vmatprep.subr.bf16.mxu1 %v2807_v23 }
  0x4a   : > { %500 = vmatpush1.bf16.msra.mxu0 %v2813_v24 }
  0x4b   : > { %501 = vmatprep.subr.bf16.mxu0 %v2819_v25  ;;  %541 = vmatpush1.bf16.msra.mxu1 %v2825_v26 }
  0x4c   : > { %542 = vmatprep.subr.bf16.mxu1 %v2831_v27 }
  0x4e   : > { %502 = vmatpush1.bf16.msra.mxu0 %v2837_v28 }
  0x4f   : > { %503 = vmatprep.subr.bf16.mxu0 %v2843_v29  ;;  %543 = vmatpush1.bf16.msra.mxu1 %v2849_v30 }
  0x50   : > { %544 = vmatprep.subr.bf16.mxu1 %v2855_v31 }
  0x52   : > { %504 = vmatpush1.bf16.msra.mxu0 %v2861_v32 }
  0x53   : > { %599 = vmatprep.subr.bf16.mxu0 %v2682_v1  ;;  %545 = vmatpush1.bf16.msra.mxu1 %v2868_v34 }
  0x54   : > { %640 = vmatprep.subr.bf16.mxu1 %v2695_v4 }
  0xf5   : > { %v413_v37 = vpop.f32.mrf.mxu0  ;;  %v454_v42 = vpop.f32.mrf.mxu1 }
  0xf6   : > { %v461_v39 = vadd.f32 %v413_v37, %v182_v36  ;;  %v463_v48 = vadd.f32 %v454_v42, %v184_v41  ;;  %v2248_v41 = vld [vmem:[%s2676_s17 + $0x20] sm:$0xff] }
  0xf7   : > { %v415_v40 = vpop.f32.mrf.mxu0  ;;  %v456_v46 = vpop.f32.mrf.mxu1 }
  0xf8   : > { %v465_v43 = vmul.f32 0.5, %v461_v39  ;;  %v462_v44 = vadd.f32 %v415_v40, %v183_v38  ;;  %v464_v53 = vadd.f32 %v456_v46, %v185_v52 }
  0xf9   : > { %v417_v45 = vpop.f32.mrf.mxu0  ;;  %v458_v50 = vpop.f32.mrf.mxu1 }
  0xfa   : > { %2387 = vtanh.f32 %v465_v43  ;;  %v466_v47 = vmul.f32 0.5, %v462_v44  ;;  %v474_v54 = vmul.f32 0.5, %v464_v53  ;;  %v2249_v44 = vld [vmem:[%s2676_s17 + $0x28] sm:$0xff]  ;;  %v2250_v50 = vld [vmem:[%s2676_s17 + $0x30] sm:$0xff] }
  0xfb   : > { %v418_v49 = vpop.f32.mrf.mxu0  ;;  %v459_v51 = vpop.f32.mrf.mxu1 }
  0xfc   : > { %2389 = vtanh.f32 %v466_v47 }
  0xfd   : > { %2391 = vtanh.f32 %v463_v48 }
  0xfe   : > { %2393 = vtanh.f32 %v474_v54 }
 0x107   : > { %v2388_v55 = vpop.eup %2387 }
 0x108   : > { %v469_v56 = vmul.f32 0.5, %v2388_v55 }
 0x109   : > { %v2390_v57 = vpop.eup %2389 }
 0x10a   : > { %v471_v58 = vadd.f32 0.5, %v469_v56  ;;  %v470_v59 = vmul.f32 0.5, %v2390_v57  ;;  %v2392_v60 = vpop.eup %2391  ;;  %v2251_v57 = vld [vmem:[%s2676_s17 + $0x38] sm:$0xff] }
 0x10b   : > { %v2394_v35 = vpop.eup %2393 }
 0x10c   : > { %v472_v62 = vadd.f32 0.5, %v470_v59  ;;  %v479_v0 = vmul.f32 %v2392_v60, %v471_v58  ;;  %v476_v36 = vmul.f32 0.5, %v2394_v35 }
 0x10e   : > { %v478_v63 = vmul.f32 %v472_v62, %v181_v61  ;;  %v477_v37 = vadd.f32 0.5, %v476_v36 }
 0x110   : > { %v2913_v33 = vadd.f32 %v479_v0, %v478_v63 }
 0x112   : > { %2395 = vtanh.f32 %v2913_v33 }
 0x11f   : > { %v2396_v38 = vpop.eup %2395 }
 0x120   : > { %v482_v39 = vmul.f32 %v2396_v38, %v477_v37 }
 0x122   : > { %v488_v40 = vpack.c.bf16 %v482_v39, %v482_v39 }
 0x124   : > { %522 = vmatmul.mubr.bf16.vlgmr.msra.gmra.mxu0 %v488_v40  ;;  %563 = vmatmul.mubr.bf16.vlgmr.msra.gmra.mxu1 %v488_v40 }
 0x125   : > { %600 = vmatpush1.bf16.msra.mxu0 %v2687_v2  ;;  %641 = vmatpush1.bf16.msra.mxu1 %v2700_v5 }
 0x126   : > { %601 = vmatprep.subr.bf16.mxu0 %v2706_v6  ;;  %642 = vmatprep.subr.bf16.mxu1 %v2717_v8 }
 0x127   : > { %631 = vmatprep.mubr.bf16.mxu0 %v2636_v3  ;;  %672 = vmatprep.mubr.bf16.mxu1 %v2636_v3 }
 0x129   : > { %602 = vmatpush1.bf16.msra.mxu0 %v2711_v7  ;;  %643 = vmatpush1.bf16.msra.mxu1 %v2724_v9 }
 0x12a   : > { %603 = vmatprep.subr.bf16.mxu0 %v2730_v10  ;;  %644 = vmatprep.subr.bf16.mxu1 %v2741_v12 }
 0x12d   : > { %604 = vmatpush1.bf16.msra.mxu0 %v2736_v11  ;;  %645 = vmatpush1.bf16.msra.mxu1 %v2753_v14 }
 0x12e   : > { %605 = vmatprep.subr.bf16.mxu0 %v2747_v13  ;;  %646 = vmatprep.subr.bf16.mxu1 %v2759_v15 }
 0x131   : > { %606 = vmatpush1.bf16.msra.mxu0 %v2765_v16  ;;  %647 = vmatpush1.bf16.msra.mxu1 %v2777_v18 }
 0x132   : > { %607 = vmatprep.subr.bf16.mxu0 %v2771_v17  ;;  %648 = vmatprep.subr.bf16.mxu1 %v2783_v19 }
 0x135   : > { %608 = vmatpush1.bf16.msra.mxu0 %v2789_v20  ;;  %649 = vmatpush1.bf16.msra.mxu1 %v2801_v22 }
 0x136   : > { %609 = vmatprep.subr.bf16.mxu0 %v2795_v21  ;;  %650 = vmatprep.subr.bf16.mxu1 %v2807_v23 }
 0x139   : > { %610 = vmatpush1.bf16.msra.mxu0 %v2813_v24  ;;  %651 = vmatpush1.bf16.msra.mxu1 %v2825_v26 }
 0x13a   : > { %611 = vmatprep.subr.bf16.mxu0 %v2819_v25  ;;  %652 = vmatprep.subr.bf16.mxu1 %v2831_v27 }
 0x13d   : > { %612 = vmatpush1.bf16.msra.mxu0 %v2837_v28  ;;  %653 = vmatpush1.bf16.msra.mxu1 %v2849_v30 }
 0x13e   : > { %613 = vmatprep.subr.bf16.mxu0 %v2843_v29  ;;  %654 = vmatprep.subr.bf16.mxu1 %v2855_v31 }
 0x141   : > { %614 = vmatpush1.bf16.msra.mxu0 %v2861_v32  ;;  %655 = vmatpush1.bf16.msra.mxu1 %v2868_v34 }
 0x142   : > { %709 = vmatprep.subr.bf16.mxu0 %v2682_v1  ;;  %750 = vmatprep.subr.bf16.mxu1 %v2695_v4 }
 0x1e4   : > { %v523_v42 = vpop.f32.mrf.mxu0  ;;  %v564_v43 = vpop.f32.mrf.mxu1 }
 0x1e5   : > { %v571_v45 = vadd.f32 %v2248_v41, %v523_v42  ;;  %v573_v56 = vadd.f32 %v2250_v50, %v564_v43 }
 0x1e6   : > { %v525_v46 = vpop.f32.mrf.mxu0  ;;  %v566_v47 = vpop.f32.mrf.mxu1 }
 0x1e7   : > { %v575_v48 = vmul.f32 0.5, %v571_v45  ;;  %v572_v49 = vadd.f32 %v2249_v44, %v525_v46  ;;  %v574_v58 = vadd.f32 %v2251_v57, %v566_v47 }
 0x1e8   : > { %v527_v51 = vpop.f32.mrf.mxu0  ;;  %v568_v52 = vpop.f32.mrf.mxu1 }
 0x1e9   : > { %2397 = vtanh.f32 %v575_v48  ;;  %v576_v53 = vmul.f32 0.5, %v572_v49  ;;  %v584_v59 = vmul.f32 0.5, %v574_v58  ;;  %v2253_v48 = vld [vmem:[%s2676_s17 + $0x48] sm:$0xff] }
 0x1ea   : > { %v528_v54 = vpop.f32.mrf.mxu0  ;;  %v569_v55 = vpop.f32.mrf.mxu1 }
 0x1eb   : > { %2399 = vtanh.f32 %v576_v53  ;;  %v2254_v54 = vld [vmem:[%s2676_s17 + $0x50] sm:$0xff] }
 0x1ec   : > { %2401 = vtanh.f32 %v573_v56 }
 0x1ed   : > { %2403 = vtanh.f32 %v584_v59 }
 0x1f6   : > { %v2398_v60 = vpop.eup %2397 }
 0x1f7   : > { %v579_v61 = vmul.f32 0.5, %v2398_v60 }
 0x1f8   : > { %v2400_v62 = vpop.eup %2399 }
 0x1f9   : > { %v581_v63 = vadd.f32 0.5, %v579_v61  ;;  %v580_v0 = vmul.f32 0.5, %v2400_v62  ;;  %v2402_v36 = vpop.eup %2401  ;;  %v2255_v61 = vld [vmem:[%s2676_s17 + $0x58] sm:$0xff] }
 0x1fa   : > { %v2404_v40 = vpop.eup %2403 }
 0x1fb   : > { %v582_v35 = vadd.f32 0.5, %v580_v0  ;;  %v589_v38 = vmul.f32 %v2402_v36, %v581_v63  ;;  %v586_v41 = vmul.f32 0.5, %v2404_v40 }
 0x1fd   : > { %v588_v37 = vmul.f32 %v582_v35, %v2913_v33  ;;  %v587_v42 = vadd.f32 0.5, %v586_v41  ;;  %v2252_v33 = vld [vmem:[%s2676_s17 + $0x40] sm:$0xff] }
 0x1ff   : > { %v2955_v39 = vadd.f32 %v589_v38, %v588_v37 }
 0x201   : > { %2405 = vtanh.f32 %v2955_v39 }
 0x20e   : > { %v2406_v43 = vpop.eup %2405 }
 0x20f   : > { %v592_v44 = vmul.f32 %v2406_v43, %v587_v42 }
 0x211   : > { %v598_v45 = vpack.c.bf16 %v592_v44, %v592_v44 }
 0x213   : > { %632 = vmatmul.mubr.bf16.vlgmr.msra.gmra.mxu0 %v598_v45  ;;  %673 = vmatmul.mubr.bf16.vlgmr.msra.gmra.mxu1 %v598_v45 }
 0x214   : > { %710 = vmatpush1.bf16.msra.mxu0 %v2687_v2  ;;  %751 = vmatpush1.bf16.msra.mxu1 %v2700_v5 }
 0x215   : > { %711 = vmatprep.subr.bf16.mxu0 %v2706_v6  ;;  %752 = vmatprep.subr.bf16.mxu1 %v2717_v8 }
 0x216   : > { %741 = vmatprep.mubr.bf16.mxu0 %v2636_v3  ;;  %782 = vmatprep.mubr.bf16.mxu1 %v2636_v3 }
 0x218   : > { %712 = vmatpush1.bf16.msra.mxu0 %v2711_v7  ;;  %753 = vmatpush1.bf16.msra.mxu1 %v2724_v9 }
 0x219   : > { %713 = vmatprep.subr.bf16.mxu0 %v2730_v10  ;;  %754 = vmatprep.subr.bf16.mxu1 %v2741_v12 }
 0x21c   : > { %714 = vmatpush1.bf16.msra.mxu0 %v2736_v11  ;;  %755 = vmatpush1.bf16.msra.mxu1 %v2753_v14 }
 0x21d   : > { %715 = vmatprep.subr.bf16.mxu0 %v2747_v13  ;;  %756 = vmatprep.subr.bf16.mxu1 %v2759_v15 }
 0x220   : > { %716 = vmatpush1.bf16.msra.mxu0 %v2765_v16  ;;  %757 = vmatpush1.bf16.msra.mxu1 %v2777_v18 }
 0x221   : > { %717 = vmatprep.subr.bf16.mxu0 %v2771_v17  ;;  %758 = vmatprep.subr.bf16.mxu1 %v2783_v19 }
 0x224   : > { %718 = vmatpush1.bf16.msra.mxu0 %v2789_v20  ;;  %759 = vmatpush1.bf16.msra.mxu1 %v2801_v22 }
 0x225   : > { %719 = vmatprep.subr.bf16.mxu0 %v2795_v21  ;;  %760 = vmatprep.subr.bf16.mxu1 %v2807_v23 }
 0x228   : > { %720 = vmatpush1.bf16.msra.mxu0 %v2813_v24  ;;  %761 = vmatpush1.bf16.msra.mxu1 %v2825_v26 }
 0x229   : > { %721 = vmatprep.subr.bf16.mxu0 %v2819_v25  ;;  %762 = vmatprep.subr.bf16.mxu1 %v2831_v27 }
 0x22c   : > { %722 = vmatpush1.bf16.msra.mxu0 %v2837_v28  ;;  %763 = vmatpush1.bf16.msra.mxu1 %v2849_v30 }
 0x22d   : > { %723 = vmatprep.subr.bf16.mxu0 %v2843_v29  ;;  %764 = vmatprep.subr.bf16.mxu1 %v2855_v31 }
 0x230   : > { %724 = vmatpush1.bf16.msra.mxu0 %v2861_v32  ;;  %765 = vmatpush1.bf16.msra.mxu1 %v2868_v34 }
 0x231   : > { %819 = vmatprep.subr.bf16.mxu0 %v2682_v1  ;;  %860 = vmatprep.subr.bf16.mxu1 %v2695_v4 }
 0x2d3   : > { %v633_v46 = vpop.f32.mrf.mxu0  ;;  %v674_v47 = vpop.f32.mrf.mxu1 }
 0x2d4   : > { %v681_v49 = vadd.f32 %v2252_v33, %v633_v46  ;;  %v683_v60 = vadd.f32 %v2254_v54, %v674_v47 }
 0x2d5   : > { %v635_v50 = vpop.f32.mrf.mxu0  ;;  %v676_v51 = vpop.f32.mrf.mxu1 }
 0x2d6   : > { %v685_v52 = vmul.f32 0.5, %v681_v49  ;;  %v682_v53 = vadd.f32 %v2253_v48, %v635_v50  ;;  %v684_v62 = vadd.f32 %v2255_v61, %v676_v51 }
 0x2d7   : > { %v637_v55 = vpop.f32.mrf.mxu0  ;;  %v678_v56 = vpop.f32.mrf.mxu1 }
 0x2d8   : > { %2407 = vtanh.f32 %v685_v52  ;;  %v686_v57 = vmul.f32 0.5, %v682_v53  ;;  %v694_v63 = vmul.f32 0.5, %v684_v62  ;;  %v2257_v52 = vld [vmem:[%s2676_s17 + $0x68] sm:$0xff] }
 0x2d9   : > { %v638_v58 = vpop.f32.mrf.mxu0  ;;  %v679_v59 = vpop.f32.mrf.mxu1 }
 0x2da   : > { %2409 = vtanh.f32 %v686_v57  ;;  %v2258_v58 = vld [vmem:[%s2676_s17 + $0x70] sm:$0xff] }
 0x2db   : > { %2411 = vtanh.f32 %v683_v60 }
 0x2dc   : > { %2413 = vtanh.f32 %v694_v63 }
 0x2e5   : > { %v2408_v0 = vpop.eup %2407 }
 0x2e6   : > { %v689_v35 = vmul.f32 0.5, %v2408_v0 }
 0x2e7   : > { %v2410_v36 = vpop.eup %2409 }
 0x2e8   : > { %v691_v37 = vadd.f32 0.5, %v689_v35  ;;  %v690_v38 = vmul.f32 0.5, %v2410_v36  ;;  %v2412_v41 = vpop.eup %2411  ;;  %v2259_v35 = vld [vmem:[%s2676_s17 + $0x78] sm:$0xff] }
 0x2e9   : > { %v2414_v45 = vpop.eup %2413 }
 0x2ea   : > { %v692_v40 = vadd.f32 0.5, %v690_v38  ;;  %v699_v43 = vmul.f32 %v2412_v41, %v691_v37  ;;  %v696_v33 = vmul.f32 0.5, %v2414_v45 }
 0x2ec   : > { %v698_v42 = vmul.f32 %v692_v40, %v2955_v39  ;;  %v697_v46 = vadd.f32 0.5, %v696_v33  ;;  %v2256_v39 = vld [vmem:[%s2676_s17 + $0x60] sm:$0xff] }
 0x2ee   : > { %v2997_v44 = vadd.f32 %v699_v43, %v698_v42 }
 0x2f0   : > { %2415 = vtanh.f32 %v2997_v44 }
 0x2fd   : > { %v2416_v47 = vpop.eup %2415 }
 0x2fe   : > { %v702_v48 = vmul.f32 %v2416_v47, %v697_v46 }
 0x300   : > { %v708_v49 = vpack.c.bf16 %v702_v48, %v702_v48 }
 0x302   : > { %742 = vmatmul.mubr.bf16.vlgmr.msra.gmra.mxu0 %v708_v49  ;;  %783 = vmatmul.mubr.bf16.vlgmr.msra.gmra.mxu1 %v708_v49 }
 0x303   : > { %820 = vmatpush1.bf16.msra.mxu0 %v2687_v2  ;;  %861 = vmatpush1.bf16.msra.mxu1 %v2700_v5 }
 0x304   : > { %821 = vmatprep.subr.bf16.mxu0 %v2706_v6  ;;  %862 = vmatprep.subr.bf16.mxu1 %v2717_v8 }
 0x305   : > { %851 = vmatprep.mubr.bf16.mxu0 %v2636_v3  ;;  %892 = vmatprep.mubr.bf16.mxu1 %v2636_v3 }
 0x307   : > { %822 = vmatpush1.bf16.msra.mxu0 %v2711_v7  ;;  %863 = vmatpush1.bf16.msra.mxu1 %v2724_v9 }
 0x308   : > { %823 = vmatprep.subr.bf16.mxu0 %v2730_v10  ;;  %864 = vmatprep.subr.bf16.mxu1 %v2741_v12 }
 0x30b   : > { %824 = vmatpush1.bf16.msra.mxu0 %v2736_v11  ;;  %865 = vmatpush1.bf16.msra.mxu1 %v2753_v14 }
 0x30c   : > { %825 = vmatprep.subr.bf16.mxu0 %v2747_v13  ;;  %866 = vmatprep.subr.bf16.mxu1 %v2759_v15 }
 0x30f   : > { %826 = vmatpush1.bf16.msra.mxu0 %v2765_v16  ;;  %867 = vmatpush1.bf16.msra.mxu1 %v2777_v18 }
 0x310   : > { %827 = vmatprep.subr.bf16.mxu0 %v2771_v17  ;;  %868 = vmatprep.subr.bf16.mxu1 %v2783_v19 }
 0x313   : > { %828 = vmatpush1.bf16.msra.mxu0 %v2789_v20  ;;  %869 = vmatpush1.bf16.msra.mxu1 %v2801_v22 }
 0x314   : > { %829 = vmatprep.subr.bf16.mxu0 %v2795_v21  ;;  %870 = vmatprep.subr.bf16.mxu1 %v2807_v23 }
 0x317   : > { %830 = vmatpush1.bf16.msra.mxu0 %v2813_v24  ;;  %871 = vmatpush1.bf16.msra.mxu1 %v2825_v26 }
 0x318   : > { %831 = vmatprep.subr.bf16.mxu0 %v2819_v25  ;;  %872 = vmatprep.subr.bf16.mxu1 %v2831_v27 }
 0x31b   : > { %832 = vmatpush1.bf16.msra.mxu0 %v2837_v28  ;;  %873 = vmatpush1.bf16.msra.mxu1 %v2849_v30 }
 0x31c   : > { %833 = vmatprep.subr.bf16.mxu0 %v2843_v29  ;;  %874 = vmatprep.subr.bf16.mxu1 %v2855_v31 }
 0x31f   : > { %834 = vmatpush1.bf16.msra.mxu0 %v2861_v32  ;;  %875 = vmatpush1.bf16.msra.mxu1 %v2868_v34 }
 0x320   : > { %929 = vmatprep.subr.bf16.mxu0 %v2682_v1  ;;  %970 = vmatprep.subr.bf16.mxu1 %v2695_v4 }
 0x3c2   : > { %v743_v50 = vpop.f32.mrf.mxu0  ;;  %v784_v51 = vpop.f32.mrf.mxu1 }
 0x3c3   : > { %v791_v53 = vadd.f32 %v2256_v39, %v743_v50  ;;  %v793_v0 = vadd.f32 %v2258_v58, %v784_v51 }
 0x3c4   : > { %v745_v54 = vpop.f32.mrf.mxu0  ;;  %v786_v55 = vpop.f32.mrf.mxu1 }
 0x3c5   : > { %v795_v56 = vmul.f32 0.5, %v791_v53  ;;  %v792_v57 = vadd.f32 %v2257_v52, %v745_v54  ;;  %v794_v36 = vadd.f32 %v2259_v35, %v786_v55 }
 0x3c6   : > { %v747_v59 = vpop.f32.mrf.mxu0  ;;  %v788_v60 = vpop.f32.mrf.mxu1 }
 0x3c7   : > { %2417 = vtanh.f32 %v795_v56  ;;  %v796_v61 = vmul.f32 0.5, %v792_v57  ;;  %v804_v37 = vmul.f32 0.5, %v794_v36  ;;  %v2261_v56 = vld [vmem:[%s2676_s17 + $0x88] sm:$0xff] }
 0x3c8   : > { %v748_v62 = vpop.f32.mrf.mxu0  ;;  %v789_v63 = vpop.f32.mrf.mxu1 }
 0x3c9   : > { %2419 = vtanh.f32 %v796_v61  ;;  %v2262_v62 = vld [vmem:[%s2676_s17 + $0x90] sm:$0xff] }
 0x3ca   : > { %2421 = vtanh.f32 %v793_v0 }
 0x3cb   : > { %2423 = vtanh.f32 %v804_v37 }
 0x3d4   : > { %v2418_v38 = vpop.eup %2417 }
 0x3d5   : > { %v799_v40 = vmul.f32 0.5, %v2418_v38  ;;  %v2263_v38 = vld [vmem:[%s2676_s17 + $0x98] sm:$0xff] }
 0x3d6   : > { %v2420_v41 = vpop.eup %2419 }
 0x3d7   : > { %v801_v42 = vadd.f32 0.5, %v799_v40  ;;  %v800_v43 = vmul.f32 0.5, %v2420_v41  ;;  %v2422_v33 = vpop.eup %2421 }
 0x3d8   : > { %v2424_v49 = vpop.eup %2423 }
 0x3d9   : > { %v802_v45 = vadd.f32 0.5, %v800_v43  ;;  %v809_v47 = vmul.f32 %v2422_v33, %v801_v42  ;;  %v806_v39 = vmul.f32 0.5, %v2424_v49 }
 0x3db   : > { %v808_v46 = vmul.f32 %v802_v45, %v2997_v44  ;;  %v807_v50 = vadd.f32 0.5, %v806_v39  ;;  %v2260_v44 = vld [vmem:[%s2676_s17 + $0x80] sm:$0xff] }
 0x3dd   : > { %v3039_v48 = vadd.f32 %v809_v47, %v808_v46 }
 0x3df   : > { %2425 = vtanh.f32 %v3039_v48 }
 0x3ec   : > { %v2426_v51 = vpop.eup %2425 }
 0x3ed   : > { %v812_v52 = vmul.f32 %v2426_v51, %v807_v50 }
 0x3ef   : > { %v818_v53 = vpack.c.bf16 %v812_v52, %v812_v52 }
 0x3f1   : > { %852 = vmatmul.mubr.bf16.vlgmr.msra.gmra.mxu0 %v818_v53  ;;  %893 = vmatmul.mubr.bf16.vlgmr.msra.gmra.mxu1 %v818_v53 }
 0x3f2   : > { %930 = vmatpush1.bf16.msra.mxu0 %v2687_v2  ;;  %971 = vmatpush1.bf16.msra.mxu1 %v2700_v5 }
 0x3f3   : > { %931 = vmatprep.subr.bf16.mxu0 %v2706_v6  ;;  %972 = vmatprep.subr.bf16.mxu1 %v2717_v8 }
 0x3f4   : > { %961 = vmatprep.mubr.bf16.mxu0 %v2636_v3  ;;  %1002 = vmatprep.mubr.bf16.mxu1 %v2636_v3 }
 0x3f6   : > { %932 = vmatpush1.bf16.msra.mxu0 %v2711_v7  ;;  %973 = vmatpush1.bf16.msra.mxu1 %v2724_v9 }
 0x3f7   : > { %933 = vmatprep.subr.bf16.mxu0 %v2730_v10  ;;  %974 = vmatprep.subr.bf16.mxu1 %v2741_v12 }
 0x3fa   : > { %934 = vmatpush1.bf16.msra.mxu0 %v2736_v11  ;;  %975 = vmatpush1.bf16.msra.mxu1 %v2753_v14 }
 0x3fb   : > { %935 = vmatprep.subr.bf16.mxu0 %v2747_v13  ;;  %976 = vmatprep.subr.bf16.mxu1 %v2759_v15 }
 0x3fe   : > { %936 = vmatpush1.bf16.msra.mxu0 %v2765_v16  ;;  %977 = vmatpush1.bf16.msra.mxu1 %v2777_v18 }
 0x3ff   : > { %937 = vmatprep.subr.bf16.mxu0 %v2771_v17  ;;  %978 = vmatprep.subr.bf16.mxu1 %v2783_v19 }
 0x402   : > { %938 = vmatpush1.bf16.msra.mxu0 %v2789_v20  ;;  %979 = vmatpush1.bf16.msra.mxu1 %v2801_v22 }
 0x403   : > { %939 = vmatprep.subr.bf16.mxu0 %v2795_v21  ;;  %980 = vmatprep.subr.bf16.mxu1 %v2807_v23 }
 0x406   : > { %940 = vmatpush1.bf16.msra.mxu0 %v2813_v24  ;;  %981 = vmatpush1.bf16.msra.mxu1 %v2825_v26 }
 0x407   : > { %941 = vmatprep.subr.bf16.mxu0 %v2819_v25  ;;  %982 = vmatprep.subr.bf16.mxu1 %v2831_v27 }
 0x40a   : > { %942 = vmatpush1.bf16.msra.mxu0 %v2837_v28  ;;  %983 = vmatpush1.bf16.msra.mxu1 %v2849_v30 }
 0x40b   : > { %943 = vmatprep.subr.bf16.mxu0 %v2843_v29  ;;  %984 = vmatprep.subr.bf16.mxu1 %v2855_v31 }
 0x40e   : > { %944 = vmatpush1.bf16.msra.mxu0 %v2861_v32  ;;  %985 = vmatpush1.bf16.msra.mxu1 %v2868_v34 }
 0x40f   : > { %1039 = vmatprep.subr.bf16.mxu0 %v2682_v1  ;;  %1080 = vmatprep.subr.bf16.mxu1 %v2695_v4 }
 0x4b1   : > { %v853_v54 = vpop.f32.mrf.mxu0  ;;  %v894_v55 = vpop.f32.mrf.mxu1 }
 0x4b2   : > { %v901_v57 = vadd.f32 %v2260_v44, %v853_v54  ;;  %v903_v1 = vadd.f32 %v2262_v62, %v894_v55 }
 0x4b3   : > { %v855_v58 = vpop.f32.mrf.mxu0  ;;  %v896_v59 = vpop.f32.mrf.mxu1 }
 0x4b4   : > { %v905_v60 = vmul.f32 0.5, %v901_v57  ;;  %v902_v61 = vadd.f32 %v2261_v56, %v855_v58  ;;  %v904_v40 = vadd.f32 %v2263_v38, %v896_v59 }
 0x4b5   : > { %v857_v63 = vpop.f32.mrf.mxu0  ;;  %v898_v0 = vpop.f32.mrf.mxu1 }
 0x4b6   : > { %2427 = vtanh.f32 %v905_v60  ;;  %v906_v35 = vmul.f32 0.5, %v902_v61  ;;  %v914_v41 = vmul.f32 0.5, %v904_v40 }
 0x4b7   : > { %v858_v36 = vpop.f32.mrf.mxu0  ;;  %v899_v37 = vpop.f32.mrf.mxu1 }
 0x4b8   : > { %2429 = vtanh.f32 %v906_v35 }
 0x4b9   : > { %2431 = vtanh.f32 %v903_v1 }
 0x4ba   : > { %2433 = vtanh.f32 %v914_v41  ;;  %v3134_v41 = vld [vmem:[%s3804_s1 + $0xe0] ss:$16 sps:$4 sm:$0xff]  }
 0x4c3   : > { %v2428_v42 = vpop.eup %2427 }
 0x4c4   : > { %v909_v43 = vmul.f32 0.5, %v2428_v42  ;;  %v3140_v42 = vld [vmem:[%s3804_s1 + $0xe8] ss:$16 sps:$4 sm:$0xff]  }
 0x4c5   : > { %v2430_v45 = vpop.eup %2429 }
 0x4c6   : > { %v911_v33 = vadd.f32 0.5, %v909_v43  ;;  %v910_v46 = vmul.f32 0.5, %v2430_v45  ;;  %v2432_v49 = vpop.eup %2431  ;;  %v3146_v43 = vld [vmem:[%s3804_s1 + $0xc4] ss:$16 sps:$4 sm:$0xff]   ;;  %v3152_v45 = vld [vmem:[%s3804_s1 + $0xcc] ss:$16 sps:$4 sm:$0xff]  }
 0x4c7   : > { %v2434_v52 = vpop.eup %2433 }
 0x4c8   : > { %v912_v47 = vadd.f32 0.5, %v910_v46  ;;  %v919_v50 = vmul.f32 %v2432_v49, %v911_v33  ;;  %v916_v53 = vmul.f32 0.5, %v2434_v52  ;;  %v3160_v33 = vld [vmem:[%s3804_s1 + $0xc0] ss:$16 sps:$4 sm:$0xff]   ;;  %v3166_v46 = vld [vmem:[%s3804_s1 + $0xc8] ss:$16 sps:$4 sm:$0xff]  }
 0x4c9   : > { %v3178_v49 = vld [vmem:[%s3804_s1 + $0xac] ss:$16 sps:$4 sm:$0xff]  }
 0x4ca   : > { %v918_v39 = vmul.f32 %v912_v47, %v3039_v48  ;;  %v917_v44 = vadd.f32 0.5, %v916_v53  ;;  %v3172_v47 = vld [vmem:[%s3804_s1 + $0xa4] ss:$16 sps:$4 sm:$0xff]   ;;  %v3202_v52 = vld [vmem:[%s3804_s1 + $0x8c] ss:$16 sps:$4 sm:$0xff]  }
 0x4cb   : > { %v3208_v53 = vld [vmem:[%s3804_s1 + $0x80] ss:$16 sps:$4 sm:$0xff]  }
 0x4cc   : > { %v3081_v51 = vadd.f32 %v919_v50, %v918_v39  ;;  %v3184_v39 = vld [vmem:[%s3804_s1 + $0xa0] ss:$16 sps:$4 sm:$0xff]   ;;  %v3190_v50 = vld [vmem:[%s3804_s1 + $0xa8] ss:$16 sps:$4 sm:$0xff]  }
 0x4ce   : > { %2435 = vtanh.f32 %v3081_v51 }
 0x4db   : > { %v2436_v54 = vpop.eup %2435 }
 0x4dc   : > { %v922_v55 = vmul.f32 %v2436_v54, %v917_v44  ;;  %v3214_v44 = vld [vmem:[%s3804_s1 + $0x88] ss:$16 sps:$4 sm:$0xff]   ;;  %v3220_v54 = vld [vmem:[%s3804_s1 + $0x64] ss:$16 sps:$4 sm:$0xff]  }
 0x4de   : > { %v928_v56 = vpack.c.bf16 %v922_v55, %v922_v55  ;;  %v3226_v55 = vld [vmem:[%s3804_s1 + $0x6c] ss:$16 sps:$4 sm:$0xff]  }
 0x4e0   : > { %962 = vmatmul.mubr.bf16.vlgmr.msra.gmra.mxu0 %v928_v56  ;;  %1003 = vmatmul.mubr.bf16.vlgmr.msra.gmra.mxu1 %v928_v56  ;;  %v3232_v56 = vld [vmem:[%s3804_s1 + $0x60] ss:$16 sps:$4 sm:$0xff]  }
 0x4e1   : > { %1040 = vmatpush1.bf16.msra.mxu0 %v2687_v2  ;;  %1081 = vmatpush1.bf16.msra.mxu1 %v2700_v5  ;;  %v3119_v2 = vld [vmem:[%s3804_s1 + $0xe4] ss:$16 sps:$4 sm:$0xff]  }
 0x4e2   : > { %1041 = vmatprep.subr.bf16.mxu0 %v2706_v6  ;;  %1082 = vmatprep.subr.bf16.mxu1 %v2717_v8  ;;  %v2264_v5 = vld [vmem:[%s2676_s17 + $0xa0] sm:$0xff]  ;;  %v2265_v8 = vld [vmem:[%s2676_s17 + $0xa8] sm:$0xff] }
 0x4e3   : > { %1071 = vmatprep.mubr.bf16.mxu0 %v2636_v3  ;;  %1112 = vmatprep.mubr.bf16.mxu1 %v2636_v3 }
 0x4e5   : > { %1042 = vmatpush1.bf16.msra.mxu0 %v2711_v7  ;;  %1083 = vmatpush1.bf16.msra.mxu1 %v2724_v9 }
 0x4e6   : > { %1043 = vmatprep.subr.bf16.mxu0 %v2730_v10  ;;  %1084 = vmatprep.subr.bf16.mxu1 %v2741_v12 }
 0x4e9   : > { %1044 = vmatpush1.bf16.msra.mxu0 %v2736_v11  ;;  %1085 = vmatpush1.bf16.msra.mxu1 %v2753_v14  ;;  %v2266_v14 = vld [vmem:[%s2676_s17 + $0xb0] sm:$0xff] }
 0x4ea   : > { %1045 = vmatprep.subr.bf16.mxu0 %v2747_v13  ;;  %1086 = vmatprep.subr.bf16.mxu1 %v2759_v15 }
 0x4ed   : > { %1046 = vmatpush1.bf16.msra.mxu0 %v2765_v16  ;;  %1087 = vmatpush1.bf16.msra.mxu1 %v2777_v18 }
 0x4ee   : > { %1047 = vmatprep.subr.bf16.mxu0 %v2771_v17  ;;  %1088 = vmatprep.subr.bf16.mxu1 %v2783_v19 }
 0x4f1   : > { %1048 = vmatpush1.bf16.msra.mxu0 %v2789_v20  ;;  %1089 = vmatpush1.bf16.msra.mxu1 %v2801_v22 }
 0x4f2   : > { %1049 = vmatprep.subr.bf16.mxu0 %v2795_v21  ;;  %1090 = vmatprep.subr.bf16.mxu1 %v2807_v23 }
 0x4f5   : > { %1050 = vmatpush1.bf16.msra.mxu0 %v2813_v24  ;;  %1091 = vmatpush1.bf16.msra.mxu1 %v2825_v26 }
 0x4f6   : > { %1051 = vmatprep.subr.bf16.mxu0 %v2819_v25  ;;  %1092 = vmatprep.subr.bf16.mxu1 %v2831_v27 }
 0x4f9   : > { %1052 = vmatpush1.bf16.msra.mxu0 %v2837_v28  ;;  %1093 = vmatpush1.bf16.msra.mxu1 %v2849_v30 }
 0x4fa   : > { %1053 = vmatprep.subr.bf16.mxu0 %v2843_v29  ;;  %1094 = vmatprep.subr.bf16.mxu1 %v2855_v31 }
 0x4fd   : > { %1054 = vmatpush1.bf16.msra.mxu0 %v2861_v32  ;;  %1095 = vmatpush1.bf16.msra.mxu1 %v2868_v34 }
 0x4fe   : > { %1149 = vmatprep.subr.bf16.mxu0 %v3119_v2  ;;  %1190 = vmatprep.subr.bf16.mxu1 %v2695_v4  ;;  %v2267_v4 = vld [vmem:[%s2676_s17 + $0xb8] sm:$0xff] }
 0x5a0   : > { %v963_v6 = vpop.f32.mrf.mxu0  ;;  %v1004_v7 = vpop.f32.mrf.mxu1 }
 0x5a1   : > { %v1011_v9 = vadd.f32 %v2264_v5, %v963_v6  ;;  %v1013_v20 = vadd.f32 %v2266_v14, %v1004_v7  ;;  %v3238_v5 = vld [vmem:[%s3804_s1 + $0x68] ss:$16 sps:$4 sm:$0xff]   ;;  %v3244_v6 = vld [vmem:[%s3804_s1 + $0x44] ss:$16 sps:$4 sm:$0xff]   ;;  %v3250_v7 = vld [vmem:[%s3804_s1 + $0x4c] ss:$16 sps:$4 sm:$0xff]  }
 0x5a2   : > { %v965_v10 = vpop.f32.mrf.mxu0  ;;  %v1006_v11 = vpop.f32.mrf.mxu1 }
 0x5a3   : > { %v1015_v12 = vmul.f32 0.5, %v1011_v9  ;;  %v1012_v13 = vadd.f32 %v2265_v8, %v965_v10  ;;  %v1014_v21 = vadd.f32 %v2267_v4, %v1006_v11 }
 0x5a4   : > { %v967_v15 = vpop.f32.mrf.mxu0  ;;  %v1008_v16 = vpop.f32.mrf.mxu1 }
 0x5a5   : > { %2437 = vtanh.f32 %v1015_v12  ;;  %v1016_v17 = vmul.f32 0.5, %v1012_v13  ;;  %v1024_v22 = vmul.f32 0.5, %v1014_v21  ;;  %v2271_v15 = vld [vmem:[%s2676_s17 + $0xd8] sm:$0xff] }
 0x5a6   : > { %v968_v18 = vpop.f32.mrf.mxu0  ;;  %v1009_v19 = vpop.f32.mrf.mxu1 }
 0x5a7   : > { %2439 = vtanh.f32 %v1016_v17 }
 0x5a8   : > { %2441 = vtanh.f32 %v1013_v20 }
 0x5a9   : > { %2443 = vtanh.f32 %v1024_v22 }
 0x5b2   : > { %v2438_v23 = vpop.eup %2437 }
 0x5b3   : > { %v1019_v48 = vmul.f32 0.5, %v2438_v23 }
 0x5b4   : > { %v2440_v57 = vpop.eup %2439 }
 0x5b5   : > { %v1021_v58 = vadd.f32 0.5, %v1019_v48  ;;  %v1020_v59 = vmul.f32 0.5, %v2440_v57  ;;  %v2442_v61 = vpop.eup %2441 }
 0x5b6   : > { %v2444_v35 = vpop.eup %2443 }
 0x5b7   : > { %v1022_v60 = vadd.f32 0.5, %v1020_v59  ;;  %v1029_v63 = vmul.f32 %v2442_v61, %v1021_v58  ;;  %v1026_v36 = vmul.f32 0.5, %v2444_v35 }
 0x5b9   : > { %v1028_v62 = vmul.f32 %v1022_v60, %v3081_v51  ;;  %v1027_v37 = vadd.f32 0.5, %v1026_v36  ;;  %v3196_v51 = vld [vmem:[%s3804_s1 + $0x84] ss:$16 sps:$4 sm:$0xff]   ;;  %v3309_v36 = vld [vmem:[%s3804_s1 + $0x48] ss:$16 sps:$4 sm:$0xff]  }
 0x5bb   : > { %v3128_v0 = vadd.f32 %v1029_v63, %v1028_v62 }
 0x5bd   : > { %2445 = vtanh.f32 %v3128_v0 }
 0x5ca   : > { %v2446_v1 = vpop.eup %2445 }
 0x5cb   : > { %v1032_v38 = vmul.f32 %v2446_v1, %v1027_v37  ;;  %v3315_v37 = vld [vmem:[%s3804_s1 + $0x24] ss:$16 sps:$4 sm:$0xff]   ;;  %v3321_v1 = vld [vmem:[%s3804_s1 + $0x2c] ss:$16 sps:$4 sm:$0xff]  }
 0x5cd   : > { %v1038_v40 = vpack.c.bf16 %v1032_v38, %v1032_v38  ;;  %v3327_v38 = vld [vmem:[%s3804_s1 + $0x20] ss:$16 sps:$4 sm:$0xff]  }
 0x5cf   : > { %1072 = vmatmul.mubr.bf16.vlgmr.msra.gmra.mxu0 %v1038_v40  ;;  %1113 = vmatmul.mubr.bf16.vlgmr.msra.gmra.mxu1 %v1038_v40  ;;  %v3333_v40 = vld [vmem:[%s3804_s1 + $0x28] ss:$16 sps:$4 sm:$0xff]  }
 0x5d0   : > { %1150 = vmatpush1.bf16.msra.mxu0 %v3134_v41  ;;  %1191 = vmatpush1.bf16.msra.mxu1 %v3140_v42 }
 0x5d1   : > { %1151 = vmatprep.subr.bf16.mxu0 %v3146_v43  ;;  %1192 = vmatprep.subr.bf16.mxu1 %v3152_v45 }
 0x5d2   : > { %1181 = vmatprep.mubr.bf16.mxu0 %v2636_v3  ;;  %1222 = vmatprep.mubr.bf16.mxu1 %v2636_v3 }
 0x5d4   : > { %1152 = vmatpush1.bf16.msra.mxu0 %v3160_v33  ;;  %1193 = vmatpush1.bf16.msra.mxu1 %v3166_v46 }
 0x5d5   : > { %1153 = vmatprep.subr.bf16.mxu0 %v3172_v47  ;;  %1194 = vmatprep.subr.bf16.mxu1 %v3178_v49 }
 0x5d8   : > { %1154 = vmatpush1.bf16.msra.mxu0 %v3184_v39  ;;  %1195 = vmatpush1.bf16.msra.mxu1 %v3190_v50 }
 0x5d9   : > { %1155 = vmatprep.subr.bf16.mxu0 %v3196_v51  ;;  %1196 = vmatprep.subr.bf16.mxu1 %v3202_v52 }
 0x5dc   : > { %1156 = vmatpush1.bf16.msra.mxu0 %v3208_v53  ;;  %1197 = vmatpush1.bf16.msra.mxu1 %v3214_v44 }
 0x5dd   : > { %1157 = vmatprep.subr.bf16.mxu0 %v3220_v54  ;;  %1198 = vmatprep.subr.bf16.mxu1 %v3226_v55 }
 0x5e0   : > { %1158 = vmatpush1.bf16.msra.mxu0 %v3232_v56  ;;  %1199 = vmatpush1.bf16.msra.mxu1 %v3238_v5 }
 0x5e1   : > { %1159 = vmatprep.subr.bf16.mxu0 %v3244_v6  ;;  %1200 = vmatprep.subr.bf16.mxu1 %v3250_v7 }
 0x5e4   : > { %1160 = vmatpush1.bf16.msra.mxu0 %v2813_v24  ;;  %1201 = vmatpush1.bf16.msra.mxu1 %v2825_v26  ;;  %v3267_v24 = vld [vmem:[%s3804_s1 + $0xec] ss:$16 sps:$4 sm:$0xff]  }
 0x5e5   : > { %1161 = vmatprep.subr.bf16.mxu0 %v2819_v25  ;;  %1202 = vmatprep.subr.bf16.mxu1 %v2831_v27  ;;  %v2268_v25 = vld [vmem:[%s2676_s17 + $0xc0] sm:$0xff] }
 0x5e8   : > { %1162 = vmatpush1.bf16.msra.mxu0 %v2837_v28  ;;  %1203 = vmatpush1.bf16.msra.mxu1 %v2849_v30  ;;  %v2269_v28 = vld [vmem:[%s2676_s17 + $0xc8] sm:$0xff] }
 0x5e9   : > { %1163 = vmatprep.subr.bf16.mxu0 %v2843_v29  ;;  %1204 = vmatprep.subr.bf16.mxu1 %v2855_v31 }
 0x5ec   : > { %1164 = vmatpush1.bf16.msra.mxu0 %v2861_v32  ;;  %1205 = vmatpush1.bf16.msra.mxu1 %v2868_v34  ;;  %v2270_v34 = vld [vmem:[%s2676_s17 + $0xd0] sm:$0xff] }
 0x5ed   : > { %1259 = vmatprep.subr.bf16.mxu0 %v3119_v2  ;;  %1300 = vmatprep.subr.bf16.mxu1 %v3267_v24 }
 0x68f   : > { %v1073_v26 = vpop.f32.mrf.mxu0  ;;  %v1114_v27 = vpop.f32.mrf.mxu1 }
 0x690   : > { %v1121_v29 = vadd.f32 %v2268_v25, %v1073_v26  ;;  %v1123_v14 = vadd.f32 %v2270_v34, %v1114_v27  ;;  %v3339_v25 = vld [vmem:[%s3804_s1 + $0x4] ss:$16 sps:$4 sm:$0xff]   ;;  %v3345_v26 = vld [vmem:[%s3804_s1 + $0xc] ss:$16 sps:$4 sm:$0xff]   ;;  %v3351_v27 = vld [vmem:[%s3804_s1] ss:$16 sps:$4 sm:$0xff]  }
 0x691   : > { %v1075_v30 = vpop.f32.mrf.mxu0  ;;  %v1116_v31 = vpop.f32.mrf.mxu1 }
 0x692   : > { %v1125_v32 = vmul.f32 0.5, %v1121_v29  ;;  %v1122_v8 = vadd.f32 %v2269_v28, %v1075_v30  ;;  %v1124_v16 = vadd.f32 %v2271_v15, %v1116_v31  ;;  %v3357_v28 = vld [vmem:[%s3804_s1 + $0x8] ss:$16 sps:$4 sm:$0xff]   ;;  %v2272_v29 = vld [vmem:[%s2676_s17 + $0xe0] sm:$0xff] }
 0x693   : > { %v1077_v9 = vpop.f32.mrf.mxu0  ;;  %v1118_v10 = vpop.f32.mrf.mxu1 }
 0x694   : > { %2447 = vtanh.f32 %v1125_v32  ;;  %v1126_v11 = vmul.f32 0.5, %v1122_v8  ;;  %v1134_v17 = vmul.f32 0.5, %v1124_v16  ;;  %v2273_v32 = vld [vmem:[%s2676_s17 + $0xe8] sm:$0xff] }
 0x695   : > { %v1078_v12 = vpop.f32.mrf.mxu0  ;;  %v1119_v13 = vpop.f32.mrf.mxu1 }
 0x696   : > { %2449 = vtanh.f32 %v1126_v11  ;;  %v2274_v12 = vld [vmem:[%s2676_s17 + $0xf0] sm:$0xff] }
 0x697   : > { %2451 = vtanh.f32 %v1123_v14 }
 0x698   : > { %2453 = vtanh.f32 %v1134_v17 }
 0x6a1   : > { %v2448_v18 = vpop.eup %2447 }
 0x6a2   : > { %v1129_v19 = vmul.f32 0.5, %v2448_v18 }
 0x6a3   : > { %v2450_v20 = vpop.eup %2449 }
 0x6a4   : > { %v1131_v4 = vadd.f32 0.5, %v1129_v19  ;;  %v1130_v21 = vmul.f32 0.5, %v2450_v20  ;;  %v2452_v23 = vpop.eup %2451  ;;  %v2275_v19 = vld [vmem:[%s2676_s17 + $0xf8] sm:$0xff] }
 0x6a5   : > { %v2454_v59 = vpop.eup %2453 }
 0x6a6   : > { %v1132_v22 = vadd.f32 0.5, %v1130_v21  ;;  %v1139_v57 = vmul.f32 %v2452_v23, %v1131_v4  ;;  %v1136_v60 = vmul.f32 0.5, %v2454_v59 }
 0x6a8   : > { %v1138_v48 = vmul.f32 %v1132_v22, %v3128_v0  ;;  %v1137_v61 = vadd.f32 0.5, %v1136_v60  ;;  %v3303_v0 = vld [vmem:[%s3804_s1 + $0x40] ss:$16 sps:$4 sm:$0xff]  }
 0x6aa   : > { %v3275_v58 = vadd.f32 %v1139_v57, %v1138_v48 }
 0x6ac   : > { %2455 = vtanh.f32 %v3275_v58 }
 0x6b9   : > { %v2456_v62 = vpop.eup %2455 }
 0x6ba   : > { %v1142_v63 = vmul.f32 %v2456_v62, %v1137_v61 }
 0x6bc   : > { %v1148_v35 = vpack.c.bf16 %v1142_v63, %v1142_v63 }
 0x6be   : > { %1182 = vmatmul.mubr.bf16.vlgmr.msra.gmra.mxu0 %v1148_v35  ;;  %1223 = vmatmul.mubr.bf16.vlgmr.msra.gmra.mxu1 %v1148_v35 }
 0x6bf   : > { %1260 = vmatpush1.bf16.msra.mxu0 %v3134_v41  ;;  %1301 = vmatpush1.bf16.msra.mxu1 %v3140_v42 }
 0x6c0   : > { %1261 = vmatprep.subr.bf16.mxu0 %v3146_v43  ;;  %1302 = vmatprep.subr.bf16.mxu1 %v3152_v45 }
 0x6c1   : > { %1291 = vmatprep.mubr.bf16.mxu0 %v2636_v3  ;;  %1332 = vmatprep.mubr.bf16.mxu1 %v2636_v3 }
 0x6c3   : > { %1262 = vmatpush1.bf16.msra.mxu0 %v3160_v33  ;;  %1303 = vmatpush1.bf16.msra.mxu1 %v3166_v46 }
 0x6c4   : > { %1263 = vmatprep.subr.bf16.mxu0 %v3172_v47  ;;  %1304 = vmatprep.subr.bf16.mxu1 %v3178_v49 }
 0x6c7   : > { %1264 = vmatpush1.bf16.msra.mxu0 %v3184_v39  ;;  %1305 = vmatpush1.bf16.msra.mxu1 %v3190_v50 }
 0x6c8   : > { %1265 = vmatprep.subr.bf16.mxu0 %v3196_v51  ;;  %1306 = vmatprep.subr.bf16.mxu1 %v3202_v52 }
 0x6cb   : > { %1266 = vmatpush1.bf16.msra.mxu0 %v3208_v53  ;;  %1307 = vmatpush1.bf16.msra.mxu1 %v3214_v44 }
 0x6cc   : > { %1267 = vmatprep.subr.bf16.mxu0 %v3220_v54  ;;  %1308 = vmatprep.subr.bf16.mxu1 %v3226_v55 }
 0x6cf   : > { %1268 = vmatpush1.bf16.msra.mxu0 %v3232_v56  ;;  %1309 = vmatpush1.bf16.msra.mxu1 %v3238_v5 }
 0x6d0   : > { %1269 = vmatprep.subr.bf16.mxu0 %v3244_v6  ;;  %1310 = vmatprep.subr.bf16.mxu1 %v3250_v7 }
 0x6d3   : > { %1270 = vmatpush1.bf16.msra.mxu0 %v3303_v0  ;;  %1311 = vmatpush1.bf16.msra.mxu1 %v3309_v36 }
 0x6d4   : > { %1271 = vmatprep.subr.bf16.mxu0 %v3315_v37  ;;  %1312 = vmatprep.subr.bf16.mxu1 %v3321_v1 }
 0x6d7   : > { %1272 = vmatpush1.bf16.msra.mxu0 %v3327_v38  ;;  %1313 = vmatpush1.bf16.msra.mxu1 %v3333_v40 }
 0x6d8   : > { %1273 = vmatprep.subr.bf16.mxu0 %v3339_v25  ;;  %1314 = vmatprep.subr.bf16.mxu1 %v3345_v26 }
 0x6db   : > { %1274 = vmatpush1.bf16.msra.mxu0 %v3351_v27  ;;  %1315 = vmatpush1.bf16.msra.mxu1 %v3357_v28 }
 0x6dc   : > { %1369 = vmatprep.subr.bf16.mxu0 %v3119_v2  ;;  %1410 = vmatprep.subr.bf16.mxu1 %v3267_v24 }
 0x77e   : > { %v1183_v30 = vpop.f32.mrf.mxu0  ;;  %v1224_v31 = vpop.f32.mrf.mxu1 }
 0x77f   : > { %v1231_v8 = vadd.f32 %v2272_v29, %v1183_v30  ;;  %v1233_v18 = vadd.f32 %v2274_v12, %v1224_v31 }
 0x780   : > { %v1185_v34 = vpop.f32.mrf.mxu0  ;;  %v1226_v9 = vpop.f32.mrf.mxu1 }
 0x781   : > { %v1235_v10 = vmul.f32 0.5, %v1231_v8  ;;  %v1232_v11 = vadd.f32 %v2273_v32, %v1185_v34  ;;  %v1234_v20 = vadd.f32 %v2275_v19, %v1226_v9 }
 0x782   : > { %v1187_v13 = vpop.f32.mrf.mxu0  ;;  %v1228_v14 = vpop.f32.mrf.mxu1 }
 0x783   : > { %2457 = vtanh.f32 %v1235_v10  ;;  %v1236_v15 = vmul.f32 0.5, %v1232_v11  ;;  %v1244_v4 = vmul.f32 0.5, %v1234_v20  ;;  %v2277_v10 = vld [vmem:[%s2676_s17 + $0x108] sm:$0xff] }
 0x784   : > { %v1188_v16 = vpop.f32.mrf.mxu0  ;;  %v1229_v17 = vpop.f32.mrf.mxu1 }
 0x785   : > { %2459 = vtanh.f32 %v1236_v15  ;;  %v2278_v16 = vld [vmem:[%s2676_s17 + $0x110] sm:$0xff] }
 0x786   : > { %2461 = vtanh.f32 %v1233_v18 }
 0x787   : > { %2463 = vtanh.f32 %v1244_v4 }
 0x790   : > { %v2458_v21 = vpop.eup %2457 }
 0x791   : > { %v1239_v22 = vmul.f32 0.5, %v2458_v21 }
 0x792   : > { %v2460_v23 = vpop.eup %2459 }
 0x793   : > { %v1241_v48 = vadd.f32 0.5, %v1239_v22  ;;  %v1240_v57 = vmul.f32 0.5, %v2460_v23  ;;  %v2462_v60 = vpop.eup %2461  ;;  %v2279_v22 = vld [vmem:[%s2676_s17 + $0x118] sm:$0xff] }
 0x794   : > { %v2464_v35 = vpop.eup %2463 }
 0x795   : > { %v1242_v59 = vadd.f32 0.5, %v1240_v57  ;;  %v1249_v62 = vmul.f32 %v2462_v60, %v1241_v48  ;;  %v1246_v29 = vmul.f32 0.5, %v2464_v35 }
 0x797   : > { %v1248_v61 = vmul.f32 %v1242_v59, %v3275_v58  ;;  %v1247_v30 = vadd.f32 0.5, %v1246_v29  ;;  %v2276_v58 = vld [vmem:[%s2676_s17 + $0x100] sm:$0xff] }
 0x799   : > { %v3367_v63 = vadd.f32 %v1249_v62, %v1248_v61 }
 0x79b   : > { %2465 = vtanh.f32 %v3367_v63 }
 0x7a8   : > { %v2466_v31 = vpop.eup %2465 }
 0x7a9   : > { %v1252_v32 = vmul.f32 %v2466_v31, %v1247_v30 }
 0x7ab   : > { %v1258_v8 = vpack.c.bf16 %v1252_v32, %v1252_v32 }
 0x7ad   : > { %1292 = vmatmul.mubr.bf16.vlgmr.msra.gmra.mxu0 %v1258_v8  ;;  %1333 = vmatmul.mubr.bf16.vlgmr.msra.gmra.mxu1 %v1258_v8 }
 0x7ae   : > { %1370 = vmatpush1.bf16.msra.mxu0 %v3134_v41  ;;  %1411 = vmatpush1.bf16.msra.mxu1 %v3140_v42 }
 0x7af   : > { %1371 = vmatprep.subr.bf16.mxu0 %v3146_v43  ;;  %1412 = vmatprep.subr.bf16.mxu1 %v3152_v45 }
 0x7b0   : > { %1401 = vmatprep.mubr.bf16.mxu0 %v2636_v3  ;;  %1442 = vmatprep.mubr.bf16.mxu1 %v2636_v3 }
 0x7b2   : > { %1372 = vmatpush1.bf16.msra.mxu0 %v3160_v33  ;;  %1413 = vmatpush1.bf16.msra.mxu1 %v3166_v46 }
 0x7b3   : > { %1373 = vmatprep.subr.bf16.mxu0 %v3172_v47  ;;  %1414 = vmatprep.subr.bf16.mxu1 %v3178_v49 }
 0x7b6   : > { %1374 = vmatpush1.bf16.msra.mxu0 %v3184_v39  ;;  %1415 = vmatpush1.bf16.msra.mxu1 %v3190_v50 }
 0x7b7   : > { %1375 = vmatprep.subr.bf16.mxu0 %v3196_v51  ;;  %1416 = vmatprep.subr.bf16.mxu1 %v3202_v52 }
 0x7ba   : > { %1376 = vmatpush1.bf16.msra.mxu0 %v3208_v53  ;;  %1417 = vmatpush1.bf16.msra.mxu1 %v3214_v44 }
 0x7bb   : > { %1377 = vmatprep.subr.bf16.mxu0 %v3220_v54  ;;  %1418 = vmatprep.subr.bf16.mxu1 %v3226_v55 }
 0x7be   : > { %1378 = vmatpush1.bf16.msra.mxu0 %v3232_v56  ;;  %1419 = vmatpush1.bf16.msra.mxu1 %v3238_v5 }
 0x7bf   : > { %1379 = vmatprep.subr.bf16.mxu0 %v3244_v6  ;;  %1420 = vmatprep.subr.bf16.mxu1 %v3250_v7 }
 0x7c2   : > { %1380 = vmatpush1.bf16.msra.mxu0 %v3303_v0  ;;  %1421 = vmatpush1.bf16.msra.mxu1 %v3309_v36 }
 0x7c3   : > { %1381 = vmatprep.subr.bf16.mxu0 %v3315_v37  ;;  %1422 = vmatprep.subr.bf16.mxu1 %v3321_v1 }
 0x7c6   : > { %1382 = vmatpush1.bf16.msra.mxu0 %v3327_v38  ;;  %1423 = vmatpush1.bf16.msra.mxu1 %v3333_v40 }
 0x7c7   : > { %1383 = vmatprep.subr.bf16.mxu0 %v3339_v25  ;;  %1424 = vmatprep.subr.bf16.mxu1 %v3345_v26 }
 0x7ca   : > { %1384 = vmatpush1.bf16.msra.mxu0 %v3351_v27  ;;  %1425 = vmatpush1.bf16.msra.mxu1 %v3357_v28 }
 0x7cb   : > { %1479 = vmatprep.subr.bf16.mxu0 %v3119_v2  ;;  %1520 = vmatprep.subr.bf16.mxu1 %v3267_v24 }
 0x86d   : > { %v1293_v34 = vpop.f32.mrf.mxu0  ;;  %v1334_v9 = vpop.f32.mrf.mxu1 }
 0x86e   : > { %v1341_v11 = vadd.f32 %v2276_v58, %v1293_v34  ;;  %v1343_v21 = vadd.f32 %v2278_v16, %v1334_v9 }
 0x86f   : > { %v1295_v12 = vpop.f32.mrf.mxu0  ;;  %v1336_v13 = vpop.f32.mrf.mxu1 }
 0x870   : > { %v1345_v14 = vmul.f32 0.5, %v1341_v11  ;;  %v1342_v15 = vadd.f32 %v2277_v10, %v1295_v12  ;;  %v1344_v23 = vadd.f32 %v2279_v22, %v1336_v13 }
 0x871   : > { %v1297_v17 = vpop.f32.mrf.mxu0  ;;  %v1338_v18 = vpop.f32.mrf.mxu1 }
 0x872   : > { %2467 = vtanh.f32 %v1345_v14  ;;  %v1346_v19 = vmul.f32 0.5, %v1342_v15  ;;  %v1354_v48 = vmul.f32 0.5, %v1344_v23  ;;  %v2281_v14 = vld [vmem:[%s2676_s17 + $0x128] sm:$0xff] }
 0x873   : > { %v1298_v20 = vpop.f32.mrf.mxu0  ;;  %v1339_v4 = vpop.f32.mrf.mxu1 }
 0x874   : > { %2469 = vtanh.f32 %v1346_v19  ;;  %v2282_v20 = vld [vmem:[%s2676_s17 + $0x130] sm:$0xff] }
 0x875   : > { %2471 = vtanh.f32 %v1343_v21 }
 0x876   : > { %2473 = vtanh.f32 %v1354_v48 }
 0x87f   : > { %v2468_v57 = vpop.eup %2467 }
 0x880   : > { %v1349_v59 = vmul.f32 0.5, %v2468_v57 }
 0x881   : > { %v2470_v60 = vpop.eup %2469 }
 0x882   : > { %v1351_v61 = vadd.f32 0.5, %v1349_v59  ;;  %v1350_v62 = vmul.f32 0.5, %v2470_v60  ;;  %v2472_v29 = vpop.eup %2471  ;;  %v2283_v59 = vld [vmem:[%s2676_s17 + $0x138] sm:$0xff] }
 0x883   : > { %v2474_v8 = vpop.eup %2473 }
 0x884   : > { %v1352_v35 = vadd.f32 0.5, %v1350_v62  ;;  %v1359_v31 = vmul.f32 %v2472_v29, %v1351_v61  ;;  %v1356_v58 = vmul.f32 0.5, %v2474_v8 }
 0x886   : > { %v1358_v30 = vmul.f32 %v1352_v35, %v3367_v63  ;;  %v1357_v34 = vadd.f32 0.5, %v1356_v58  ;;  %v2280_v63 = vld [vmem:[%s2676_s17 + $0x120] sm:$0xff] }
 0x888   : > { %v3409_v32 = vadd.f32 %v1359_v31, %v1358_v30 }
 0x88a   : > { %2475 = vtanh.f32 %v3409_v32 }
 0x897   : > { %v2476_v9 = vpop.eup %2475 }
 0x898   : > { %v1362_v10 = vmul.f32 %v2476_v9, %v1357_v34 }
 0x89a   : > { %v1368_v11 = vpack.c.bf16 %v1362_v10, %v1362_v10 }
 0x89c   : > { %1402 = vmatmul.mubr.bf16.vlgmr.msra.gmra.mxu0 %v1368_v11  ;;  %1443 = vmatmul.mubr.bf16.vlgmr.msra.gmra.mxu1 %v1368_v11 }
 0x89d   : > { %1480 = vmatpush1.bf16.msra.mxu0 %v3134_v41  ;;  %1521 = vmatpush1.bf16.msra.mxu1 %v3140_v42 }
 0x89e   : > { %1481 = vmatprep.subr.bf16.mxu0 %v3146_v43  ;;  %1522 = vmatprep.subr.bf16.mxu1 %v3152_v45 }
 0x89f   : > { %1511 = vmatprep.mubr.bf16.mxu0 %v2636_v3  ;;  %1552 = vmatprep.mubr.bf16.mxu1 %v2636_v3 }
 0x8a1   : > { %1482 = vmatpush1.bf16.msra.mxu0 %v3160_v33  ;;  %1523 = vmatpush1.bf16.msra.mxu1 %v3166_v46 }
 0x8a2   : > { %1483 = vmatprep.subr.bf16.mxu0 %v3172_v47  ;;  %1524 = vmatprep.subr.bf16.mxu1 %v3178_v49 }
 0x8a5   : > { %1484 = vmatpush1.bf16.msra.mxu0 %v3184_v39  ;;  %1525 = vmatpush1.bf16.msra.mxu1 %v3190_v50 }
 0x8a6   : > { %1485 = vmatprep.subr.bf16.mxu0 %v3196_v51  ;;  %1526 = vmatprep.subr.bf16.mxu1 %v3202_v52 }
 0x8a9   : > { %1486 = vmatpush1.bf16.msra.mxu0 %v3208_v53  ;;  %1527 = vmatpush1.bf16.msra.mxu1 %v3214_v44 }
 0x8aa   : > { %1487 = vmatprep.subr.bf16.mxu0 %v3220_v54  ;;  %1528 = vmatprep.subr.bf16.mxu1 %v3226_v55 }
 0x8ad   : > { %1488 = vmatpush1.bf16.msra.mxu0 %v3232_v56  ;;  %1529 = vmatpush1.bf16.msra.mxu1 %v3238_v5 }
 0x8ae   : > { %1489 = vmatprep.subr.bf16.mxu0 %v3244_v6  ;;  %1530 = vmatprep.subr.bf16.mxu1 %v3250_v7 }
 0x8b1   : > { %1490 = vmatpush1.bf16.msra.mxu0 %v3303_v0  ;;  %1531 = vmatpush1.bf16.msra.mxu1 %v3309_v36 }
 0x8b2   : > { %1491 = vmatprep.subr.bf16.mxu0 %v3315_v37  ;;  %1532 = vmatprep.subr.bf16.mxu1 %v3321_v1 }
 0x8b5   : > { %1492 = vmatpush1.bf16.msra.mxu0 %v3327_v38  ;;  %1533 = vmatpush1.bf16.msra.mxu1 %v3333_v40 }
 0x8b6   : > { %1493 = vmatprep.subr.bf16.mxu0 %v3339_v25  ;;  %1534 = vmatprep.subr.bf16.mxu1 %v3345_v26 }
 0x8b9   : > { %1494 = vmatpush1.bf16.msra.mxu0 %v3351_v27  ;;  %1535 = vmatpush1.bf16.msra.mxu1 %v3357_v28 }
 0x8ba   : > { %1589 = vmatprep.subr.bf16.mxu0 %v3119_v2  ;;  %1630 = vmatprep.subr.bf16.mxu1 %v3267_v24 }
 0x95c   : > { %v1403_v12 = vpop.f32.mrf.mxu0  ;;  %v1444_v13 = vpop.f32.mrf.mxu1 }
 0x95d   : > { %v1451_v15 = vadd.f32 %v2280_v63, %v1403_v12  ;;  %v1453_v57 = vadd.f32 %v2282_v20, %v1444_v13 }
 0x95e   : > { %v1405_v16 = vpop.f32.mrf.mxu0  ;;  %v1446_v17 = vpop.f32.mrf.mxu1 }
 0x95f   : > { %v1455_v18 = vmul.f32 0.5, %v1451_v15  ;;  %v1452_v19 = vadd.f32 %v2281_v14, %v1405_v16  ;;  %v1454_v60 = vadd.f32 %v2283_v59, %v1446_v17 }
 0x960   : > { %v1407_v4 = vpop.f32.mrf.mxu0  ;;  %v1448_v21 = vpop.f32.mrf.mxu1 }
 0x961   : > { %2477 = vtanh.f32 %v1455_v18  ;;  %v1456_v22 = vmul.f32 0.5, %v1452_v19  ;;  %v1464_v61 = vmul.f32 0.5, %v1454_v60  ;;  %v2285_v18 = vld [vmem:[%s2676_s17 + $0x148] sm:$0xff] }
 0x962   : > { %v1408_v23 = vpop.f32.mrf.mxu0  ;;  %v1449_v48 = vpop.f32.mrf.mxu1 }
 0x963   : > { %2479 = vtanh.f32 %v1456_v22  ;;  %v2286_v23 = vld [vmem:[%s2676_s17 + $0x150] sm:$0xff] }
 0x964   : > { %2481 = vtanh.f32 %v1453_v57 }
 0x965   : > { %2483 = vtanh.f32 %v1464_v61 }
 0x96e   : > { %v2478_v62 = vpop.eup %2477 }
 0x96f   : > { %v1459_v35 = vmul.f32 0.5, %v2478_v62 }
 0x970   : > { %v2480_v29 = vpop.eup %2479 }
 0x971   : > { %v1461_v30 = vadd.f32 0.5, %v1459_v35  ;;  %v1460_v31 = vmul.f32 0.5, %v2480_v29  ;;  %v2482_v58 = vpop.eup %2481  ;;  %v2287_v35 = vld [vmem:[%s2676_s17 + $0x158] sm:$0xff] }
 0x972   : > { %v2484_v11 = vpop.eup %2483 }
 0x973   : > { %v1462_v8 = vadd.f32 0.5, %v1460_v31  ;;  %v1469_v9 = vmul.f32 %v2482_v58, %v1461_v30  ;;  %v1466_v63 = vmul.f32 0.5, %v2484_v11 }
 0x975   : > { %v1468_v34 = vmul.f32 %v1462_v8, %v3409_v32  ;;  %v1467_v12 = vadd.f32 0.5, %v1466_v63  ;;  %v2284_v32 = vld [vmem:[%s2676_s17 + $0x140] sm:$0xff] }
 0x977   : > { %v3451_v10 = vadd.f32 %v1469_v9, %v1468_v34 }
 0x979   : > { %2485 = vtanh.f32 %v3451_v10 }
 0x986   : > { %v2486_v13 = vpop.eup %2485 }
 0x987   : > { %v1472_v14 = vmul.f32 %v2486_v13, %v1467_v12 }
 0x989   : > { %v1478_v15 = vpack.c.bf16 %v1472_v14, %v1472_v14 }
 0x98b   : > { %1512 = vmatmul.mubr.bf16.vlgmr.msra.gmra.mxu0 %v1478_v15  ;;  %1553 = vmatmul.mubr.bf16.vlgmr.msra.gmra.mxu1 %v1478_v15 }
 0x98c   : > { %1590 = vmatpush1.bf16.msra.mxu0 %v3134_v41  ;;  %1631 = vmatpush1.bf16.msra.mxu1 %v3140_v42 }
 0x98d   : > { %1591 = vmatprep.subr.bf16.mxu0 %v3146_v43  ;;  %1632 = vmatprep.subr.bf16.mxu1 %v3152_v45 }
 0x98e   : > { %1621 = vmatprep.mubr.bf16.mxu0 %v2636_v3  ;;  %1662 = vmatprep.mubr.bf16.mxu1 %v2636_v3 }
 0x990   : > { %1592 = vmatpush1.bf16.msra.mxu0 %v3160_v33  ;;  %1633 = vmatpush1.bf16.msra.mxu1 %v3166_v46 }
 0x991   : > { %1593 = vmatprep.subr.bf16.mxu0 %v3172_v47  ;;  %1634 = vmatprep.subr.bf16.mxu1 %v3178_v49 }
 0x994   : > { %1594 = vmatpush1.bf16.msra.mxu0 %v3184_v39  ;;  %1635 = vmatpush1.bf16.msra.mxu1 %v3190_v50 }
 0x995   : > { %1595 = vmatprep.subr.bf16.mxu0 %v3196_v51  ;;  %1636 = vmatprep.subr.bf16.mxu1 %v3202_v52 }
 0x998   : > { %1596 = vmatpush1.bf16.msra.mxu0 %v3208_v53  ;;  %1637 = vmatpush1.bf16.msra.mxu1 %v3214_v44 }
 0x999   : > { %1597 = vmatprep.subr.bf16.mxu0 %v3220_v54  ;;  %1638 = vmatprep.subr.bf16.mxu1 %v3226_v55 }
 0x99c   : > { %1598 = vmatpush1.bf16.msra.mxu0 %v3232_v56  ;;  %1639 = vmatpush1.bf16.msra.mxu1 %v3238_v5 }
 0x99d   : > { %1599 = vmatprep.subr.bf16.mxu0 %v3244_v6  ;;  %1640 = vmatprep.subr.bf16.mxu1 %v3250_v7 }
 0x9a0   : > { %1600 = vmatpush1.bf16.msra.mxu0 %v3303_v0  ;;  %1641 = vmatpush1.bf16.msra.mxu1 %v3309_v36 }
 0x9a1   : > { %1601 = vmatprep.subr.bf16.mxu0 %v3315_v37  ;;  %1642 = vmatprep.subr.bf16.mxu1 %v3321_v1 }
 0x9a4   : > { %1602 = vmatpush1.bf16.msra.mxu0 %v3327_v38  ;;  %1643 = vmatpush1.bf16.msra.mxu1 %v3333_v40 }
 0x9a5   : > { %1603 = vmatprep.subr.bf16.mxu0 %v3339_v25  ;;  %1644 = vmatprep.subr.bf16.mxu1 %v3345_v26 }
 0x9a8   : > { %1604 = vmatpush1.bf16.msra.mxu0 %v3351_v27  ;;  %1645 = vmatpush1.bf16.msra.mxu1 %v3357_v28 }
 0x9a9   : > { %1699 = vmatprep.subr.bf16.mxu0 %v3119_v2  ;;  %1740 = vmatprep.subr.bf16.mxu1 %v3267_v24 }
 0xa4b   : > { %v1513_v16 = vpop.f32.mrf.mxu0  ;;  %v1554_v17 = vpop.f32.mrf.mxu1 }
 0xa4c   : > { %v1561_v19 = vadd.f32 %v2284_v32, %v1513_v16  ;;  %v1563_v62 = vadd.f32 %v2286_v23, %v1554_v17 }
 0xa4d   : > { %v1515_v20 = vpop.f32.mrf.mxu0  ;;  %v1556_v4 = vpop.f32.mrf.mxu1 }
 0xa4e   : > { %v1565_v21 = vmul.f32 0.5, %v1561_v19  ;;  %v1562_v22 = vadd.f32 %v2285_v18, %v1515_v20  ;;  %v1564_v29 = vadd.f32 %v2287_v35, %v1556_v4 }
 0xa4f   : > { %v1517_v48 = vpop.f32.mrf.mxu0  ;;  %v1558_v57 = vpop.f32.mrf.mxu1 }
 0xa50   : > { %2487 = vtanh.f32 %v1565_v21  ;;  %v1566_v59 = vmul.f32 0.5, %v1562_v22  ;;  %v1574_v30 = vmul.f32 0.5, %v1564_v29  ;;  %v2289_v21 = vld [vmem:[%s2676_s17 + $0x168] sm:$0xff] }
 0xa51   : > { %v1518_v60 = vpop.f32.mrf.mxu0  ;;  %v1559_v61 = vpop.f32.mrf.mxu1 }
 0xa52   : > { %2489 = vtanh.f32 %v1566_v59  ;;  %v2290_v60 = vld [vmem:[%s2676_s17 + $0x170] sm:$0xff] }
 0xa53   : > { %2491 = vtanh.f32 %v1563_v62 }
 0xa54   : > { %2493 = vtanh.f32 %v1574_v30 }
 0xa5d   : > { %v2488_v31 = vpop.eup %2487 }
 0xa5e   : > { %v1569_v8 = vmul.f32 0.5, %v2488_v31  ;;  %v2291_v31 = vld [vmem:[%s2676_s17 + $0x178] sm:$0xff] }
 0xa5f   : > { %v2490_v58 = vpop.eup %2489 }
 0xa60   : > { %v1571_v34 = vadd.f32 0.5, %v1569_v8  ;;  %v1570_v9 = vmul.f32 0.5, %v2490_v58  ;;  %v2492_v63 = vpop.eup %2491 }
 0xa61   : > { %v2494_v15 = vpop.eup %2493 }
 0xa62   : > { %v1572_v11 = vadd.f32 0.5, %v1570_v9  ;;  %v1579_v13 = vmul.f32 %v2492_v63, %v1571_v34  ;;  %v1576_v32 = vmul.f32 0.5, %v2494_v15 }
 0xa64   : > { %v1578_v12 = vmul.f32 %v1572_v11, %v3451_v10  ;;  %v1577_v16 = vadd.f32 0.5, %v1576_v32  ;;  %v2288_v10 = vld [vmem:[%s2676_s17 + $0x160] sm:$0xff] }
 0xa66   : > { %v3493_v14 = vadd.f32 %v1579_v13, %v1578_v12 }
 0xa68   : > { %2495 = vtanh.f32 %v3493_v14 }
 0xa75   : > { %v2496_v17 = vpop.eup %2495 }
 0xa76   : > { %v1582_v18 = vmul.f32 %v2496_v17, %v1577_v16 }
 0xa78   : > { %v1588_v19 = vpack.c.bf16 %v1582_v18, %v1582_v18 }
 0xa7a   : > { %1622 = vmatmul.mubr.bf16.vlgmr.msra.gmra.mxu0 %v1588_v19  ;;  %1663 = vmatmul.mubr.bf16.vlgmr.msra.gmra.mxu1 %v1588_v19 }
 0xa7b   : > { %1700 = vmatpush1.bf16.msra.mxu0 %v3134_v41  ;;  %1741 = vmatpush1.bf16.msra.mxu1 %v3140_v42 }
 0xa7c   : > { %1701 = vmatprep.subr.bf16.mxu0 %v3146_v43  ;;  %1742 = vmatprep.subr.bf16.mxu1 %v3152_v45 }
 0xa7d   : > { %1731 = vmatprep.mubr.bf16.mxu0 %v2636_v3  ;;  %1772 = vmatprep.mubr.bf16.mxu1 %v2636_v3 }
 0xa7f   : > { %1702 = vmatpush1.bf16.msra.mxu0 %v3160_v33  ;;  %1743 = vmatpush1.bf16.msra.mxu1 %v3166_v46 }
 0xa80   : > { %1703 = vmatprep.subr.bf16.mxu0 %v3172_v47  ;;  %1744 = vmatprep.subr.bf16.mxu1 %v3178_v49 }
 0xa83   : > { %1704 = vmatpush1.bf16.msra.mxu0 %v3184_v39  ;;  %1745 = vmatpush1.bf16.msra.mxu1 %v3190_v50 }
 0xa84   : > { %1705 = vmatprep.subr.bf16.mxu0 %v3196_v51  ;;  %1746 = vmatprep.subr.bf16.mxu1 %v3202_v52 }
 0xa87   : > { %1706 = vmatpush1.bf16.msra.mxu0 %v3208_v53  ;;  %1747 = vmatpush1.bf16.msra.mxu1 %v3214_v44 }
 0xa88   : > { %1707 = vmatprep.subr.bf16.mxu0 %v3220_v54  ;;  %1748 = vmatprep.subr.bf16.mxu1 %v3226_v55 }
 0xa8b   : > { %1708 = vmatpush1.bf16.msra.mxu0 %v3232_v56  ;;  %1749 = vmatpush1.bf16.msra.mxu1 %v3238_v5 }
 0xa8c   : > { %1709 = vmatprep.subr.bf16.mxu0 %v3244_v6  ;;  %1750 = vmatprep.subr.bf16.mxu1 %v3250_v7 }
 0xa8f   : > { %1710 = vmatpush1.bf16.msra.mxu0 %v3303_v0  ;;  %1751 = vmatpush1.bf16.msra.mxu1 %v3309_v36 }
 0xa90   : > { %1711 = vmatprep.subr.bf16.mxu0 %v3315_v37  ;;  %1752 = vmatprep.subr.bf16.mxu1 %v3321_v1 }
 0xa93   : > { %1712 = vmatpush1.bf16.msra.mxu0 %v3327_v38  ;;  %1753 = vmatpush1.bf16.msra.mxu1 %v3333_v40 }
 0xa94   : > { %1713 = vmatprep.subr.bf16.mxu0 %v3339_v25  ;;  %1754 = vmatprep.subr.bf16.mxu1 %v3345_v26 }
 0xa97   : > { %1714 = vmatpush1.bf16.msra.mxu0 %v3351_v27  ;;  %1755 = vmatpush1.bf16.msra.mxu1 %v3357_v28 }
 0xa98   : > { %1809 = vmatprep.subr.bf16.mxu0 %v3119_v2  ;;  %1850 = vmatprep.subr.bf16.mxu1 %v3267_v24 }
 0xb3a   : > { %v1623_v20 = vpop.f32.mrf.mxu0  ;;  %v1664_v4 = vpop.f32.mrf.mxu1 }
 0xb3b   : > { %v1671_v22 = vadd.f32 %v2288_v10, %v1623_v20  ;;  %v1673_v2 = vadd.f32 %v2290_v60, %v1664_v4 }
 0xb3c   : > { %v1625_v23 = vpop.f32.mrf.mxu0  ;;  %v1666_v48 = vpop.f32.mrf.mxu1 }
 0xb3d   : > { %v1675_v57 = vmul.f32 0.5, %v1671_v22  ;;  %v1672_v59 = vadd.f32 %v2289_v21, %v1625_v23  ;;  %v1674_v8 = vadd.f32 %v2291_v31, %v1666_v48 }
 0xb3e   : > { %v1627_v61 = vpop.f32.mrf.mxu0  ;;  %v1668_v62 = vpop.f32.mrf.mxu1 }
 0xb3f   : > { %2497 = vtanh.f32 %v1675_v57  ;;  %v1676_v35 = vmul.f32 0.5, %v1672_v59  ;;  %v1684_v58 = vmul.f32 0.5, %v1674_v8 }
 0xb40   : > { %v1628_v29 = vpop.f32.mrf.mxu0  ;;  %v1669_v30 = vpop.f32.mrf.mxu1 }
 0xb41   : > { %2499 = vtanh.f32 %v1676_v35 }
 0xb42   : > { %2501 = vtanh.f32 %v1673_v2 }
 0xb43   : > { %2503 = vtanh.f32 %v1684_v58  ;;  %v3588_v58 = vld [vmem:[%s3804_s1 + $0xe0] ss:$16 sps:$4 sm:$0xff]  }
 0xb4c   : > { %v2498_v34 = vpop.eup %2497 }
 0xb4d   : > { %v1679_v9 = vmul.f32 0.5, %v2498_v34  ;;  %v3594_v34 = vld [vmem:[%s3804_s1 + $0xe8] ss:$16 sps:$4 sm:$0xff]  }
 0xb4e   : > { %v2500_v11 = vpop.eup %2499 }
 0xb4f   : > { %v1681_v63 = vadd.f32 0.5, %v1679_v9  ;;  %v1680_v12 = vmul.f32 0.5, %v2500_v11  ;;  %v2502_v15 = vpop.eup %2501  ;;  %v3600_v9 = vld [vmem:[%s3804_s1 + $0xc4] ss:$16 sps:$4 sm:$0xff]   ;;  %v3606_v11 = vld [vmem:[%s3804_s1 + $0xcc] ss:$16 sps:$4 sm:$0xff]  }
 0xb50   : > { %v2504_v18 = vpop.eup %2503 }
 0xb51   : > { %v1682_v13 = vadd.f32 0.5, %v1680_v12  ;;  %v1689_v16 = vmul.f32 %v2502_v15, %v1681_v63  ;;  %v1686_v19 = vmul.f32 0.5, %v2504_v18  ;;  %v3614_v63 = vld [vmem:[%s3804_s1 + $0xc0] ss:$16 sps:$4 sm:$0xff]   ;;  %v3620_v12 = vld [vmem:[%s3804_s1 + $0xc8] ss:$16 sps:$4 sm:$0xff]  }
 0xb52   : > { %v3632_v15 = vld [vmem:[%s3804_s1 + $0xac] ss:$16 sps:$4 sm:$0xff]  }
 0xb53   : > { %v1688_v32 = vmul.f32 %v1682_v13, %v3493_v14  ;;  %v1687_v10 = vadd.f32 0.5, %v1686_v19  ;;  %v3626_v13 = vld [vmem:[%s3804_s1 + $0xa4] ss:$16 sps:$4 sm:$0xff]   ;;  %v3656_v18 = vld [vmem:[%s3804_s1 + $0x8c] ss:$16 sps:$4 sm:$0xff]  }
 0xb54   : > { %v3662_v19 = vld [vmem:[%s3804_s1 + $0x80] ss:$16 sps:$4 sm:$0xff]  }
 0xb55   : > { %v3535_v17 = vadd.f32 %v1689_v16, %v1688_v32  ;;  %v3638_v32 = vld [vmem:[%s3804_s1 + $0xa0] ss:$16 sps:$4 sm:$0xff]   ;;  %v3644_v16 = vld [vmem:[%s3804_s1 + $0xa8] ss:$16 sps:$4 sm:$0xff]  }
 0xb57   : > { %2505 = vtanh.f32 %v3535_v17 }
 0xb64   : > { %v2506_v20 = vpop.eup %2505 }
 0xb65   : > { %v1692_v4 = vmul.f32 %v2506_v20, %v1687_v10  ;;  %v3668_v10 = vld [vmem:[%s3804_s1 + $0x88] ss:$16 sps:$4 sm:$0xff]   ;;  %v3674_v20 = vld [vmem:[%s3804_s1 + $0x64] ss:$16 sps:$4 sm:$0xff]  }
 0xb67   : > { %v1698_v21 = vpack.c.bf16 %v1692_v4, %v1692_v4  ;;  %v3680_v4 = vld [vmem:[%s3804_s1 + $0x6c] ss:$16 sps:$4 sm:$0xff]  }
 0xb69   : > { %1732 = vmatmul.mubr.bf16.vlgmr.msra.gmra.mxu0 %v1698_v21  ;;  %1773 = vmatmul.mubr.bf16.vlgmr.msra.gmra.mxu1 %v1698_v21  ;;  %v3686_v21 = vld [vmem:[%s3804_s1 + $0x60] ss:$16 sps:$4 sm:$0xff]  }
 0xb6a   : > { %1810 = vmatpush1.bf16.msra.mxu0 %v3134_v41  ;;  %1851 = vmatpush1.bf16.msra.mxu1 %v3140_v42  ;;  %v3573_v41 = vld [vmem:[%s3804_s1 + $0xe4] ss:$16 sps:$4 sm:$0xff]  }
 0xb6b   : > { %1811 = vmatprep.subr.bf16.mxu0 %v3146_v43  ;;  %1852 = vmatprep.subr.bf16.mxu1 %v3152_v45  ;;  %v2292_v42 = vld [vmem:[%s2676_s17 + $0x180] sm:$0xff] }
 0xb6c   : > { %1841 = vmatprep.mubr.bf16.mxu0 %v2636_v3  ;;  %1882 = vmatprep.mubr.bf16.mxu1 %v2636_v3 }
 0xb6e   : > { %1812 = vmatpush1.bf16.msra.mxu0 %v3160_v33  ;;  %1853 = vmatpush1.bf16.msra.mxu1 %v3166_v46  ;;  %v2293_v33 = vld [vmem:[%s2676_s17 + $0x188] sm:$0xff] }
 0xb6f   : > { %1813 = vmatprep.subr.bf16.mxu0 %v3172_v47  ;;  %1854 = vmatprep.subr.bf16.mxu1 %v3178_v49 }
 0xb72   : > { %1814 = vmatpush1.bf16.msra.mxu0 %v3184_v39  ;;  %1855 = vmatpush1.bf16.msra.mxu1 %v3190_v50 }
 0xb73   : > { %1815 = vmatprep.subr.bf16.mxu0 %v3196_v51  ;;  %1856 = vmatprep.subr.bf16.mxu1 %v3202_v52  ;;  %v2294_v51 = vld [vmem:[%s2676_s17 + $0x190] sm:$0xff] }
 0xb76   : > { %1816 = vmatpush1.bf16.msra.mxu0 %v3208_v53  ;;  %1857 = vmatpush1.bf16.msra.mxu1 %v3214_v44 }
 0xb77   : > { %1817 = vmatprep.subr.bf16.mxu0 %v3220_v54  ;;  %1858 = vmatprep.subr.bf16.mxu1 %v3226_v55 }
 0xb7a   : > { %1818 = vmatpush1.bf16.msra.mxu0 %v3232_v56  ;;  %1859 = vmatpush1.bf16.msra.mxu1 %v3238_v5  ;;  %v2295_v5 = vld [vmem:[%s2676_s17 + $0x198] sm:$0xff] }
 0xb7b   : > { %1819 = vmatprep.subr.bf16.mxu0 %v3244_v6  ;;  %1860 = vmatprep.subr.bf16.mxu1 %v3250_v7 }
 0xb7e   : > { %1820 = vmatpush1.bf16.msra.mxu0 %v3303_v0  ;;  %1861 = vmatpush1.bf16.msra.mxu1 %v3309_v36 }
 0xb7f   : > { %1821 = vmatprep.subr.bf16.mxu0 %v3315_v37  ;;  %1862 = vmatprep.subr.bf16.mxu1 %v3321_v1 }
 0xb82   : > { %1822 = vmatpush1.bf16.msra.mxu0 %v3327_v38  ;;  %1863 = vmatpush1.bf16.msra.mxu1 %v3333_v40 }
 0xb83   : > { %1823 = vmatprep.subr.bf16.mxu0 %v3339_v25  ;;  %1864 = vmatprep.subr.bf16.mxu1 %v3345_v26 }
 0xb86   : > { %1824 = vmatpush1.bf16.msra.mxu0 %v3351_v27  ;;  %1865 = vmatpush1.bf16.msra.mxu1 %v3357_v28 }
 0xb87   : > { %1919 = vmatprep.subr.bf16.mxu0 %v3573_v41  ;;  %1960 = vmatprep.subr.bf16.mxu1 %v3267_v24 }
 0xc29   : > { %v1733_v43 = vpop.f32.mrf.mxu0  ;;  %v1774_v45 = vpop.f32.mrf.mxu1 }
 0xc2a   : > { %v1781_v46 = vadd.f32 %v2292_v42, %v1733_v43  ;;  %v1783_v56 = vadd.f32 %v2294_v51, %v1774_v45  ;;  %v3692_v42 = vld [vmem:[%s3804_s1 + $0x68] ss:$16 sps:$4 sm:$0xff]   ;;  %v3698_v43 = vld [vmem:[%s3804_s1 + $0x44] ss:$16 sps:$4 sm:$0xff]   ;;  %v3704_v45 = vld [vmem:[%s3804_s1 + $0x4c] ss:$16 sps:$4 sm:$0xff]  }
 0xc2b   : > { %v1735_v47 = vpop.f32.mrf.mxu0  ;;  %v1776_v49 = vpop.f32.mrf.mxu1  ;;  %v2299_v51 = vld [vmem:[%s2676_s17 + $0x1b8] sm:$0xff] }
 0xc2c   : > { %v1785_v39 = vmul.f32 0.5, %v1781_v46  ;;  %v1782_v50 = vadd.f32 %v2293_v33, %v1735_v47  ;;  %v1784_v6 = vadd.f32 %v2295_v5, %v1776_v49 }
 0xc2d   : > { %v1737_v52 = vpop.f32.mrf.mxu0  ;;  %v1778_v53 = vpop.f32.mrf.mxu1 }
 0xc2e   : > { %2507 = vtanh.f32 %v1785_v39  ;;  %v1786_v44 = vmul.f32 0.5, %v1782_v50  ;;  %v1794_v7 = vmul.f32 0.5, %v1784_v6 }
 0xc2f   : > { %v1738_v54 = vpop.f32.mrf.mxu0  ;;  %v1779_v55 = vpop.f32.mrf.mxu1 }
 0xc30   : > { %2509 = vtanh.f32 %v1786_v44 }
 0xc31   : > { %2511 = vtanh.f32 %v1783_v56 }
 0xc32   : > { %2513 = vtanh.f32 %v1794_v7 }
 0xc3b   : > { %v2508_v24 = vpop.eup %2507 }
 0xc3c   : > { %v1789_v14 = vmul.f32 0.5, %v2508_v24 }
 0xc3d   : > { %v2510_v22 = vpop.eup %2509 }
 0xc3e   : > { %v1791_v23 = vadd.f32 0.5, %v1789_v14  ;;  %v1790_v48 = vmul.f32 0.5, %v2510_v22  ;;  %v2512_v59 = vpop.eup %2511 }
 0xc3f   : > { %v2514_v35 = vpop.eup %2513 }
 0xc40   : > { %v1792_v57 = vadd.f32 0.5, %v1790_v48  ;;  %v1799_v61 = vmul.f32 %v2512_v59, %v1791_v23  ;;  %v1796_v29 = vmul.f32 0.5, %v2514_v35  ;;  %v2603_v35 = vld [vmem:[%s3804_s1 + $0x24] ss:$16 sps:$4 sm:$0xff]  }
 0xc42   : > { %v1798_v60 = vmul.f32 %v1792_v57, %v3535_v17  ;;  %v1797_v30 = vadd.f32 0.5, %v1796_v29  ;;  %v3650_v17 = vld [vmem:[%s3804_s1 + $0x84] ss:$16 sps:$4 sm:$0xff]   ;;  %v2604_v29 = vld [vmem:[%s3804_s1 + $0x2c] ss:$16 sps:$4 sm:$0xff]  }
 0xc44   : > { %v3582_v62 = vadd.f32 %v1799_v61, %v1798_v60 }
 0xc46   : > { %2515 = vtanh.f32 %v3582_v62 }
 0xc53   : > { %v2516_v2 = vpop.eup %2515 }
 0xc54   : > { %v1802_v31 = vmul.f32 %v2516_v2, %v1797_v30  ;;  %v2605_v30 = vld [vmem:[%s3804_s1 + $0x20] ss:$16 sps:$4 sm:$0xff]   ;;  %v2606_v2 = vld [vmem:[%s3804_s1 + $0x28] ss:$16 sps:$4 sm:$0xff]  }
 0xc56   : > { %v1808_v8 = vpack.c.bf16 %v1802_v31, %v1802_v31  ;;  %v2607_v31 = vld [vmem:[%s3804_s1 + $0x4] ss:$16 sps:$4 sm:$0xff]  }
 0xc58   : > { %1842 = vmatmul.mubr.bf16.vlgmr.msra.gmra.mxu0 %v1808_v8  ;;  %1883 = vmatmul.mubr.bf16.vlgmr.msra.gmra.mxu1 %v1808_v8  ;;  %v2608_v8 = vld [vmem:[%s3804_s1 + $0xc] ss:$16 sps:$4 sm:$0xff]  }
 0xc59   : > { %1920 = vmatpush1.bf16.msra.mxu0 %v3588_v58  ;;  %1961 = vmatpush1.bf16.msra.mxu1 %v3594_v34 }
 0xc5a   : > { %1921 = vmatprep.subr.bf16.mxu0 %v3600_v9  ;;  %1962 = vmatprep.subr.bf16.mxu1 %v3606_v11 }
 0xc5b   : > { %1951 = vmatprep.mubr.bf16.mxu0 %v2636_v3  ;;  %1992 = vmatprep.mubr.bf16.mxu1 %v2636_v3 }
 0xc5d   : > { %1922 = vmatpush1.bf16.msra.mxu0 %v3614_v63  ;;  %1963 = vmatpush1.bf16.msra.mxu1 %v3620_v12 }
 0xc5e   : > { %1923 = vmatprep.subr.bf16.mxu0 %v3626_v13  ;;  %1964 = vmatprep.subr.bf16.mxu1 %v3632_v15 }
 0xc61   : > { %1924 = vmatpush1.bf16.msra.mxu0 %v3638_v32  ;;  %1965 = vmatpush1.bf16.msra.mxu1 %v3644_v16 }
 0xc62   : > { %1925 = vmatprep.subr.bf16.mxu0 %v3650_v17  ;;  %1966 = vmatprep.subr.bf16.mxu1 %v3656_v18 }
 0xc65   : > { %1926 = vmatpush1.bf16.msra.mxu0 %v3662_v19  ;;  %1967 = vmatpush1.bf16.msra.mxu1 %v3668_v10 }
 0xc66   : > { %1927 = vmatprep.subr.bf16.mxu0 %v3674_v20  ;;  %1968 = vmatprep.subr.bf16.mxu1 %v3680_v4 }
 0xc69   : > { %1928 = vmatpush1.bf16.msra.mxu0 %v3686_v21  ;;  %1969 = vmatpush1.bf16.msra.mxu1 %v3692_v42 }
 0xc6a   : > { %1929 = vmatprep.subr.bf16.mxu0 %v3698_v43  ;;  %1970 = vmatprep.subr.bf16.mxu1 %v3704_v45 }
 0xc6d   : > { %1930 = vmatpush1.bf16.msra.mxu0 %v3303_v0  ;;  %1971 = vmatpush1.bf16.msra.mxu1 %v3309_v36  ;;  %v2600_v0 = vld [vmem:[%s3804_s1 + $0xec] ss:$16 sps:$4 sm:$0xff]   ;;  %v2296_v36 = vld [vmem:[%s2676_s17 + $0x1a0] sm:$0xff] }
 0xc6e   : > { %1931 = vmatprep.subr.bf16.mxu0 %v3315_v37  ;;  %1972 = vmatprep.subr.bf16.mxu1 %v3321_v1 }
 0xc71   : > { %1932 = vmatpush1.bf16.msra.mxu0 %v3327_v38  ;;  %1973 = vmatpush1.bf16.msra.mxu1 %v3333_v40  ;;  %v2297_v38 = vld [vmem:[%s2676_s17 + $0x1a8] sm:$0xff] }
 0xc72   : > { %1933 = vmatprep.subr.bf16.mxu0 %v3339_v25  ;;  %1974 = vmatprep.subr.bf16.mxu1 %v3345_v26 }
 0xc75   : > { %1934 = vmatpush1.bf16.msra.mxu0 %v3351_v27  ;;  %1975 = vmatpush1.bf16.msra.mxu1 %v3357_v28  ;;  %v2298_v27 = vld [vmem:[%s2676_s17 + $0x1b0] sm:$0xff] }
 0xc76   : > { %2029 = vmatprep.subr.bf16.mxu0 %v3573_v41  ;;  %2070 = vmatprep.subr.bf16.mxu1 %v2600_v0 }
 0xd18   : > { %v1843_v37 = vpop.f32.mrf.mxu0  ;;  %v1884_v1 = vpop.f32.mrf.mxu1 }
 0xd19   : > { %v1891_v40 = vadd.f32 %v2296_v36, %v1843_v37  ;;  %v1893_v50 = vadd.f32 %v2298_v27, %v1884_v1 }
 0xd1a   : > { %v1845_v25 = vpop.f32.mrf.mxu0  ;;  %v1886_v33 = vpop.f32.mrf.mxu1 }
 0xd1b   : > { %v1895_v26 = vmul.f32 0.5, %v1891_v40  ;;  %v1892_v46 = vadd.f32 %v2297_v38, %v1845_v25  ;;  %v1894_v52 = vadd.f32 %v2299_v51, %v1886_v33  ;;  %v2304_v51 = vld [vmem:[%s2676_s17 + $0x1e0] sm:$0xff] }
 0xd1c   : > { %v1847_v47 = vpop.f32.mrf.mxu0  ;;  %v1888_v28 = vpop.f32.mrf.mxu1 }
 0xd1d   : > { %2517 = vtanh.f32 %v1895_v26  ;;  %v1896_v41 = vmul.f32 0.5, %v1892_v46  ;;  %v1904_v53 = vmul.f32 0.5, %v1894_v52 }
 0xd1e   : > { %v1848_v49 = vpop.f32.mrf.mxu0  ;;  %v1889_v39 = vpop.f32.mrf.mxu1 }
 0xd1f   : > { %2519 = vtanh.f32 %v1896_v41 }
 0xd20   : > { %2521 = vtanh.f32 %v1893_v50 }
 0xd21   : > { %2523 = vtanh.f32 %v1904_v53 }
 0xd2a   : > { %v2518_v44 = vpop.eup %2517 }
 0xd2b   : > { %v1899_v54 = vmul.f32 0.5, %v2518_v44  ;;  %v2305_v44 = vld [vmem:[%s2676_s17 + $0x1e8] sm:$0xff] }
 0xd2c   : > { %v2520_v55 = vpop.eup %2519 }
 0xd2d   : > { %v1901_v56 = vadd.f32 0.5, %v1899_v54  ;;  %v1900_v5 = vmul.f32 0.5, %v2520_v55  ;;  %v2522_v7 = vpop.eup %2521 }
 0xd2e   : > { %v2524_v23 = vpop.eup %2523 }
 0xd2f   : > { %v1902_v6 = vadd.f32 0.5, %v1900_v5  ;;  %v1909_v14 = vmul.f32 %v2522_v7, %v1901_v56  ;;  %v1906_v48 = vmul.f32 0.5, %v2524_v23  ;;  %v2306_v7 = vld [vmem:[%s2676_s17 + $0x1f0] sm:$0xff] }
 0xd31   : > { %v1908_v24 = vmul.f32 %v1902_v6, %v3582_v62  ;;  %v1907_v57 = vadd.f32 0.5, %v1906_v48  ;;  %v2602_v62 = vld [vmem:[%s3804_s1 + $0x48] ss:$16 sps:$4 sm:$0xff]  }
 0xd33   : > { %v3726_v22 = vadd.f32 %v1909_v14, %v1908_v24 }
 0xd35   : > { %2525 = vtanh.f32 %v3726_v22 }
 0xd42   : > { %v2526_v59 = vpop.eup %2525 }
 0xd43   : > { %v1912_v60 = vmul.f32 %v2526_v59, %v1907_v57  ;;  %v2307_v59 = vld [vmem:[%s2676_s17 + $0x1f8] sm:$0xff] }
 0xd45   : > { %v1918_v61 = vpack.c.bf16 %v1912_v60, %v1912_v60 }
 0xd47   : > { %1952 = vmatmul.mubr.bf16.vlgmr.msra.gmra.mxu0 %v1918_v61  ;;  %1993 = vmatmul.mubr.bf16.vlgmr.msra.gmra.mxu1 %v1918_v61 }
 0xd48   : > { %2030 = vmatpush1.bf16.msra.mxu0 %v3588_v58  ;;  %2071 = vmatpush1.bf16.msra.mxu1 %v3594_v34  ;;  %v2609_v58 = vld [vmem:[%s3804_s1] ss:$16 sps:$4 sm:$0xff]   ;;  %v2610_v34 = vld [vmem:[%s3804_s1 + $0x8] ss:$16 sps:$4 sm:$0xff]  }
 0xd49   : > { %2031 = vmatprep.subr.bf16.mxu0 %v3600_v9  ;;  %2072 = vmatprep.subr.bf16.mxu1 %v3606_v11  ;;  %v2300_v9 = vld [vmem:[%s2676_s17 + $0x1c0] sm:$0xff] }
 0xd4a   : > { %2061 = vmatprep.mubr.bf16.mxu0 %v2636_v3  ;;  %2102 = vmatprep.mubr.bf16.mxu1 %v2636_v3  ;;  %v2601_v3 = vld [vmem:[%s3804_s1 + $0x40] ss:$16 sps:$4 sm:$0xff]  }
 0xd4c   : > { %2032 = vmatpush1.bf16.msra.mxu0 %v3614_v63  ;;  %2073 = vmatpush1.bf16.msra.mxu1 %v3620_v12  ;;  %v2301_v12 = vld [vmem:[%s2676_s17 + $0x1c8] sm:$0xff] }
 0xd4d   : > { %2033 = vmatprep.subr.bf16.mxu0 %v3626_v13  ;;  %2074 = vmatprep.subr.bf16.mxu1 %v3632_v15 }
 0xd50   : > { %2034 = vmatpush1.bf16.msra.mxu0 %v3638_v32  ;;  %2075 = vmatpush1.bf16.msra.mxu1 %v3644_v16 }
 0xd51   : > { %2035 = vmatprep.subr.bf16.mxu0 %v3650_v17  ;;  %2076 = vmatprep.subr.bf16.mxu1 %v3656_v18  ;;  %v2302_v18 = vld [vmem:[%s2676_s17 + $0x1d0] sm:$0xff] }
 0xd54   : > { %2036 = vmatpush1.bf16.msra.mxu0 %v3662_v19  ;;  %2077 = vmatpush1.bf16.msra.mxu1 %v3668_v10 }
 0xd55   : > { %2037 = vmatprep.subr.bf16.mxu0 %v3674_v20  ;;  %2078 = vmatprep.subr.bf16.mxu1 %v3680_v4 }
 0xd58   : > { %2038 = vmatpush1.bf16.msra.mxu0 %v3686_v21  ;;  %2079 = vmatpush1.bf16.msra.mxu1 %v3692_v42 }
 0xd59   : > { %2039 = vmatprep.subr.bf16.mxu0 %v3698_v43  ;;  %2080 = vmatprep.subr.bf16.mxu1 %v3704_v45  ;;  %v2303_v43 = vld [vmem:[%s2676_s17 + $0x1d8] sm:$0xff] }
 0xd5c   : > { %2040 = vmatpush1.bf16.msra.mxu0 %v2601_v3  ;;  %2081 = vmatpush1.bf16.msra.mxu1 %v2602_v62 }
 0xd5d   : > { %2041 = vmatprep.subr.bf16.mxu0 %v2603_v35  ;;  %2082 = vmatprep.subr.bf16.mxu1 %v2604_v29 }
 0xd60   : > { %2042 = vmatpush1.bf16.msra.mxu0 %v2605_v30  ;;  %2083 = vmatpush1.bf16.msra.mxu1 %v2606_v2 }
 0xd61   : > { %2043 = vmatprep.subr.bf16.mxu0 %v2607_v31  ;;  %2084 = vmatprep.subr.bf16.mxu1 %v2608_v8 }
 0xd64   : > { %2044 = vmatpush1.bf16.msra.mxu0 %v2609_v58  ;;  %2085 = vmatpush1.bf16.msra.mxu1 %v2610_v34 }
 0xe07   : > { %v1953_v11 = vpop.f32.mrf.mxu0  ;;  %v1994_v63 = vpop.f32.mrf.mxu1 }
 0xe08   : > { %v2001_v13 = vadd.f32 %v2300_v9, %v1953_v11  ;;  %v2003_v42 = vadd.f32 %v2302_v18, %v1994_v63 }
 0xe09   : > { %v1955_v15 = vpop.f32.mrf.mxu0  ;;  %v1996_v32 = vpop.f32.mrf.mxu1 }
 0xe0a   : > { %v2005_v16 = vmul.f32 0.5, %v2001_v13  ;;  %v2002_v17 = vadd.f32 %v2301_v12, %v1955_v15  ;;  %v2004_v45 = vadd.f32 %v2303_v43, %v1996_v32 }
 0xe0b   : > { %v1957_v19 = vpop.f32.mrf.mxu0  ;;  %v1998_v10 = vpop.f32.mrf.mxu1 }
 0xe0c   : > { %2527 = vtanh.f32 %v2005_v16  ;;  %v2006_v20 = vmul.f32 0.5, %v2002_v17  ;;  %v2014_v0 = vmul.f32 0.5, %v2004_v45 }
 0xe0d   : > { %v1958_v4 = vpop.f32.mrf.mxu0  ;;  %v1999_v21 = vpop.f32.mrf.mxu1 }
 0xe0e   : > { %2529 = vtanh.f32 %v2006_v20 }
 0xe0f   : > { %2531 = vtanh.f32 %v2003_v42 }
 0xe10   : > { %2533 = vtanh.f32 %v2014_v0 }
 0xe19   : > { %v2528_v36 = vpop.eup %2527 }
 0xe1a   : > { %v2009_v37 = vmul.f32 0.5, %v2528_v36 }
 0xe1b   : > { %v2530_v1 = vpop.eup %2529 }
 0xe1c   : > { %v2011_v38 = vadd.f32 0.5, %v2009_v37  ;;  %v2010_v40 = vmul.f32 0.5, %v2530_v1  ;;  %v2532_v33 = vpop.eup %2531 }
 0xe1d   : > { %v2534_v47 = vpop.eup %2533 }
 0xe1e   : > { %v2012_v25 = vadd.f32 0.5, %v2010_v40  ;;  %v2019_v46 = vmul.f32 %v2532_v33, %v2011_v38  ;;  %v2016_v28 = vmul.f32 0.5, %v2534_v47 }
 0xe20   : > { %v2018_v26 = vmul.f32 %v2012_v25, %v3726_v22  ;;  %v2017_v41 = vadd.f32 0.5, %v2016_v28 }
 0xe22   : > { %v2020_v27 = vadd.f32 %v2019_v46, %v2018_v26 }
 0xe24   : > { %2535 = vtanh.f32 %v2020_v27 }
 0xe31   : > { %v2536_v49 = vpop.eup %2535 }
 0xe32   : > { %v2022_v39 = vmul.f32 %v2536_v49, %v2017_v41 }
 0xe34   : > { %v2028_v50 = vpack.c.bf16 %v2022_v39, %v2022_v39 }
 0xe36   : > { %2062 = vmatmul.mubr.bf16.vlgmr.msra.gmra.mxu0 %v2028_v50  ;;  %2103 = vmatmul.mubr.bf16.vlgmr.msra.gmra.mxu1 %v2028_v50 }
 0xef6   : > { %v2063_v52 = vpop.f32.mrf.mxu0  ;;  %v2104_v53 = vpop.f32.mrf.mxu1 }
 0xef7   : > { %v2111_v54 = vadd.f32 %v2304_v51, %v2063_v52  ;;  %v2113_v57 = vadd.f32 %v2306_v7, %v2104_v53 }
 0xef8   : > { %v2065_v55 = vpop.f32.mrf.mxu0  ;;  %v2106_v56 = vpop.f32.mrf.mxu1 }
 0xef9   : > { %v2115_v5 = vmul.f32 0.5, %v2111_v54  ;;  %v2112_v6 = vadd.f32 %v2305_v44, %v2065_v55  ;;  %v2114_v60 = vadd.f32 %v2307_v59, %v2106_v56 }
 0xefa   : > { %v2067_v24 = vpop.f32.mrf.mxu0  ;;  %v2108_v14 = vpop.f32.mrf.mxu1 }
 0xefb   : > { %2537 = vtanh.f32 %v2115_v5  ;;  %v2116_v22 = vmul.f32 0.5, %v2112_v6  ;;  %v2124_v61 = vmul.f32 0.5, %v2114_v60 }
 0xefc   : > { %v2068_v23 = vpop.f32.mrf.mxu0  ;;  %v2109_v48 = vpop.f32.mrf.mxu1 }
 0xefd   : > { %2539 = vtanh.f32 %v2116_v22 }
 0xefe   : > { %2541 = vtanh.f32 %v2113_v57 }
 0xeff   : > { %2543 = vtanh.f32 %v2124_v61 }
 0xf08   : > { %v2538_v3 = vpop.eup %2537 }
 0xf09   : > { %v2119_v62 = vmul.f32 0.5, %v2538_v3 }
 0xf0a   : > { %v2540_v35 = vpop.eup %2539 }
 0xf0b   : > { %v2121_v29 = vadd.f32 0.5, %v2119_v62  ;;  %v2120_v30 = vmul.f32 0.5, %v2540_v35  ;;  %v2542_v31 = vpop.eup %2541 }
 0xf0c   : > { %v2544_v9 = vpop.eup %2543 }
 0xf0d   : > { %v2122_v2 = vadd.f32 0.5, %v2120_v30  ;;  %v2129_v58 = vmul.f32 %v2542_v31, %v2121_v29  ;;  %v2126_v11 = vmul.f32 0.5, %v2544_v9 }
 0xf0f   : > { %v2128_v8 = vmul.f32 %v2122_v2, %v2020_v27  ;;  %v2127_v63 = vadd.f32 0.5, %v2126_v11 }
 0xf11   : > { %v2130_v34 = vadd.f32 %v2129_v58, %v2128_v8 }
 0xf13   : > { %2545 = vtanh.f32 %v2130_v34  ;;  %2134 = vst [vmem:[#allocation3] sm:$0xff] %v2130_v34 }
 0xf1f   : > { %2138 = sbr.rel (%p2308_p6) target bundleno = 3877 (0xf25), region = 36 }
 0xf20   : > { %v2546_v12 = vpop.eup %2545 }
 0xf21   : > { %v2132_v13 = vmul.f32 %v2546_v12, %v2127_v63 }
 0xf23   : > { %2133 = vst [vmem:[#allocation2] sm:$0xff] %v2132_v13 }
 0xf24   : > { %2139 = vst [vmem:[%s3805_s2] sm:$0xff] %v2132_v13 }
 0xf25 PF: > { %s12_s11 = sadd.s32 1, %s2633_s11   ;;  %s3806_s9 = smov %s2629_s10 }
 0xf26   : > { %p9_p7 = scmp.ge.s32.totalorder %s12_s11, 4   ;;  %s3807_s10 = smov %s3809_s12 }
 0xf28   :  { %11 = sbr.rel (!%p9_p7) target bundleno = 2 (0x2), region = 81 }

</bundles_post_ra>
